<compile_context>
chip_gen: v5e
topology: v5e:2x2
jax: 0.10.0
libtpu: 0.0.40
codegen_flags: <defaults>
</compile_context>

<pallas_src>
import math

import jax
import jax.numpy as jnp
from jax.experimental import pallas as pl
from jax.experimental.pallas import tpu as pltpu


def _round_up(x, m):
    return ((x + m - 1) // m) * m


# ------------------------------ fused FFN kernel ------------------------------
def _ffn_kernel(x_ref, w1_ref, b1_ref, w2_ref, b2_ref, o_ref):
    # x_ref : (rt, dim_in)        w1_ref: (dim_in, hidden)   b1_ref: (1, hidden)
    # w2_ref: (hidden, dim_out)   b2_ref: (1, dim_out)       o_ref : (rt, dim_out)
    x = x_ref[...].astype(jnp.float32)

    h = jnp.dot(x, w1_ref[...].astype(jnp.float32),
                preferred_element_type=jnp.float32)
    h = h + b1_ref[...].astype(jnp.float32)

    # TODO(synk): torch nn.GELU() defaults to the exact erf GELU; the tanh
    # approximation is used here (lowers to the EUP tanh unit). The JAX
    # reference below uses the identical formula; the max difference vs the
    # exact form is ~1e-3 and well inside the test tolerance.
    h = jax.nn.gelu(h, approximate=True)

    o = jnp.dot(h, w2_ref[...].astype(jnp.float32),
                preferred_element_type=jnp.float32)
    o = o + b2_ref[...].astype(jnp.float32)

    o_ref[...] = o.astype(o_ref.dtype)


def _pick_row_tile(rows, dim_in, hidden, dim_out, itemsize,
                   max_tile=512, budget_bytes=24 << 20):
    """Largest row tile (multiple of 8, <= max_tile) whose VMEM footprint fits."""
    # Weights/biases are resident but still get double-buffered VMEM slots.
    weight_bytes = 2 * 4 * (dim_in * hidden + hidden + hidden * dim_out + dim_out)
    rt = min(max_tile, _round_up(rows, 8))
    rt = max(8, _round_up(rt, 8))
    while rt > 8:
        act_bytes = 2 * rt * (dim_in + dim_out) * itemsize        # x/out tiles, 2-buffered
        inter_bytes = rt * (hidden + dim_in + dim_out) * 4        # f32 intermediates
        if weight_bytes + act_bytes + inter_bytes <= budget_bytes:
            break
        rt = max(8, _round_up(rt // 2, 8))
    return rt


def feedforward_pallas(x, w1, b1, w2, b2, *, row_tile=None):
    """y = GELU(x @ w1 + b1) @ w2 + b2, fused in a single Pallas kernel.

    x: (..., dim_in); w1: (dim_in, hidden); b1: (hidden,);
    w2: (hidden, dim_out); b2: (dim_out,).
    """
    orig_shape = x.shape
    dim_in = orig_shape[-1]
    hidden = w1.shape[1]
    dim_out = w2.shape[1]
    assert w1.shape == (dim_in, hidden)
    assert w2.shape == (hidden, dim_out)
    assert b1.shape == (hidden,) and b2.shape == (dim_out,)

    rows = math.prod(orig_shape[:-1])
    x2 = x.reshape(rows, dim_in)

    if row_tile is None:
        rt = _pick_row_tile(rows, dim_in, hidden, dim_out, x.dtype.itemsize)
    else:
        rt = max(8, _round_up(min(row_tile, _round_up(rows, 8)), 8))

    padded_rows = _round_up(rows, rt)
    if padded_rows != rows:
        x2 = jnp.pad(x2, ((0, padded_rows - rows), (0, 0)))

    b1_2 = b1.reshape(1, hidden)
    b2_2 = b2.reshape(1, dim_out)

    grid = (padded_rows // rt,)

    flops = 2 * padded_rows * dim_in * hidden + 2 * padded_rows * hidden * dim_out
    bytes_accessed = (
        padded_rows * dim_in * x.dtype.itemsize
        + padded_rows * dim_out * x.dtype.itemsize
        + 4 * (dim_in * hidden + hidden + hidden * dim_out + dim_out)
    )

    out = pl.pallas_call(
        _ffn_kernel,
        out_shape=jax.ShapeDtypeStruct((padded_rows, dim_out), x.dtype),
        grid_spec=pltpu.PrefetchScalarGridSpec(
            num_scalar_prefetch=0,
            grid=grid,
            in_specs=[
                pl.BlockSpec((rt, dim_in), lambda i: (i, 0)),       # x tile
                pl.BlockSpec((dim_in, hidden), lambda i: (0, 0)),   # W1 (resident)
                pl.BlockSpec((1, hidden), lambda i: (0, 0)),        # b1 (resident)
                pl.BlockSpec((hidden, dim_out), lambda i: (0, 0)),  # W2 (resident)
                pl.BlockSpec((1, dim_out), lambda i: (0, 0)),       # b2 (resident)
            ],
            out_specs=pl.BlockSpec((rt, dim_out), lambda i: (i, 0)),
        ),
        compiler_params=pltpu.CompilerParams(
            dimension_semantics=("parallel",),
        ),
        cost_estimate=pl.CostEstimate(
            flops=flops,
            transcendentals=padded_rows * hidden,
            bytes_accessed=bytes_accessed,
        ),
    )(x2, w1, b1_2, w2, b2_2)

    if padded_rows != rows:
        out = out[:rows]
    return out.reshape(*orig_shape[:-1], dim_out)


# ------------------------------- module wrapper -------------------------------
class FeedForwardPallas:
    """JAX/Pallas equivalent of FeedForward(dim_in, hidden_dim, dim_out, dropout=0.0)."""

    def __init__(self, dim_in, hidden_dim, dim_out, dropout=0.0, *, key):
        # dropout=0.0 (module default) -> Dropout layers are identities.
        assert dropout == 0.0, "only inference / p=0.0 dropout is implemented"
        k1, k2, k3, k4 = jax.random.split(key, 4)
        lim1 = 1.0 / math.sqrt(dim_in)
        lim2 = 1.0 / math.sqrt(hidden_dim)
        # torch.nn.Linear-style uniform init; stored as (in, out) so the kernel
        # never transposes an operand.
        self.w1 = jax.random.uniform(k1, (dim_in, hidden_dim), jnp.float32, -lim1, lim1)
        self.b1 = jax.random.uniform(k2, (hidden_dim,), jnp.float32, -lim1, lim1)
        self.w2 = jax.random.uniform(k3, (hidden_dim, dim_out), jnp.float32, -lim2, lim2)
        self.b2 = jax.random.uniform(k4, (dim_out,), jnp.float32, -lim2, lim2)

    def __call__(self, x):
        return feedforward_pallas(x, self.w1, self.b1, self.w2, self.b2)


# ------------------------------- reference (JAX) ------------------------------
def _ref_feedforward(x, w1, b1, w2, b2):
    h = jnp.dot(x, w1, precision=jax.lax.Precision.HIGHEST) + b1
    h = jax.nn.gelu(h, approximate=True)
    return jnp.dot(h, w2, precision=jax.lax.Precision.HIGHEST) + b2


if __name__ == "__main__":
    # Small but lane-dense / MXU-friendly demo shapes.
    B, N, dim_in, hidden, dim_out = 2, 256, 128, 256, 128

    key = jax.random.PRNGKey(0)
    kx, kp = jax.random.split(key)
    x = jax.random.normal(kx, (B, N, dim_in), dtype=jnp.float32)

    module = FeedForwardPallas(dim_in, hidden, dim_out, key=kp)

    out = jax.block_until_ready(module(x))

    ref = _ref_feedforward(x, module.w1, module.b1, module.w2, module.b2)
    assert out.shape == (B, N, dim_out)
    max_err = float(jnp.max(jnp.abs(out - ref)))
    assert jnp.allclose(out, ref, atol=2e-3, rtol=2e-3), f"mismatch vs reference, max abs err {max_err}"

    print("KERNEL_OK")
</pallas_src>

<mosaic_0001>
module attributes {stable_mosaic.version = 11 : i64} {
  func.func @_ffn_kernel(%arg0: i32, %arg1: memref<512x128xf32, #tpu.memory_space<vmem>>, %arg2: memref<128x256xf32, #tpu.memory_space<vmem>>, %arg3: memref<1x256xf32, #tpu.memory_space<vmem>>, %arg4: memref<256x128xf32, #tpu.memory_space<vmem>>, %arg5: memref<1x128xf32, #tpu.memory_space<vmem>>, %arg6: memref<512x128xf32, #tpu.memory_space<vmem>>) attributes {dimension_semantics = [#tpu.dimension_semantics<parallel>], iteration_bounds = array<i64: 1>, scalar_prefetch = 0 : i64, scratch_operands = 0 : i64, tpu.core_type = #tpu.core_type<tc>, window_params = [{transform_indices = @transform_0, window_bounds = array<i64: 512, 128>}, {pipeline_mode = #tpu.pipeline_mode<synchronous>, transform_indices = @transform_1, window_bounds = array<i64: 128, 256>}, {pipeline_mode = #tpu.pipeline_mode<synchronous>, transform_indices = @transform_2, window_bounds = array<i64: 1, 256>}, {pipeline_mode = #tpu.pipeline_mode<synchronous>, transform_indices = @transform_3, window_bounds = array<i64: 256, 128>}, {pipeline_mode = #tpu.pipeline_mode<synchronous>, transform_indices = @transform_4, window_bounds = array<i64: 1, 128>}, {transform_indices = @transform_5, window_bounds = array<i64: 512, 128>}]} {
    %c0 = arith.constant 0 : index
    %c0_0 = arith.constant 0 : index
    %0 = vector.load %arg1[%c0, %c0_0] : memref<512x128xf32, #tpu.memory_space<vmem>>, vector<512x128xf32>
    %c0_1 = arith.constant 0 : index
    %c0_2 = arith.constant 0 : index
    %1 = vector.load %arg2[%c0_1, %c0_2] : memref<128x256xf32, #tpu.memory_space<vmem>>, vector<128x256xf32>
    %cst = arith.constant dense<0.000000e+00> : vector<512x256xf32>
    %2 = tpu.matmul %0, %1, %cst {dimension_numbers = #tpu.dot_dimension_numbers<[1], [0], [0], [1], [0, 0, 1, 1], [], []>} : vector<512x128xf32>, vector<128x256xf32>, vector<512x256xf32> -> vector<512x256xf32>
    %c0_3 = arith.constant 0 : index
    %c0_4 = arith.constant 0 : index
    %3 = vector.load %arg3[%c0_3, %c0_4] : memref<1x256xf32, #tpu.memory_space<vmem>>, vector<1x256xf32>
    %4 = vector.broadcast %3 : vector<1x256xf32> to vector<512x256xf32>
    %5 = arith.addf %2, %4 : vector<512x256xf32>
    %6 = arith.mulf %5, %5 : vector<512x256xf32>
    %7 = arith.mulf %5, %6 : vector<512x256xf32>
    %cst_5 = arith.constant 4.471500e-02 : f32
    %8 = vector.broadcast %cst_5 : f32 to vector<512x256xf32>
    %9 = arith.mulf %8, %7 : vector<512x256xf32>
    %10 = arith.addf %5, %9 : vector<512x256xf32>
    %cst_6 = arith.constant 0.797884583 : f32
    %11 = vector.broadcast %cst_6 : f32 to vector<512x256xf32>
    %12 = arith.mulf %11, %10 : vector<512x256xf32>
    %13 = math.tanh %12 : vector<512x256xf32>
    %cst_7 = arith.constant 1.000000e+00 : f32
    %14 = vector.broadcast %cst_7 : f32 to vector<512x256xf32>
    %15 = arith.addf %14, %13 : vector<512x256xf32>
    %cst_8 = arith.constant 5.000000e-01 : f32
    %16 = vector.broadcast %cst_8 : f32 to vector<512x256xf32>
    %17 = arith.mulf %16, %15 : vector<512x256xf32>
    %18 = arith.mulf %5, %17 : vector<512x256xf32>
    %c0_9 = arith.constant 0 : index
    %c0_10 = arith.constant 0 : index
    %19 = vector.load %arg4[%c0_9, %c0_10] : memref<256x128xf32, #tpu.memory_space<vmem>>, vector<256x128xf32>
    %cst_11 = arith.constant dense<0.000000e+00> : vector<512x128xf32>
    %20 = tpu.matmul %18, %19, %cst_11 {dimension_numbers = #tpu.dot_dimension_numbers<[1], [0], [0], [1], [0, 0, 1, 1], [], []>} : vector<512x256xf32>, vector<256x128xf32>, vector<512x128xf32> -> vector<512x128xf32>
    %c0_12 = arith.constant 0 : index
    %c0_13 = arith.constant 0 : index
    %21 = vector.load %arg5[%c0_12, %c0_13] : memref<1x128xf32, #tpu.memory_space<vmem>>, vector<1x128xf32>
    %22 = vector.broadcast %21 : vector<1x128xf32> to vector<512x128xf32>
    %23 = arith.addf %20, %22 : vector<512x128xf32>
    %c0_14 = arith.constant 0 : index
    %c0_15 = arith.constant 0 : index
    %24 = vector.load %arg6[%c0_14, %c0_15] : memref<512x128xf32, #tpu.memory_space<vmem>>, vector<512x128xf32>
    tpu.vector_store %arg6[%c0_14, %c0_15], %23 {strides = array<i32>} : memref<512x128xf32, #tpu.memory_space<vmem>>, vector<512x128xf32>,
    return
  }
  func.func @transform_0(%arg0: i32) -> (i32, i32) {
    %c0_i32 = arith.constant 0 : i32
    %c0_i32_0 = arith.constant 0 : i32
    return %arg0, %c0_i32 : i32, i32
  }
  func.func @transform_1(%arg0: i32) -> (i32, i32) {
    %c0_i32 = arith.constant 0 : i32
    %c0_i32_0 = arith.constant 0 : i32
    %c0_i32_1 = arith.constant 0 : i32
    return %c0_i32, %c0_i32_0 : i32, i32
  }
  func.func @transform_2(%arg0: i32) -> (i32, i32) {
    %c0_i32 = arith.constant 0 : i32
    %c0_i32_0 = arith.constant 0 : i32
    %c0_i32_1 = arith.constant 0 : i32
    return %c0_i32, %c0_i32_0 : i32, i32
  }
  func.func @transform_3(%arg0: i32) -> (i32, i32) {
    %c0_i32 = arith.constant 0 : i32
    %c0_i32_0 = arith.constant 0 : i32
    %c0_i32_1 = arith.constant 0 : i32
    return %c0_i32, %c0_i32_0 : i32, i32
  }
  func.func @transform_4(%arg0: i32) -> (i32, i32) {
    %c0_i32 = arith.constant 0 : i32
    %c0_i32_0 = arith.constant 0 : i32
    %c0_i32_1 = arith.constant 0 : i32
    return %c0_i32, %c0_i32_0 : i32, i32
  }
  func.func @transform_5(%arg0: i32) -> (i32, i32) {
    %c0_i32 = arith.constant 0 : i32
    %c0_i32_0 = arith.constant 0 : i32
    return %arg0, %c0_i32 : i32, i32
  }
}

</mosaic_0001>

<bundles_post_ra>
// kernel: tpu_custom_call.1
= control target key start
LH: loop header
LB: loop body
LE: loop exit
PB: predicated region body
PF: predicated region fallthrough
CT: control target
= control target key end

     0   :  { %10 = vsyncpa [#allocation3], 0  ;;  %s3837_s0 = inlined_call_operand.hbm [shape: f32[512,128], index: 0, kind: input, shape index: {}]   ;;  %s3838_s1 = inlined_call_operand.hbm [shape: f32[128,256], index: 1, kind: input, shape index: {}]   ;;  %s3839_s2 = inlined_call_operand.hbm [shape: f32[1,256], index: 2, kind: input, shape index: {}]   ;;  %s3840_s3 = inlined_call_operand.hbm [shape: f32[256,128], index: 3, kind: input, shape index: {}]   ;;  %s3841_s4 = inlined_call_operand.vmem [shape: f32[1,128], index: 4, kind: input, shape index: {}]   ;;  %s3842_s5 = inlined_call_operand.hbm [shape: f32[512,128], index: 5, kind: output, shape index: {}]  }
   0x1   :  { %11 = vsyncpa [#allocation6], 0 }
   0x2   :  { %12 = vsyncpa [#allocation9], 0  ;;  %s31_s20 = sshll.u32 %s3838_s1, 4  ;;  %s32_s20 = int_to_ptr.hbm [resolvable:$true] %s31_s20 }
   0x3   :  { %13 = vsyncpa [#allocation4], 0  ;;  %s2690_s21 = smov [#allocation5]   ;;  %s18_s25 = sshll.u32 %s3837_s0, 4  ;;  %s19_s25 = int_to_ptr.hbm [resolvable:$true] %s18_s25 }
   0x4   :  { %s33_s22 = sshll.u32 %s2690_s21, 4  ;;  %s2691_s26 = smov 256   ;;  %s34_s22 = int_to_ptr.vmem [resolvable:$true] %s33_s22 }
   0x5   :  { %s2692_s27 = smov 16   ;;  %s2693_s28 = smov [#allocation2]  }
   0x6   :  { %39 = dma.hbm_to_vmem [thread:$0]  %s32_s20, 4096, %s34_s22, [#allocation6], %s2691_s26, %s2691_s26, %s2692_s27  }
   0x7   :  { %s20_s29 = sshll.u32 %s2693_s28, 4  ;;  %s2694_s30 = smov 128   ;;  %s21_s29 = int_to_ptr.vmem [resolvable:$true] %s20_s29 }
   0x8   :  { %s2695_s6 = smov 8   ;;  %s45_s8 = sshll.u32 %s3839_s2, 4  ;;  %s46_s8 = int_to_ptr.hbm [resolvable:$true] %s45_s8 }
   0x9   :  { %26 = dma.hbm_to_vmem [thread:$0]  %s19_s25, 8192, %s21_s29, [#allocation3], %s2694_s30, %s2694_s30, %s2695_s6  }
   0xa   :  { %s2696_s9 = smov [#allocation7]   ;;  %s55_s12 = sshll.u32 %s3840_s3, 4  ;;  %s56_s12 = int_to_ptr.hbm [resolvable:$true] %s55_s12 }
   0xb   :  { %s47_s0 = sshll.u32 %s2696_s9, 4  ;;  %s2697_s13 = smov [#allocation8]   ;;  %s48_s0 = int_to_ptr.vmem [resolvable:$true] %s47_s0 }
   0xc   :  { %50 = dma.hbm_to_vmem [thread:$0]  %s46_s8, 32, %s48_s0, [#allocation6]  }
   0xd   :  { %s57_s14 = sshll.u32 %s2697_s13, 4  ;;  %s58_s14 = int_to_ptr.vmem [resolvable:$true] %s57_s14 }
   0xe   :  { %63 = dma.hbm_to_vmem [thread:$0]  %s56_s12, 4096, %s58_s14, [#allocation9], %s2694_s30, %s2694_s30, %s2695_s6  }
   0xf   :  { %2682 = dma.done.wait [#allocation3], 8192  }
  0x10   :  { %2683 = vsyncadd [#allocation3], 4294959104 }
  0x11   :  { %2684 = dma.done.wait [#allocation6], 4128  }
  0x12   :  { %2685 = vsyncadd [#allocation6], 4294963168 }
  0x13   :  { %2686 = dma.done.wait [#allocation9], 4096  }
  0x14   :  { %2687 = vsyncadd [#allocation9], 4294963200  ;;  %v176_v0 = vld [vmem:[#allocation5 + $0xf0] sm:$0xff]  ;;  %v177_v1 = vld [vmem:[#allocation5 + $0xf8] sm:$0xff]  ;;  %s2278_s24 = sshll.u32 %s3842_s5, 4  ;;  %s2279_s24 = int_to_ptr.hbm [resolvable:$true] %s2278_s24 }
  0x15   :  { %v174_v2 = vld [vmem:[#allocation5 + $0xe0] sm:$0xff]  ;;  %184 = vmatpush.msra.mxu0 %v176_v0  ;;  %393 = vmatpush.msra.mxu1 %v177_v1  ;;  %v175_v3 = vld [vmem:[#allocation5 + $0xe8] sm:$0xff]  ;;  %v172_v4 = vld [vmem:[#allocation5 + $0xd0] sm:$0xff] }
  0x16   :  { %v173_v5 = vld [vmem:[#allocation5 + $0xd8] sm:$0xff]  ;;  %v170_v6 = vld [vmem:[#allocation5 + $0xc0] sm:$0xff]  ;;  %v171_v7 = vld [vmem:[#allocation5 + $0xc8] sm:$0xff] }
  0x17   :  { %185 = vmatpush.msra.mxu0 %v174_v2  ;;  %394 = vmatpush.msra.mxu1 %v175_v3  ;;  %v168_v8 = vld [vmem:[#allocation5 + $0xb0] sm:$0xff]  ;;  %v169_v9 = vld [vmem:[#allocation5 + $0xb8] sm:$0xff]  ;;  %v166_v10 = vld [vmem:[#allocation5 + $0xa0] sm:$0xff] }
  0x18   :  { %v167_v11 = vld [vmem:[#allocation5 + $0xa8] sm:$0xff]  ;;  %v164_v12 = vld [vmem:[#allocation5 + $0x90] sm:$0xff]  ;;  %v165_v13 = vld [vmem:[#allocation5 + $0x98] sm:$0xff] }
  0x19   :  { %186 = vmatpush.msra.mxu0 %v172_v4  ;;  %395 = vmatpush.msra.mxu1 %v173_v5  ;;  %v162_v14 = vld [vmem:[#allocation5 + $0x80] sm:$0xff]  ;;  %v163_v15 = vld [vmem:[#allocation5 + $0x88] sm:$0xff]  ;;  %v160_v16 = vld [vmem:[#allocation5 + $0x70] sm:$0xff] }
  0x1a   :  { %v161_v17 = vld [vmem:[#allocation5 + $0x78] sm:$0xff]  ;;  %v158_v18 = vld [vmem:[#allocation5 + $0x60] sm:$0xff]  ;;  %v159_v19 = vld [vmem:[#allocation5 + $0x68] sm:$0xff] }
  0x1b   :  { %187 = vmatpush.msra.mxu0 %v170_v6  ;;  %396 = vmatpush.msra.mxu1 %v171_v7  ;;  %v156_v20 = vld [vmem:[#allocation5 + $0x50] sm:$0xff]  ;;  %v157_v21 = vld [vmem:[#allocation5 + $0x58] sm:$0xff]  ;;  %v154_v22 = vld [vmem:[#allocation5 + $0x40] sm:$0xff] }
  0x1c   :  { %v155_v23 = vld [vmem:[#allocation5 + $0x48] sm:$0xff]  ;;  %v152_v24 = vld [vmem:[#allocation5 + $0x30] sm:$0xff]  ;;  %v153_v25 = vld [vmem:[#allocation5 + $0x38] sm:$0xff] }
  0x1d   :  { %188 = vmatpush.msra.mxu0 %v168_v8  ;;  %397 = vmatpush.msra.mxu1 %v169_v9  ;;  %v150_v26 = vld [vmem:[#allocation5 + $0x20] sm:$0xff]  ;;  %v151_v27 = vld [vmem:[#allocation5 + $0x28] sm:$0xff]  ;;  %v148_v28 = vld [vmem:[#allocation5 + $0x10] sm:$0xff] }
  0x1e   :  { %v149_v29 = vld [vmem:[#allocation5 + $0x18] sm:$0xff]  ;;  %v146_v30 = vld [vmem:[#allocation5] sm:$0xff]  ;;  %v147_v31 = vld [vmem:[#allocation5 + $0x8] sm:$0xff] }
  0x1f   :  { %189 = vmatpush.msra.mxu0 %v166_v10  ;;  %398 = vmatpush.msra.mxu1 %v167_v11  ;;  %v82_v32 = vld [vmem:[#allocation2] sm:$0xff]  ;;  %v83_v33 = vld [vmem:[#allocation2 + $0x8] sm:$0xff]  ;;  %v84_v34 = vld [vmem:[#allocation2 + $0x10] sm:$0xff] }
  0x20   :  { %v85_v35 = vld [vmem:[#allocation2 + $0x18] sm:$0xff]  ;;  %v86_v36 = vld [vmem:[#allocation2 + $0x20] sm:$0xff]  ;;  %v87_v37 = vld [vmem:[#allocation2 + $0x28] sm:$0xff] }
  0x21   :  { %190 = vmatpush.msra.mxu0 %v164_v12  ;;  %399 = vmatpush.msra.mxu1 %v165_v13  ;;  %v88_v38 = vld [vmem:[#allocation2 + $0x30] sm:$0xff]  ;;  %v89_v39 = vld [vmem:[#allocation2 + $0x38] sm:$0xff]  ;;  %v90_v40 = vld [vmem:[#allocation2 + $0x40] sm:$0xff] }
  0x22   :  { %v91_v41 = vld [vmem:[#allocation2 + $0x48] sm:$0xff]  ;;  %v92_v42 = vld [vmem:[#allocation2 + $0x50] sm:$0xff]  ;;  %v93_v43 = vld [vmem:[#allocation2 + $0x58] sm:$0xff] }
  0x23   :  { %191 = vmatpush.msra.mxu0 %v162_v14  ;;  %400 = vmatpush.msra.mxu1 %v163_v15  ;;  %v1769_v44 = vld [vmem:[#allocation8 + $0x78] sm:$0xff]  ;;  %v1768_v46 = vld [vmem:[#allocation8 + $0x70] sm:$0xff]  ;;  %v1767_v48 = vld [vmem:[#allocation8 + $0x68] sm:$0xff] }
  0x24   :  { %v1785_v45 = vld [vmem:[#allocation8 + $0xf8] sm:$0xff]  ;;  %v1784_v47 = vld [vmem:[#allocation8 + $0xf0] sm:$0xff]  ;;  %1790 = vmatpush.msra.mxu2 %v1769_v44  ;;  %v1783_v49 = vld [vmem:[#allocation8 + $0xe8] sm:$0xff] }
  0x25   :  { %192 = vmatpush.msra.mxu0 %v160_v16  ;;  %401 = vmatpush.msra.mxu1 %v161_v17  ;;  %v94_v50 = vld [vmem:[#allocation2 + $0x60] sm:$0xff]  ;;  %v1764_v55 = vld [vmem:[#allocation8 + $0x50] sm:$0xff]  ;;  %v1763_v57 = vld [vmem:[#allocation8 + $0x48] sm:$0xff] }
  0x26   :  { %1999 = vmatpush.msra.mxu3 %v1785_v45  ;;  %1791 = vmatpush.msra.mxu2 %v1768_v46  ;;  %v1766_v51 = vld [vmem:[#allocation8 + $0x60] sm:$0xff]  ;;  %v1765_v53 = vld [vmem:[#allocation8 + $0x58] sm:$0xff]  ;;  %v1780_v56 = vld [vmem:[#allocation8 + $0xd0] sm:$0xff] }
  0x27   :  { %193 = vmatpush.msra.mxu0 %v158_v18  ;;  %402 = vmatpush.msra.mxu1 %v159_v19  ;;  %v1782_v52 = vld [vmem:[#allocation8 + $0xe0] sm:$0xff]  ;;  %v1781_v54 = vld [vmem:[#allocation8 + $0xd8] sm:$0xff]  ;;  %v1779_v58 = vld [vmem:[#allocation8 + $0xc8] sm:$0xff] }
  0x28   :  { %2000 = vmatpush.msra.mxu3 %v1784_v47  ;;  %1792 = vmatpush.msra.mxu2 %v1767_v48  ;;  %v95_v59 = vld [vmem:[#allocation2 + $0x68] sm:$0xff]  ;;  %v1761_v62 = vld [vmem:[#allocation8 + $0x38] sm:$0xff]  ;;  %v1760_v0 = vld [vmem:[#allocation8 + $0x30] sm:$0xff] }
  0x29   :  { %194 = vmatpush.msra.mxu0 %v156_v20  ;;  %403 = vmatpush.msra.mxu1 %v157_v21  ;;  %v1762_v60 = vld [vmem:[#allocation8 + $0x40] sm:$0xff]  ;;  %v1777_v63 = vld [vmem:[#allocation8 + $0xb8] sm:$0xff]  ;;  %v1776_v1 = vld [vmem:[#allocation8 + $0xb0] sm:$0xff] }
  0x2a   :  { %2001 = vmatpush.msra.mxu3 %v1783_v49  ;;  %1793 = vmatpush.msra.mxu2 %v1766_v51  ;;  %v1778_v61 = vld [vmem:[#allocation8 + $0xc0] sm:$0xff]  ;;  %v1759_v2 = vld [vmem:[#allocation8 + $0x28] sm:$0xff]  ;;  %v1757_v7 = vld [vmem:[#allocation8 + $0x18] sm:$0xff] }
  0x2b   :  { %195 = vmatpush.msra.mxu0 %v154_v22  ;;  %404 = vmatpush.msra.mxu1 %v155_v23  ;;  %v1775_v3 = vld [vmem:[#allocation8 + $0xa8] sm:$0xff]  ;;  %v1758_v5 = vld [vmem:[#allocation8 + $0x20] sm:$0xff]  ;;  %v1773_v8 = vld [vmem:[#allocation8 + $0x98] sm:$0xff] }
  0x2c   :  { %2002 = vmatpush.msra.mxu3 %v1782_v52  ;;  %1794 = vmatpush.msra.mxu2 %v1765_v53  ;;  %v96_v4 = vld [vmem:[#allocation2 + $0x70] sm:$0xff]  ;;  %v1774_v6 = vld [vmem:[#allocation8 + $0xa0] sm:$0xff]  ;;  %v97_v13 = vld [vmem:[#allocation2 + $0x78] sm:$0xff] }
  0x2d   :  { %196 = vmatpush.msra.mxu0 %v152_v24  ;;  %405 = vmatpush.msra.mxu1 %v153_v25  ;;  %v1756_v9 = vld [vmem:[#allocation8 + $0x10] sm:$0xff]  ;;  %v1755_v11 = vld [vmem:[#allocation8 + $0x8] sm:$0xff]  ;;  %v1754_v14 = vld [vmem:[#allocation8] sm:$0xff] }
  0x2e   :  { %2003 = vmatpush.msra.mxu3 %v1781_v54  ;;  %1795 = vmatpush.msra.mxu2 %v1764_v55  ;;  %v1772_v10 = vld [vmem:[#allocation8 + $0x90] sm:$0xff]  ;;  %v1771_v12 = vld [vmem:[#allocation8 + $0x88] sm:$0xff]  ;;  %v1770_v15 = vld [vmem:[#allocation8 + $0x80] sm:$0xff] }
  0x2f   :  { %197 = vmatpush.msra.mxu0 %v150_v26  ;;  %406 = vmatpush.msra.mxu1 %v151_v27  ;;  %v178_v16 = vld [vmem:[#allocation7] sm:$0x3]  ;;  %v100_v47 = vld [vmem:[#allocation2 + $0x90] sm:$0xff] }
  0x30   :  { %2004 = vmatpush.msra.mxu3 %v1780_v56  ;;  %1796 = vmatpush.msra.mxu2 %v1763_v57  ;;  %v2747_v17 = vperm.slane %v178_v16, 0  ;;  %v2749_v18 = vperm.slane %v178_v16, 1  ;;  %v98_v21 = vld [vmem:[#allocation2 + $0x80] sm:$0xff] }
  0x31   :  { %198 = vmatpush.msra.mxu0 %v148_v28  ;;  %407 = vmatpush.msra.mxu1 %v149_v29 }
  0x32   :  { %2005 = vmatpush.msra.mxu3 %v1779_v58  ;;  %1797 = vmatpush.msra.mxu2 %v1762_v60 }
  0x33   :  { %199 = vmatpush.msra.mxu0 %v146_v30  ;;  %408 = vmatpush.msra.mxu1 %v147_v31 }
  0x34   :  { %200 = vmatmul.f32.vlgmr.msra.gmra.mxu0 %v82_v32  ;;  %409 = vmatmul.f32.vlgmr.msra.gmra.mxu1 %v82_v32  ;;  %v99_v32 = vld [vmem:[#allocation2 + $0x88] sm:$0xff] }
  0x35   :  { %2006 = vmatpush.msra.mxu3 %v1778_v61  ;;  %1798 = vmatpush.msra.mxu2 %v1761_v62 }
  0x37   :  { %2007 = vmatpush.msra.mxu3 %v1777_v63  ;;  %1799 = vmatpush.msra.mxu2 %v1760_v0 }
  0x39   :  { %2008 = vmatpush.msra.mxu3 %v1776_v1  ;;  %1800 = vmatpush.msra.mxu2 %v1759_v2 }
  0x3b   :  { %2009 = vmatpush.msra.mxu3 %v1775_v3  ;;  %1801 = vmatpush.msra.mxu2 %v1758_v5  ;;  %v101_v5 = vld [vmem:[#allocation2 + $0x98] sm:$0xff] }
  0x3c   :  { %203 = vmatmul.f32.gmra.mxu0 %v83_v33  ;;  %412 = vmatmul.f32.gmra.mxu1 %v83_v33 }
  0x3d   :  { %2010 = vmatpush.msra.mxu3 %v1774_v6  ;;  %1802 = vmatpush.msra.mxu2 %v1757_v7 }
  0x3f   :  { %2011 = vmatpush.msra.mxu3 %v1773_v8  ;;  %1803 = vmatpush.msra.mxu2 %v1756_v9 }
  0x41   :  { %2012 = vmatpush.msra.mxu3 %v1772_v10  ;;  %1804 = vmatpush.msra.mxu2 %v1755_v11 }
  0x43   :  { %2013 = vmatpush.msra.mxu3 %v1771_v12  ;;  %1805 = vmatpush.msra.mxu2 %v1754_v14 }
  0x44   :  { %206 = vmatmul.f32.gmra.mxu0 %v84_v34  ;;  %415 = vmatmul.f32.gmra.mxu1 %v84_v34 }
  0x45   :  { %2014 = vmatpush.msra.mxu3 %v1770_v15 }
  0x4c   :  { %209 = vmatmul.f32.gmra.mxu0 %v85_v35  ;;  %418 = vmatmul.f32.gmra.mxu1 %v85_v35 }
  0x54   :  { %212 = vmatmul.f32.gmra.mxu0 %v86_v36  ;;  %421 = vmatmul.f32.gmra.mxu1 %v86_v36 }
  0x5c   :  { %215 = vmatmul.f32.gmra.mxu0 %v87_v37  ;;  %424 = vmatmul.f32.gmra.mxu1 %v87_v37 }
  0x64   :  { %218 = vmatmul.f32.gmra.mxu0 %v88_v38  ;;  %427 = vmatmul.f32.gmra.mxu1 %v88_v38 }
  0x6c   :  { %221 = vmatmul.f32.gmra.mxu0 %v89_v39  ;;  %430 = vmatmul.f32.gmra.mxu1 %v89_v39 }
  0x74   :  { %224 = vmatmul.f32.gmra.mxu0 %v90_v40  ;;  %433 = vmatmul.f32.gmra.mxu1 %v90_v40 }
  0x7c   :  { %227 = vmatmul.f32.gmra.mxu0 %v91_v41  ;;  %436 = vmatmul.f32.gmra.mxu1 %v91_v41 }
  0x84   :  { %230 = vmatmul.f32.gmra.mxu0 %v92_v42  ;;  %439 = vmatmul.f32.gmra.mxu1 %v92_v42 }
  0x8c   :  { %233 = vmatmul.f32.gmra.mxu0 %v93_v43  ;;  %442 = vmatmul.f32.gmra.mxu1 %v93_v43 }
  0x94   :  { %236 = vmatmul.f32.gmra.mxu0 %v94_v50  ;;  %445 = vmatmul.f32.gmra.mxu1 %v94_v50 }
  0x9c   :  { %239 = vmatmul.f32.gmra.mxu0 %v95_v59  ;;  %448 = vmatmul.f32.gmra.mxu1 %v95_v59 }
  0xa4   :  { %242 = vmatmul.f32.gmra.mxu0 %v96_v4  ;;  %451 = vmatmul.f32.gmra.mxu1 %v96_v4 }
  0xac   :  { %245 = vmatmul.f32.gmra.mxu0 %v97_v13  ;;  %454 = vmatmul.f32.gmra.mxu1 %v97_v13 }
  0xb1   :  { %v201_v19 = vpop.f32.mrf.mxu0  ;;  %v410_v20 = vpop.f32.mrf.mxu1 }
  0xb2   :  { %v202_v22 = vadd.f32 %v201_v19, %v2747_v17  ;;  %v411_v23 = vadd.f32 %v410_v20, %v2749_v18 }
  0xb4   :  { %v602_v24 = vmul.f32 %v202_v22, %v202_v22  ;;  %v603_v25 = vmul.f32 %v411_v23, %v411_v23  ;;  %248 = vmatmul.f32.gmra.mxu0 %v98_v21  ;;  %457 = vmatmul.f32.gmra.mxu1 %v98_v21 }
  0xb6   :  { %v730_v26 = vmul.f32 %v602_v24, %v202_v22  ;;  %v731_v27 = vmul.f32 %v603_v25, %v411_v23 }
  0xb8   :  { %v858_v28 = vmul.f32 0.044715, %v730_v26  ;;  %v859_v29 = vmul.f32 0.044715, %v731_v27 }
  0xb9   :  { %v204_v30 = vpop.f32.mrf.mxu0  ;;  %v413_v31 = vpop.f32.mrf.mxu1 }
  0xba   :  { %v2754_v33 = vadd.f32 %v204_v30, %v2747_v17  ;;  %v2757_v34 = vadd.f32 %v413_v31, %v2749_v18  ;;  %v986_v35 = vadd.f32 %v858_v28, %v202_v22  ;;  %v987_v36 = vadd.f32 %v859_v29, %v411_v23  ;;  %v102_v30 = vld [vmem:[#allocation2 + $0xa0] sm:$0xff] }
  0xbc   :  { %v604_v37 = vmul.f32 %v2754_v33, %v2754_v33  ;;  %v605_v38 = vmul.f32 %v2757_v34, %v2757_v34  ;;  %251 = vmatmul.f32.gmra.mxu0 %v99_v32  ;;  %460 = vmatmul.f32.gmra.mxu1 %v99_v32  ;;  %v1114_v39 = vmul.f32 0.7978846, %v986_v35  ;;  %v1115_v40 = vmul.f32 0.7978846, %v987_v36 }
  0xbe   :  { %2303 = vtanh.f32 %v1114_v39  ;;  %v732_v41 = vmul.f32 %v604_v37, %v2754_v33  ;;  %v733_v42 = vmul.f32 %v605_v38, %v2757_v34 }
  0xbf   :  { %2305 = vtanh.f32 %v1115_v40 }
  0xc0   :  { %v860_v43 = vmul.f32 0.044715, %v732_v41  ;;  %v861_v44 = vmul.f32 0.044715, %v733_v42 }
  0xc1   :  { %v207_v45 = vpop.f32.mrf.mxu0  ;;  %v416_v46 = vpop.f32.mrf.mxu1 }
  0xc2   :  { %v2766_v48 = vadd.f32 %v207_v45, %v2747_v17  ;;  %v2769_v49 = vadd.f32 %v416_v46, %v2749_v18  ;;  %v988_v50 = vadd.f32 %v860_v43, %v2754_v33  ;;  %v989_v51 = vadd.f32 %v861_v44, %v2757_v34 }
  0xc4   :  { %v2304_v52 = vpop.eup %2303  ;;  %v606_v53 = vmul.f32 %v2766_v48, %v2766_v48  ;;  %v607_v54 = vmul.f32 %v2769_v49, %v2769_v49  ;;  %254 = vmatmul.f32.gmra.mxu0 %v100_v47  ;;  %463 = vmatmul.f32.gmra.mxu1 %v100_v47  ;;  %v1116_v55 = vmul.f32 0.7978846, %v988_v50  ;;  %v1117_v56 = vmul.f32 0.7978846, %v989_v51 }
  0xc5   :  { %v2306_v57 = vpop.eup %2305  ;;  %v1370_v58 = vadd.f32 1.0, %v2304_v52 }
  0xc6   :  { %v1371_v59 = vadd.f32 1.0, %v2306_v57  ;;  %2307 = vtanh.f32 %v1116_v55  ;;  %v734_v60 = vmul.f32 %v606_v53, %v2766_v48  ;;  %v735_v61 = vmul.f32 %v607_v54, %v2769_v49  ;;  %v103_v55 = vld [vmem:[#allocation2 + $0xa8] sm:$0xff] }
  0xc7   :  { %v1498_v62 = vmul.f32 0.5, %v1370_v58  ;;  %2309 = vtanh.f32 %v1117_v56 }
  0xc8   :  { %v1499_v63 = vmul.f32 0.5, %v1371_v59  ;;  %v862_v0 = vmul.f32 0.044715, %v734_v60  ;;  %v863_v1 = vmul.f32 0.044715, %v735_v61 }
  0xc9   :  { %v210_v2 = vpop.f32.mrf.mxu0  ;;  %v419_v3 = vpop.f32.mrf.mxu1  ;;  %v1626_v4 = vmul.f32 %v1498_v62, %v202_v22 }
  0xca   :  { %v2780_v6 = vadd.f32 %v210_v2, %v2747_v17  ;;  %v2783_v7 = vadd.f32 %v419_v3, %v2749_v18  ;;  %v1627_v8 = vmul.f32 %v1499_v63, %v411_v23  ;;  %v990_v9 = vadd.f32 %v862_v0, %v2766_v48 }
  0xcb   :  { %1806 = vmatmul.f32.vlgmr.msra.gmra.mxu2 %v1626_v4  ;;  %v991_v10 = vadd.f32 %v863_v1, %v2769_v49 }
  0xcc   :  { %v2308_v11 = vpop.eup %2307  ;;  %v608_v12 = vmul.f32 %v2780_v6, %v2780_v6  ;;  %v609_v13 = vmul.f32 %v2783_v7, %v2783_v7  ;;  %2015 = vmatmul.f32.vlgmr.msra.gmra.mxu3 %v1627_v8  ;;  %257 = vmatmul.f32.gmra.mxu0 %v101_v5  ;;  %v1118_v14 = vmul.f32 0.7978846, %v990_v9 }
  0xcd   :  { %v2310_v15 = vpop.eup %2309  ;;  %466 = vmatmul.f32.gmra.mxu1 %v101_v5  ;;  %v1372_v16 = vadd.f32 1.0, %v2308_v11  ;;  %v1119_v19 = vmul.f32 0.7978846, %v991_v10 }
  0xce   :  { %v1373_v20 = vadd.f32 1.0, %v2310_v15  ;;  %2311 = vtanh.f32 %v1118_v14  ;;  %v736_v21 = vmul.f32 %v608_v12, %v2780_v6  ;;  %v737_v22 = vmul.f32 %v609_v13, %v2783_v7  ;;  %v104_v14 = vld [vmem:[#allocation2 + $0xb0] sm:$0xff] }
  0xcf   :  { %v1500_v23 = vmul.f32 0.5, %v1372_v16  ;;  %2313 = vtanh.f32 %v1119_v19 }
  0xd0   :  { %v1501_v24 = vmul.f32 0.5, %v1373_v20  ;;  %v864_v25 = vmul.f32 0.044715, %v736_v21  ;;  %v865_v26 = vmul.f32 0.044715, %v737_v22 }
  0xd1   :  { %v213_v27 = vpop.f32.mrf.mxu0  ;;  %v422_v28 = vpop.f32.mrf.mxu1  ;;  %v1628_v29 = vmul.f32 %v1500_v23, %v2754_v33 }
  0xd2   :  { %v2795_v31 = vadd.f32 %v213_v27, %v2747_v17  ;;  %v2798_v32 = vadd.f32 %v422_v28, %v2749_v18  ;;  %v1629_v35 = vmul.f32 %v1501_v24, %v2757_v34  ;;  %v992_v36 = vadd.f32 %v864_v25, %v2780_v6 }
  0xd3   :  { %1809 = vmatmul.f32.gmra.mxu2 %v1628_v29  ;;  %v993_v37 = vadd.f32 %v865_v26, %v2783_v7 }
  0xd4   :  { %v2312_v38 = vpop.eup %2311  ;;  %v610_v39 = vmul.f32 %v2795_v31, %v2795_v31  ;;  %v611_v33 = vmul.f32 %v2798_v32, %v2798_v32  ;;  %2018 = vmatmul.f32.gmra.mxu3 %v1629_v35  ;;  %260 = vmatmul.f32.gmra.mxu0 %v102_v30  ;;  %v1120_v40 = vmul.f32 0.7978846, %v992_v36 }
  0xd5   :  { %v2314_v41 = vpop.eup %2313  ;;  %469 = vmatmul.f32.gmra.mxu1 %v102_v30  ;;  %v1374_v42 = vadd.f32 1.0, %v2312_v38  ;;  %v1121_v43 = vmul.f32 0.7978846, %v993_v37 }
  0xd6   :  { %v1375_v34 = vadd.f32 1.0, %v2314_v41  ;;  %2315 = vtanh.f32 %v1120_v40  ;;  %v738_v44 = vmul.f32 %v610_v39, %v2795_v31  ;;  %v739_v45 = vmul.f32 %v611_v33, %v2798_v32  ;;  %v105_v40 = vld [vmem:[#allocation2 + $0xb8] sm:$0xff] }
  0xd7   :  { %v1502_v46 = vmul.f32 0.5, %v1374_v42  ;;  %2317 = vtanh.f32 %v1121_v43 }
  0xd8   :  { %v1503_v47 = vmul.f32 0.5, %v1375_v34  ;;  %v866_v50 = vmul.f32 0.044715, %v738_v44  ;;  %v867_v51 = vmul.f32 0.044715, %v739_v45 }
  0xd9   :  { %v216_v52 = vpop.f32.mrf.mxu0  ;;  %v425_v53 = vpop.f32.mrf.mxu1  ;;  %v1630_v54 = vmul.f32 %v1502_v46, %v2766_v48 }
  0xda   :  { %v2811_v56 = vadd.f32 %v216_v52, %v2747_v17  ;;  %v2814_v57 = vadd.f32 %v425_v53, %v2749_v18  ;;  %v1631_v58 = vmul.f32 %v1503_v47, %v2769_v49  ;;  %v994_v59 = vadd.f32 %v866_v50, %v2795_v31 }
  0xdb   :  { %1812 = vmatmul.f32.gmra.mxu2 %v1630_v54  ;;  %v995_v60 = vadd.f32 %v867_v51, %v2798_v32 }
  0xdc   :  { %v2316_v61 = vpop.eup %2315  ;;  %v612_v62 = vmul.f32 %v2811_v56, %v2811_v56  ;;  %v613_v48 = vmul.f32 %v2814_v57, %v2814_v57  ;;  %2021 = vmatmul.f32.gmra.mxu3 %v1631_v58  ;;  %263 = vmatmul.f32.gmra.mxu0 %v103_v55  ;;  %v1122_v63 = vmul.f32 0.7978846, %v994_v59 }
  0xdd   :  { %v2318_v0 = vpop.eup %2317  ;;  %472 = vmatmul.f32.gmra.mxu1 %v103_v55  ;;  %v1376_v1 = vadd.f32 1.0, %v2316_v61  ;;  %v1123_v2 = vmul.f32 0.7978846, %v995_v60 }
  0xde   :  { %v1377_v49 = vadd.f32 1.0, %v2318_v0  ;;  %2319 = vtanh.f32 %v1122_v63  ;;  %v740_v3 = vmul.f32 %v612_v62, %v2811_v56  ;;  %v741_v4 = vmul.f32 %v613_v48, %v2814_v57  ;;  %v106_v63 = vld [vmem:[#allocation2 + $0xc0] sm:$0xff] }
  0xdf   :  { %v1504_v5 = vmul.f32 0.5, %v1376_v1  ;;  %2321 = vtanh.f32 %v1123_v2 }
  0xe0   :  { %v1505_v8 = vmul.f32 0.5, %v1377_v49  ;;  %v868_v9 = vmul.f32 0.044715, %v740_v3  ;;  %v869_v10 = vmul.f32 0.044715, %v741_v4 }
  0xe1   :  { %v219_v11 = vpop.f32.mrf.mxu0  ;;  %v428_v12 = vpop.f32.mrf.mxu1  ;;  %v1632_v13 = vmul.f32 %v1504_v5, %v2780_v6 }
  0xe2   :  { %v2827_v15 = vadd.f32 %v219_v11, %v2747_v17  ;;  %v2830_v16 = vadd.f32 %v428_v12, %v2749_v18  ;;  %v1633_v19 = vmul.f32 %v1505_v8, %v2783_v7  ;;  %v996_v20 = vadd.f32 %v868_v9, %v2811_v56 }
  0xe3   :  { %1815 = vmatmul.f32.gmra.mxu2 %v1632_v13  ;;  %v997_v21 = vadd.f32 %v869_v10, %v2814_v57 }
  0xe4   :  { %v2320_v22 = vpop.eup %2319  ;;  %v614_v23 = vmul.f32 %v2827_v15, %v2827_v15  ;;  %v615_v6 = vmul.f32 %v2830_v16, %v2830_v16  ;;  %2024 = vmatmul.f32.gmra.mxu3 %v1633_v19  ;;  %266 = vmatmul.f32.gmra.mxu0 %v104_v14  ;;  %v1124_v24 = vmul.f32 0.7978846, %v996_v20 }
  0xe5   :  { %v2322_v25 = vpop.eup %2321  ;;  %475 = vmatmul.f32.gmra.mxu1 %v104_v14  ;;  %v1378_v26 = vadd.f32 1.0, %v2320_v22  ;;  %v1125_v27 = vmul.f32 0.7978846, %v997_v21 }
  0xe6   :  { %v1379_v7 = vadd.f32 1.0, %v2322_v25  ;;  %2323 = vtanh.f32 %v1124_v24  ;;  %v742_v28 = vmul.f32 %v614_v23, %v2827_v15  ;;  %v743_v29 = vmul.f32 %v615_v6, %v2830_v16  ;;  %v107_v24 = vld [vmem:[#allocation2 + $0xc8] sm:$0xff] }
  0xe7   :  { %v1506_v30 = vmul.f32 0.5, %v1378_v26  ;;  %2325 = vtanh.f32 %v1125_v27 }
  0xe8   :  { %v1507_v35 = vmul.f32 0.5, %v1379_v7  ;;  %v870_v36 = vmul.f32 0.044715, %v742_v28  ;;  %v871_v37 = vmul.f32 0.044715, %v743_v29 }
  0xe9   :  { %v222_v38 = vpop.f32.mrf.mxu0  ;;  %v431_v39 = vpop.f32.mrf.mxu1  ;;  %v1634_v33 = vmul.f32 %v1506_v30, %v2795_v31 }
  0xea   :  { %v2843_v41 = vadd.f32 %v222_v38, %v2747_v17  ;;  %v2846_v42 = vadd.f32 %v431_v39, %v2749_v18  ;;  %v1635_v43 = vmul.f32 %v1507_v35, %v2798_v32  ;;  %v998_v34 = vadd.f32 %v870_v36, %v2827_v15 }
  0xeb   :  { %1818 = vmatmul.f32.gmra.mxu2 %v1634_v33  ;;  %v999_v44 = vadd.f32 %v871_v37, %v2830_v16 }
  0xec   :  { %v2324_v45 = vpop.eup %2323  ;;  %v616_v46 = vmul.f32 %v2843_v41, %v2843_v41  ;;  %v617_v31 = vmul.f32 %v2846_v42, %v2846_v42  ;;  %2027 = vmatmul.f32.gmra.mxu3 %v1635_v43  ;;  %269 = vmatmul.f32.gmra.mxu0 %v105_v40  ;;  %v1126_v47 = vmul.f32 0.7978846, %v998_v34 }
  0xed   :  { %v2326_v50 = vpop.eup %2325  ;;  %478 = vmatmul.f32.gmra.mxu1 %v105_v40  ;;  %v1380_v51 = vadd.f32 1.0, %v2324_v45  ;;  %v1127_v52 = vmul.f32 0.7978846, %v999_v44 }
  0xee   :  { %v1381_v32 = vadd.f32 1.0, %v2326_v50  ;;  %2327 = vtanh.f32 %v1126_v47  ;;  %v744_v53 = vmul.f32 %v616_v46, %v2843_v41  ;;  %v745_v54 = vmul.f32 %v617_v31, %v2846_v42  ;;  %v108_v47 = vld [vmem:[#allocation2 + $0xd0] sm:$0xff] }
  0xef   :  { %v1508_v55 = vmul.f32 0.5, %v1380_v51  ;;  %2329 = vtanh.f32 %v1127_v52 }
  0xf0   :  { %v1509_v58 = vmul.f32 0.5, %v1381_v32  ;;  %v872_v59 = vmul.f32 0.044715, %v744_v53  ;;  %v873_v60 = vmul.f32 0.044715, %v745_v54 }
  0xf1   :  { %v225_v61 = vpop.f32.mrf.mxu0  ;;  %v434_v62 = vpop.f32.mrf.mxu1  ;;  %v1636_v48 = vmul.f32 %v1508_v55, %v2811_v56 }
  0xf2   :  { %v2859_v0 = vadd.f32 %v225_v61, %v2747_v17  ;;  %v2862_v1 = vadd.f32 %v434_v62, %v2749_v18  ;;  %v1637_v2 = vmul.f32 %v1509_v58, %v2814_v57  ;;  %v1000_v49 = vadd.f32 %v872_v59, %v2843_v41 }
  0xf3   :  { %1821 = vmatmul.f32.gmra.mxu2 %v1636_v48  ;;  %v1001_v3 = vadd.f32 %v873_v60, %v2846_v42 }
  0xf4   :  { %v2328_v4 = vpop.eup %2327  ;;  %v618_v5 = vmul.f32 %v2859_v0, %v2859_v0  ;;  %v619_v56 = vmul.f32 %v2862_v1, %v2862_v1  ;;  %2030 = vmatmul.f32.gmra.mxu3 %v1637_v2  ;;  %272 = vmatmul.f32.gmra.mxu0 %v106_v63  ;;  %v1128_v8 = vmul.f32 0.7978846, %v1000_v49 }
  0xf5   :  { %v2330_v9 = vpop.eup %2329  ;;  %481 = vmatmul.f32.gmra.mxu1 %v106_v63  ;;  %v1382_v10 = vadd.f32 1.0, %v2328_v4  ;;  %v1129_v11 = vmul.f32 0.7978846, %v1001_v3 }
  0xf6   :  { %v1383_v57 = vadd.f32 1.0, %v2330_v9  ;;  %2331 = vtanh.f32 %v1128_v8  ;;  %v746_v12 = vmul.f32 %v618_v5, %v2859_v0  ;;  %v747_v13 = vmul.f32 %v619_v56, %v2862_v1  ;;  %v109_v8 = vld [vmem:[#allocation2 + $0xd8] sm:$0xff] }
  0xf7   :  { %v1510_v14 = vmul.f32 0.5, %v1382_v10  ;;  %2333 = vtanh.f32 %v1129_v11 }
  0xf8   :  { %v1511_v19 = vmul.f32 0.5, %v1383_v57  ;;  %v874_v20 = vmul.f32 0.044715, %v746_v12  ;;  %v875_v21 = vmul.f32 0.044715, %v747_v13 }
  0xf9   :  { %v228_v22 = vpop.f32.mrf.mxu0  ;;  %v437_v23 = vpop.f32.mrf.mxu1  ;;  %v1638_v6 = vmul.f32 %v1510_v14, %v2827_v15 }
  0xfa   :  { %v2875_v25 = vadd.f32 %v228_v22, %v2747_v17  ;;  %v2878_v26 = vadd.f32 %v437_v23, %v2749_v18  ;;  %v1639_v27 = vmul.f32 %v1511_v19, %v2830_v16  ;;  %v1002_v7 = vadd.f32 %v874_v20, %v2859_v0 }
  0xfb   :  { %1824 = vmatmul.f32.gmra.mxu2 %v1638_v6  ;;  %v1003_v28 = vadd.f32 %v875_v21, %v2862_v1 }
  0xfc   :  { %v2332_v29 = vpop.eup %2331  ;;  %v620_v30 = vmul.f32 %v2875_v25, %v2875_v25  ;;  %v621_v15 = vmul.f32 %v2878_v26, %v2878_v26  ;;  %2033 = vmatmul.f32.gmra.mxu3 %v1639_v27  ;;  %275 = vmatmul.f32.gmra.mxu0 %v107_v24  ;;  %v1130_v35 = vmul.f32 0.7978846, %v1002_v7 }
  0xfd   :  { %v2334_v36 = vpop.eup %2333  ;;  %484 = vmatmul.f32.gmra.mxu1 %v107_v24  ;;  %v1384_v37 = vadd.f32 1.0, %v2332_v29  ;;  %v1131_v38 = vmul.f32 0.7978846, %v1003_v28 }
  0xfe   :  { %v1385_v16 = vadd.f32 1.0, %v2334_v36  ;;  %2335 = vtanh.f32 %v1130_v35  ;;  %v748_v39 = vmul.f32 %v620_v30, %v2875_v25  ;;  %v749_v33 = vmul.f32 %v621_v15, %v2878_v26  ;;  %v110_v35 = vld [vmem:[#allocation2 + $0xe0] sm:$0xff] }
  0xff   :  { %v1512_v40 = vmul.f32 0.5, %v1384_v37  ;;  %2337 = vtanh.f32 %v1131_v38 }
 0x100   :  { %v1513_v43 = vmul.f32 0.5, %v1385_v16  ;;  %v876_v34 = vmul.f32 0.044715, %v748_v39  ;;  %v877_v44 = vmul.f32 0.044715, %v749_v33 }
 0x101   :  { %v231_v45 = vpop.f32.mrf.mxu0  ;;  %v440_v46 = vpop.f32.mrf.mxu1  ;;  %v1640_v31 = vmul.f32 %v1512_v40, %v2843_v41 }
 0x102   :  { %v2891_v50 = vadd.f32 %v231_v45, %v2747_v17  ;;  %v2894_v51 = vadd.f32 %v440_v46, %v2749_v18  ;;  %v1641_v52 = vmul.f32 %v1513_v43, %v2846_v42  ;;  %v1004_v32 = vadd.f32 %v876_v34, %v2875_v25 }
 0x103   :  { %1827 = vmatmul.f32.gmra.mxu2 %v1640_v31  ;;  %v1005_v53 = vadd.f32 %v877_v44, %v2878_v26 }
 0x104   :  { %v2336_v54 = vpop.eup %2335  ;;  %v622_v55 = vmul.f32 %v2891_v50, %v2891_v50  ;;  %v623_v41 = vmul.f32 %v2894_v51, %v2894_v51  ;;  %2036 = vmatmul.f32.gmra.mxu3 %v1641_v52  ;;  %278 = vmatmul.f32.gmra.mxu0 %v108_v47  ;;  %v1132_v58 = vmul.f32 0.7978846, %v1004_v32 }
 0x105   :  { %v2338_v59 = vpop.eup %2337  ;;  %487 = vmatmul.f32.gmra.mxu1 %v108_v47  ;;  %v1386_v60 = vadd.f32 1.0, %v2336_v54  ;;  %v1133_v61 = vmul.f32 0.7978846, %v1005_v53 }
 0x106   :  { %v1387_v42 = vadd.f32 1.0, %v2338_v59  ;;  %2339 = vtanh.f32 %v1132_v58  ;;  %v750_v62 = vmul.f32 %v622_v55, %v2891_v50  ;;  %v751_v48 = vmul.f32 %v623_v41, %v2894_v51  ;;  %v111_v58 = vld [vmem:[#allocation2 + $0xe8] sm:$0xff] }
 0x107   :  { %v1514_v63 = vmul.f32 0.5, %v1386_v60  ;;  %2341 = vtanh.f32 %v1133_v61 }
 0x108   :  { %v1515_v2 = vmul.f32 0.5, %v1387_v42  ;;  %v878_v49 = vmul.f32 0.044715, %v750_v62  ;;  %v879_v3 = vmul.f32 0.044715, %v751_v48 }
 0x109   :  { %v234_v4 = vpop.f32.mrf.mxu0  ;;  %v443_v5 = vpop.f32.mrf.mxu1  ;;  %v1642_v56 = vmul.f32 %v1514_v63, %v2859_v0 }
 0x10a   :  { %v2907_v9 = vadd.f32 %v234_v4, %v2747_v17  ;;  %v2910_v10 = vadd.f32 %v443_v5, %v2749_v18  ;;  %v1643_v11 = vmul.f32 %v1515_v2, %v2862_v1  ;;  %v1006_v57 = vadd.f32 %v878_v49, %v2891_v50 }
 0x10b   :  { %1830 = vmatmul.f32.gmra.mxu2 %v1642_v56  ;;  %v1007_v12 = vadd.f32 %v879_v3, %v2894_v51 }
 0x10c   :  { %v2340_v13 = vpop.eup %2339  ;;  %v624_v14 = vmul.f32 %v2907_v9, %v2907_v9  ;;  %v625_v0 = vmul.f32 %v2910_v10, %v2910_v10  ;;  %2039 = vmatmul.f32.gmra.mxu3 %v1643_v11  ;;  %281 = vmatmul.f32.gmra.mxu0 %v109_v8  ;;  %v1134_v19 = vmul.f32 0.7978846, %v1006_v57 }
 0x10d   :  { %v2342_v20 = vpop.eup %2341  ;;  %490 = vmatmul.f32.gmra.mxu1 %v109_v8  ;;  %v1388_v21 = vadd.f32 1.0, %v2340_v13  ;;  %v1135_v22 = vmul.f32 0.7978846, %v1007_v12 }
 0x10e   :  { %v1389_v1 = vadd.f32 1.0, %v2342_v20  ;;  %2343 = vtanh.f32 %v1134_v19  ;;  %v752_v23 = vmul.f32 %v624_v14, %v2907_v9  ;;  %v753_v6 = vmul.f32 %v625_v0, %v2910_v10  ;;  %v112_v19 = vld [vmem:[#allocation2 + $0xf0] sm:$0xff] }
 0x10f   :  { %v1516_v24 = vmul.f32 0.5, %v1388_v21  ;;  %2345 = vtanh.f32 %v1135_v22 }
 0x110   :  { %v1517_v27 = vmul.f32 0.5, %v1389_v1  ;;  %v880_v7 = vmul.f32 0.044715, %v752_v23  ;;  %v881_v28 = vmul.f32 0.044715, %v753_v6 }
 0x111   :  { %v237_v29 = vpop.f32.mrf.mxu0  ;;  %v446_v30 = vpop.f32.mrf.mxu1  ;;  %v1644_v15 = vmul.f32 %v1516_v24, %v2875_v25 }
 0x112   :  { %v2923_v36 = vadd.f32 %v237_v29, %v2747_v17  ;;  %v2926_v37 = vadd.f32 %v446_v30, %v2749_v18  ;;  %v1645_v38 = vmul.f32 %v1517_v27, %v2878_v26  ;;  %v1008_v16 = vadd.f32 %v880_v7, %v2907_v9 }
 0x113   :  { %1833 = vmatmul.f32.gmra.mxu2 %v1644_v15  ;;  %v1009_v39 = vadd.f32 %v881_v28, %v2910_v10 }
 0x114   :  { %v2344_v33 = vpop.eup %2343  ;;  %v626_v40 = vmul.f32 %v2923_v36, %v2923_v36  ;;  %v627_v25 = vmul.f32 %v2926_v37, %v2926_v37  ;;  %2042 = vmatmul.f32.gmra.mxu3 %v1645_v38  ;;  %284 = vmatmul.f32.gmra.mxu0 %v110_v35  ;;  %v1136_v43 = vmul.f32 0.7978846, %v1008_v16 }
 0x115   :  { %v2346_v34 = vpop.eup %2345  ;;  %493 = vmatmul.f32.gmra.mxu1 %v110_v35  ;;  %v1390_v44 = vadd.f32 1.0, %v2344_v33  ;;  %v1137_v45 = vmul.f32 0.7978846, %v1009_v39 }
 0x116   :  { %v1391_v26 = vadd.f32 1.0, %v2346_v34  ;;  %2347 = vtanh.f32 %v1136_v43  ;;  %v754_v46 = vmul.f32 %v626_v40, %v2923_v36  ;;  %v755_v31 = vmul.f32 %v627_v25, %v2926_v37  ;;  %v113_v43 = vld [vmem:[#allocation2 + $0xf8] sm:$0xff] }
 0x117   :  { %v1518_v47 = vmul.f32 0.5, %v1390_v44  ;;  %2349 = vtanh.f32 %v1137_v45 }
 0x118   :  { %v1519_v52 = vmul.f32 0.5, %v1391_v26  ;;  %v882_v32 = vmul.f32 0.044715, %v754_v46  ;;  %v883_v53 = vmul.f32 0.044715, %v755_v31 }
 0x119   :  { %v240_v54 = vpop.f32.mrf.mxu0  ;;  %v449_v55 = vpop.f32.mrf.mxu1  ;;  %v1646_v41 = vmul.f32 %v1518_v47, %v2891_v50 }
 0x11a   :  { %v2939_v59 = vadd.f32 %v240_v54, %v2747_v17  ;;  %v2942_v60 = vadd.f32 %v449_v55, %v2749_v18  ;;  %v1647_v61 = vmul.f32 %v1519_v52, %v2894_v51  ;;  %v1010_v42 = vadd.f32 %v882_v32, %v2923_v36 }
 0x11b   :  { %1836 = vmatmul.f32.gmra.mxu2 %v1646_v41  ;;  %v1011_v62 = vadd.f32 %v883_v53, %v2926_v37 }
 0x11c   :  { %v2348_v48 = vpop.eup %2347  ;;  %v628_v63 = vmul.f32 %v2939_v59, %v2939_v59  ;;  %v629_v50 = vmul.f32 %v2942_v60, %v2942_v60  ;;  %2045 = vmatmul.f32.gmra.mxu3 %v1647_v61  ;;  %287 = vmatmul.f32.gmra.mxu0 %v111_v58  ;;  %v1138_v2 = vmul.f32 0.7978846, %v1010_v42 }
 0x11d   :  { %v2350_v49 = vpop.eup %2349  ;;  %496 = vmatmul.f32.gmra.mxu1 %v111_v58  ;;  %v1392_v3 = vadd.f32 1.0, %v2348_v48  ;;  %v1139_v4 = vmul.f32 0.7978846, %v1011_v62 }
 0x11e   :  { %v1393_v51 = vadd.f32 1.0, %v2350_v49  ;;  %2351 = vtanh.f32 %v1138_v2  ;;  %v756_v5 = vmul.f32 %v628_v63, %v2939_v59  ;;  %v757_v56 = vmul.f32 %v629_v50, %v2942_v60  ;;  %v114_v2 = vld [vmem:[#allocation2 + $0x100] sm:$0xff] }
 0x11f   :  { %v1520_v8 = vmul.f32 0.5, %v1392_v3  ;;  %2353 = vtanh.f32 %v1139_v4 }
 0x120   :  { %v1521_v11 = vmul.f32 0.5, %v1393_v51  ;;  %v884_v57 = vmul.f32 0.044715, %v756_v5  ;;  %v885_v12 = vmul.f32 0.044715, %v757_v56 }
 0x121   :  { %v243_v13 = vpop.f32.mrf.mxu0  ;;  %v452_v14 = vpop.f32.mrf.mxu1  ;;  %v1648_v0 = vmul.f32 %v1520_v8, %v2907_v9 }
 0x122   :  { %v2955_v20 = vadd.f32 %v243_v13, %v2747_v17  ;;  %v2958_v21 = vadd.f32 %v452_v14, %v2749_v18  ;;  %v1649_v22 = vmul.f32 %v1521_v11, %v2910_v10  ;;  %v1012_v1 = vadd.f32 %v884_v57, %v2939_v59 }
 0x123   :  { %1839 = vmatmul.f32.gmra.mxu2 %v1648_v0  ;;  %v1013_v23 = vadd.f32 %v885_v12, %v2942_v60 }
 0x124   :  { %v2352_v6 = vpop.eup %2351  ;;  %v630_v24 = vmul.f32 %v2955_v20, %v2955_v20  ;;  %v631_v9 = vmul.f32 %v2958_v21, %v2958_v21  ;;  %2048 = vmatmul.f32.gmra.mxu3 %v1649_v22  ;;  %290 = vmatmul.f32.gmra.mxu0 %v112_v19  ;;  %v1140_v27 = vmul.f32 0.7978846, %v1012_v1 }
 0x125   :  { %v2354_v7 = vpop.eup %2353  ;;  %499 = vmatmul.f32.gmra.mxu1 %v112_v19  ;;  %v1394_v28 = vadd.f32 1.0, %v2352_v6  ;;  %v1141_v29 = vmul.f32 0.7978846, %v1013_v23 }
 0x126   :  { %v1395_v10 = vadd.f32 1.0, %v2354_v7  ;;  %2355 = vtanh.f32 %v1140_v27  ;;  %v758_v30 = vmul.f32 %v630_v24, %v2955_v20  ;;  %v759_v15 = vmul.f32 %v631_v9, %v2958_v21  ;;  %v115_v27 = vld [vmem:[#allocation2 + $0x108] sm:$0xff] }
 0x127   :  { %v1522_v35 = vmul.f32 0.5, %v1394_v28  ;;  %2357 = vtanh.f32 %v1141_v29 }
 0x128   :  { %v1523_v38 = vmul.f32 0.5, %v1395_v10  ;;  %v886_v16 = vmul.f32 0.044715, %v758_v30  ;;  %v887_v39 = vmul.f32 0.044715, %v759_v15 }
 0x129   :  { %v246_v33 = vpop.f32.mrf.mxu0  ;;  %v455_v40 = vpop.f32.mrf.mxu1  ;;  %v1650_v25 = vmul.f32 %v1522_v35, %v2923_v36 }
 0x12a   :  { %v2971_v34 = vadd.f32 %v246_v33, %v2747_v17  ;;  %v2974_v44 = vadd.f32 %v455_v40, %v2749_v18  ;;  %v1651_v45 = vmul.f32 %v1523_v38, %v2926_v37  ;;  %v1014_v26 = vadd.f32 %v886_v16, %v2955_v20 }
 0x12b   :  { %1842 = vmatmul.f32.gmra.mxu2 %v1650_v25  ;;  %v1015_v46 = vadd.f32 %v887_v39, %v2958_v21 }
 0x12c   :  { %v2356_v31 = vpop.eup %2355  ;;  %v632_v47 = vmul.f32 %v2971_v34, %v2971_v34  ;;  %v633_v36 = vmul.f32 %v2974_v44, %v2974_v44  ;;  %2051 = vmatmul.f32.gmra.mxu3 %v1651_v45  ;;  %293 = vmatmul.f32.gmra.mxu0 %v113_v43  ;;  %v1142_v52 = vmul.f32 0.7978846, %v1014_v26 }
 0x12d   :  { %v2358_v32 = vpop.eup %2357  ;;  %502 = vmatmul.f32.gmra.mxu1 %v113_v43  ;;  %v1396_v53 = vadd.f32 1.0, %v2356_v31  ;;  %v1143_v54 = vmul.f32 0.7978846, %v1015_v46 }
 0x12e   :  { %v1397_v37 = vadd.f32 1.0, %v2358_v32  ;;  %2359 = vtanh.f32 %v1142_v52  ;;  %v760_v55 = vmul.f32 %v632_v47, %v2971_v34  ;;  %v761_v41 = vmul.f32 %v633_v36, %v2974_v44  ;;  %v116_v52 = vld [vmem:[#allocation2 + $0x110] sm:$0xff] }
 0x12f   :  { %v1524_v58 = vmul.f32 0.5, %v1396_v53  ;;  %2361 = vtanh.f32 %v1143_v54 }
 0x130   :  { %v1525_v61 = vmul.f32 0.5, %v1397_v37  ;;  %v888_v42 = vmul.f32 0.044715, %v760_v55  ;;  %v889_v62 = vmul.f32 0.044715, %v761_v41 }
 0x131   :  { %v249_v48 = vpop.f32.mrf.mxu0  ;;  %v458_v63 = vpop.f32.mrf.mxu1  ;;  %v1652_v50 = vmul.f32 %v1524_v58, %v2939_v59 }
 0x132   :  { %v2987_v49 = vadd.f32 %v249_v48, %v2747_v17  ;;  %v2990_v3 = vadd.f32 %v458_v63, %v2749_v18  ;;  %v1653_v4 = vmul.f32 %v1525_v61, %v2942_v60  ;;  %v1016_v51 = vadd.f32 %v888_v42, %v2971_v34 }
 0x133   :  { %1845 = vmatmul.f32.gmra.mxu2 %v1652_v50  ;;  %v1017_v5 = vadd.f32 %v889_v62, %v2974_v44 }
 0x134   :  { %v2360_v56 = vpop.eup %2359  ;;  %v634_v8 = vmul.f32 %v2987_v49, %v2987_v49  ;;  %v635_v59 = vmul.f32 %v2990_v3, %v2990_v3  ;;  %2054 = vmatmul.f32.gmra.mxu3 %v1653_v4  ;;  %296 = vmatmul.f32.gmra.mxu0 %v114_v2  ;;  %v1144_v11 = vmul.f32 0.7978846, %v1016_v51 }
 0x135   :  { %v2362_v57 = vpop.eup %2361  ;;  %505 = vmatmul.f32.gmra.mxu1 %v114_v2  ;;  %v1398_v12 = vadd.f32 1.0, %v2360_v56  ;;  %v1145_v13 = vmul.f32 0.7978846, %v1017_v5 }
 0x136   :  { %v1399_v60 = vadd.f32 1.0, %v2362_v57  ;;  %2363 = vtanh.f32 %v1144_v11  ;;  %v762_v14 = vmul.f32 %v634_v8, %v2987_v49  ;;  %v763_v0 = vmul.f32 %v635_v59, %v2990_v3  ;;  %v117_v59 = vld [vmem:[#allocation2 + $0x118] sm:$0xff] }
 0x137   :  { %v1526_v19 = vmul.f32 0.5, %v1398_v12  ;;  %2365 = vtanh.f32 %v1145_v13 }
 0x138   :  { %v1527_v22 = vmul.f32 0.5, %v1399_v60  ;;  %v890_v1 = vmul.f32 0.044715, %v762_v14  ;;  %v891_v23 = vmul.f32 0.044715, %v763_v0 }
 0x139   :  { %v252_v6 = vpop.f32.mrf.mxu0  ;;  %v461_v24 = vpop.f32.mrf.mxu1  ;;  %v1654_v9 = vmul.f32 %v1526_v19, %v2955_v20  ;;  %v3046_v0 = vld [vmem:[%s3841_s4] ss:$0 sm:$0xff] }
 0x13a   :  { %v3003_v7 = vadd.f32 %v252_v6, %v2747_v17  ;;  %v3006_v28 = vadd.f32 %v461_v24, %v2749_v18  ;;  %v1655_v29 = vmul.f32 %v1527_v22, %v2958_v21  ;;  %v1018_v10 = vadd.f32 %v890_v1, %v2987_v49 }
 0x13b   :  { %1848 = vmatmul.f32.gmra.mxu2 %v1654_v9  ;;  %v1019_v30 = vadd.f32 %v891_v23, %v2990_v3 }
 0x13c   :  { %v2364_v15 = vpop.eup %2363  ;;  %v636_v35 = vmul.f32 %v3003_v7, %v3003_v7  ;;  %v637_v20 = vmul.f32 %v3006_v28, %v3006_v28  ;;  %2057 = vmatmul.f32.gmra.mxu3 %v1655_v29  ;;  %299 = vmatmul.f32.gmra.mxu0 %v115_v27  ;;  %v1146_v38 = vmul.f32 0.7978846, %v1018_v10 }
 0x13d   :  { %v2366_v16 = vpop.eup %2365  ;;  %508 = vmatmul.f32.gmra.mxu1 %v115_v27  ;;  %v1400_v39 = vadd.f32 1.0, %v2364_v15  ;;  %v1147_v33 = vmul.f32 0.7978846, %v1019_v30 }
 0x13e   :  { %v1401_v21 = vadd.f32 1.0, %v2366_v16  ;;  %2367 = vtanh.f32 %v1146_v38  ;;  %v764_v40 = vmul.f32 %v636_v35, %v3003_v7  ;;  %v765_v25 = vmul.f32 %v637_v20, %v3006_v28 }
 0x13f   :  { %v1528_v43 = vmul.f32 0.5, %v1400_v39  ;;  %2369 = vtanh.f32 %v1147_v33  ;;  %v118_v33 = vld [vmem:[#allocation2 + $0x120] sm:$0xff] }
 0x140   :  { %v1529_v45 = vmul.f32 0.5, %v1401_v21  ;;  %v892_v26 = vmul.f32 0.044715, %v764_v40  ;;  %v893_v46 = vmul.f32 0.044715, %v765_v25 }
 0x141   :  { %v255_v31 = vpop.f32.mrf.mxu0  ;;  %v464_v47 = vpop.f32.mrf.mxu1  ;;  %v1656_v36 = vmul.f32 %v1528_v43, %v2971_v34 }
 0x142   :  { %v3019_v32 = vadd.f32 %v255_v31, %v2747_v17  ;;  %v3022_v53 = vadd.f32 %v464_v47, %v2749_v18  ;;  %v1657_v54 = vmul.f32 %v1529_v45, %v2974_v44  ;;  %v1020_v37 = vadd.f32 %v892_v26, %v3003_v7 }
 0x143   :  { %1851 = vmatmul.f32.gmra.mxu2 %v1656_v36  ;;  %v1021_v55 = vadd.f32 %v893_v46, %v3006_v28 }
 0x144   :  { %v2368_v41 = vpop.eup %2367  ;;  %v638_v58 = vmul.f32 %v3019_v32, %v3019_v32  ;;  %v639_v34 = vmul.f32 %v3022_v53, %v3022_v53  ;;  %2060 = vmatmul.f32.gmra.mxu3 %v1657_v54  ;;  %302 = vmatmul.f32.gmra.mxu0 %v116_v52  ;;  %v1148_v61 = vmul.f32 0.7978846, %v1020_v37 }
 0x145   :  { %v2370_v42 = vpop.eup %2369  ;;  %511 = vmatmul.f32.gmra.mxu1 %v116_v52  ;;  %v1402_v62 = vadd.f32 1.0, %v2368_v41  ;;  %v1149_v48 = vmul.f32 0.7978846, %v1021_v55 }
 0x146   :  { %v1403_v44 = vadd.f32 1.0, %v2370_v42  ;;  %2371 = vtanh.f32 %v1148_v61  ;;  %v766_v63 = vmul.f32 %v638_v58, %v3019_v32  ;;  %v767_v50 = vmul.f32 %v639_v34, %v3022_v53 }
 0x147   :  { %v1530_v2 = vmul.f32 0.5, %v1402_v62  ;;  %2373 = vtanh.f32 %v1149_v48 }
 0x148   :  { %v1531_v4 = vmul.f32 0.5, %v1403_v44  ;;  %v894_v51 = vmul.f32 0.044715, %v766_v63  ;;  %v895_v5 = vmul.f32 0.044715, %v767_v50 }
 0x149   :  { %v258_v56 = vpop.f32.mrf.mxu0  ;;  %v1658_v8 = vmul.f32 %v1530_v2, %v2987_v49  ;;  %v119_v2 = vld [vmem:[#allocation2 + $0x128] sm:$0xff] }
 0x14a   :  { %v3035_v11 = vadd.f32 %v258_v56, %v2747_v17  ;;  %v467_v57 = vpop.f32.mrf.mxu1  ;;  %v1659_v12 = vmul.f32 %v1531_v4, %v2990_v3  ;;  %v1022_v13 = vadd.f32 %v894_v51, %v3019_v32  ;;  %v1023_v60 = vadd.f32 %v895_v5, %v3022_v53 }
 0x14b   :  { %v3041_v14 = vadd.f32 %v467_v57, %v2749_v18  ;;  %1854 = vmatmul.f32.gmra.mxu2 %v1658_v8 }
 0x14c   :  { %v2372_v49 = vpop.eup %2371  ;;  %v640_v19 = vmul.f32 %v3035_v11, %v3035_v11  ;;  %2063 = vmatmul.f32.gmra.mxu3 %v1659_v12  ;;  %305 = vmatmul.f32.gmra.mxu0 %v117_v59  ;;  %v1150_v3 = vmul.f32 0.7978846, %v1022_v13  ;;  %v1151_v22 = vmul.f32 0.7978846, %v1023_v60 }
 0x14d   :  { %v2374_v1 = vpop.eup %2373  ;;  %v641_v23 = vmul.f32 %v3041_v14, %v3041_v14  ;;  %514 = vmatmul.f32.gmra.mxu1 %v117_v59  ;;  %v1404_v6 = vadd.f32 1.0, %v2372_v49 }
 0x14e   :  { %v1807_v24 = vpop.f32.mrf.mxu2  ;;  %v1405_v9 = vadd.f32 1.0, %v2374_v1  ;;  %2375 = vtanh.f32 %v1150_v3  ;;  %v768_v27 = vmul.f32 %v640_v19, %v3035_v11 }
 0x14f   :  { %v1808_v29 = vadd.f32 %v3046_v0, %v1807_v24  ;;  %v2016_v10 = vpop.f32.mrf.mxu3  ;;  %v1532_v30 = vmul.f32 0.5, %v1404_v6  ;;  %2377 = vtanh.f32 %v1151_v22  ;;  %v769_v15 = vmul.f32 %v641_v23, %v3041_v14 }
 0x150   :  { %v1533_v35 = vmul.f32 0.5, %v1405_v9  ;;  %v896_v20 = vmul.f32 0.044715, %v768_v27 }
 0x151   :  { %v2017_v38 = vadd.f32 %v2016_v10, %v1808_v29  ;;  %v261_v16 = vpop.f32.mrf.mxu0  ;;  %v1660_v39 = vmul.f32 %v1532_v30, %v3003_v7  ;;  %v897_v21 = vmul.f32 0.044715, %v769_v15 }
 0x152   :  { %v3057_v40 = vadd.f32 %v261_v16, %v2747_v17  ;;  %v470_v25 = vpop.f32.mrf.mxu1  ;;  %v1661_v43 = vmul.f32 %v1533_v35, %v3006_v28  ;;  %v1024_v45 = vadd.f32 %v896_v20, %v3035_v11  ;;  %v120_v35 = vld [vmem:[#allocation2 + $0x130] sm:$0xff] }
 0x153   :  { %2208 = vst [vmem:[#allocation10] sm:$0xff] %v2017_v38  ;;  %v3062_v26 = vadd.f32 %v470_v25, %v2749_v18  ;;  %1857 = vmatmul.f32.gmra.mxu2 %v1660_v39  ;;  %v1025_v46 = vadd.f32 %v897_v21, %v3041_v14 }
 0x154   :  { %v2376_v31 = vpop.eup %2375  ;;  %v642_v7 = vmul.f32 %v3057_v40, %v3057_v40  ;;  %2066 = vmatmul.f32.gmra.mxu3 %v1661_v43  ;;  %308 = vmatmul.f32.gmra.mxu0 %v118_v33  ;;  %v1152_v47 = vmul.f32 0.7978846, %v1024_v45 }
 0x155   :  { %v2378_v36 = vpop.eup %2377  ;;  %v643_v28 = vmul.f32 %v3062_v26, %v3062_v26  ;;  %517 = vmatmul.f32.gmra.mxu1 %v118_v33  ;;  %v1406_v52 = vadd.f32 1.0, %v2376_v31  ;;  %v1153_v54 = vmul.f32 0.7978846, %v1025_v46 }
 0x156   :  { %v1810_v37 = vpop.f32.mrf.mxu2  ;;  %v1407_v55 = vadd.f32 1.0, %v2378_v36  ;;  %2379 = vtanh.f32 %v1152_v47  ;;  %v770_v41 = vmul.f32 %v642_v7, %v3057_v40 }
 0x157   :  { %v1811_v58 = vadd.f32 %v3046_v0, %v1810_v37  ;;  %v2019_v34 = vpop.f32.mrf.mxu3  ;;  %v1534_v61 = vmul.f32 0.5, %v1406_v52  ;;  %2381 = vtanh.f32 %v1153_v54  ;;  %v771_v42 = vmul.f32 %v643_v28, %v3062_v26 }
 0x158   :  { %v1535_v62 = vmul.f32 0.5, %v1407_v55  ;;  %v898_v48 = vmul.f32 0.044715, %v770_v41 }
 0x159   :  { %v2020_v44 = vadd.f32 %v2019_v34, %v1811_v58  ;;  %v264_v63 = vpop.f32.mrf.mxu0  ;;  %v1662_v50 = vmul.f32 %v1534_v61, %v3019_v32  ;;  %v899_v4 = vmul.f32 0.044715, %v771_v42 }
 0x15a   :  { %v3074_v51 = vadd.f32 %v264_v63, %v2747_v17  ;;  %v473_v5 = vpop.f32.mrf.mxu1  ;;  %v1663_v56 = vmul.f32 %v1535_v62, %v3022_v53  ;;  %v1026_v8 = vadd.f32 %v898_v48, %v3057_v40  ;;  %v121_v62 = vld [vmem:[#allocation2 + $0x138] sm:$0xff] }
 0x15b   :  { %2209 = vst [vmem:[#allocation10 + $0x8] sm:$0xff] %v2020_v44  ;;  %v3079_v59 = vadd.f32 %v473_v5, %v2749_v18  ;;  %1860 = vmatmul.f32.gmra.mxu2 %v1662_v50  ;;  %v1027_v57 = vadd.f32 %v899_v4, %v3062_v26 }
 0x15c   :  { %v2380_v12 = vpop.eup %2379  ;;  %v644_v32 = vmul.f32 %v3074_v51, %v3074_v51  ;;  %2069 = vmatmul.f32.gmra.mxu3 %v1663_v56  ;;  %311 = vmatmul.f32.gmra.mxu0 %v119_v2  ;;  %v1154_v13 = vmul.f32 0.7978846, %v1026_v8 }
 0x15d   :  { %v2382_v60 = vpop.eup %2381  ;;  %v645_v53 = vmul.f32 %v3079_v59, %v3079_v59  ;;  %520 = vmatmul.f32.gmra.mxu1 %v119_v2  ;;  %v1408_v49 = vadd.f32 1.0, %v2380_v12  ;;  %v1155_v19 = vmul.f32 0.7978846, %v1027_v57 }
 0x15e   :  { %v1813_v3 = vpop.f32.mrf.mxu2  ;;  %v1409_v22 = vadd.f32 1.0, %v2382_v60  ;;  %2383 = vtanh.f32 %v1154_v13  ;;  %v772_v1 = vmul.f32 %v644_v32, %v3074_v51 }
 0x15f   :  { %v1814_v23 = vadd.f32 %v3046_v0, %v1813_v3  ;;  %v2022_v6 = vpop.f32.mrf.mxu3  ;;  %v1536_v24 = vmul.f32 0.5, %v1408_v49  ;;  %2385 = vtanh.f32 %v1155_v19  ;;  %v773_v9 = vmul.f32 %v645_v53, %v3079_v59 }
 0x160   :  { %v1537_v27 = vmul.f32 0.5, %v1409_v22  ;;  %v900_v29 = vmul.f32 0.044715, %v772_v1 }
 0x161   :  { %v2023_v10 = vadd.f32 %v2022_v6, %v1814_v23  ;;  %v267_v30 = vpop.f32.mrf.mxu0  ;;  %v1664_v15 = vmul.f32 %v1536_v24, %v3035_v11  ;;  %v901_v20 = vmul.f32 0.044715, %v773_v9 }
 0x162   :  { %v3091_v38 = vadd.f32 %v267_v30, %v2747_v17  ;;  %v476_v16 = vpop.f32.mrf.mxu1  ;;  %v1665_v39 = vmul.f32 %v1537_v27, %v3041_v14  ;;  %v1028_v33 = vadd.f32 %v900_v29, %v3074_v51  ;;  %v122_v27 = vld [vmem:[#allocation2 + $0x140] sm:$0xff] }
 0x163   :  { %2210 = vst [vmem:[#allocation10 + $0x10] sm:$0xff] %v2023_v10  ;;  %v3096_v21 = vadd.f32 %v476_v16, %v2749_v18  ;;  %1863 = vmatmul.f32.gmra.mxu2 %v1664_v15  ;;  %v1029_v25 = vadd.f32 %v901_v20, %v3079_v59 }
 0x164   :  { %v2384_v43 = vpop.eup %2383  ;;  %v646_v11 = vmul.f32 %v3091_v38, %v3091_v38  ;;  %2072 = vmatmul.f32.gmra.mxu3 %v1665_v39  ;;  %314 = vmatmul.f32.gmra.mxu0 %v120_v35  ;;  %v1156_v45 = vmul.f32 0.7978846, %v1028_v33 }
 0x165   :  { %v2386_v46 = vpop.eup %2385  ;;  %v647_v14 = vmul.f32 %v3096_v21, %v3096_v21  ;;  %523 = vmatmul.f32.gmra.mxu1 %v120_v35  ;;  %v1410_v31 = vadd.f32 1.0, %v2384_v43  ;;  %v1157_v7 = vmul.f32 0.7978846, %v1029_v25 }
 0x166   :  { %v1816_v47 = vpop.f32.mrf.mxu2  ;;  %v1411_v36 = vadd.f32 1.0, %v2386_v46  ;;  %2387 = vtanh.f32 %v1156_v45  ;;  %v774_v28 = vmul.f32 %v646_v11, %v3091_v38 }
 0x167   :  { %v1817_v52 = vadd.f32 %v3046_v0, %v1816_v47  ;;  %v2025_v54 = vpop.f32.mrf.mxu3  ;;  %v1538_v37 = vmul.f32 0.5, %v1410_v31  ;;  %2389 = vtanh.f32 %v1157_v7  ;;  %v775_v55 = vmul.f32 %v647_v14, %v3096_v21 }
 0x168   :  { %v1539_v41 = vmul.f32 0.5, %v1411_v36  ;;  %v902_v58 = vmul.f32 0.044715, %v774_v28 }
 0x169   :  { %v2026_v34 = vadd.f32 %v2025_v54, %v1817_v52  ;;  %v270_v61 = vpop.f32.mrf.mxu0  ;;  %v1666_v42 = vmul.f32 %v1538_v37, %v3057_v40  ;;  %v903_v48 = vmul.f32 0.044715, %v775_v55 }
 0x16a   :  { %v3108_v44 = vadd.f32 %v270_v61, %v2747_v17  ;;  %v479_v63 = vpop.f32.mrf.mxu1  ;;  %v1667_v50 = vmul.f32 %v1539_v41, %v3062_v26  ;;  %v1030_v2 = vadd.f32 %v902_v58, %v3091_v38  ;;  %v123_v58 = vld [vmem:[#allocation2 + $0x148] sm:$0xff] }
 0x16b   :  { %2211 = vst [vmem:[#allocation10 + $0x18] sm:$0xff] %v2026_v34  ;;  %v3113_v4 = vadd.f32 %v479_v63, %v2749_v18  ;;  %1866 = vmatmul.f32.gmra.mxu2 %v1666_v42  ;;  %v1031_v5 = vadd.f32 %v903_v48, %v3096_v21 }
 0x16c   :  { %v2388_v56 = vpop.eup %2387  ;;  %v648_v40 = vmul.f32 %v3108_v44, %v3108_v44  ;;  %2075 = vmatmul.f32.gmra.mxu3 %v1667_v50  ;;  %317 = vmatmul.f32.gmra.mxu0 %v121_v62  ;;  %v1158_v8 = vmul.f32 0.7978846, %v1030_v2 }
 0x16d   :  { %v2390_v57 = vpop.eup %2389  ;;  %v649_v26 = vmul.f32 %v3113_v4, %v3113_v4  ;;  %526 = vmatmul.f32.gmra.mxu1 %v121_v62  ;;  %v1412_v12 = vadd.f32 1.0, %v2388_v56  ;;  %v1159_v32 = vmul.f32 0.7978846, %v1031_v5 }
 0x16e   :  { %v1819_v13 = vpop.f32.mrf.mxu2  ;;  %v1413_v60 = vadd.f32 1.0, %v2390_v57  ;;  %2391 = vtanh.f32 %v1158_v8  ;;  %v776_v53 = vmul.f32 %v648_v40, %v3108_v44 }
 0x16f   :  { %v1820_v49 = vadd.f32 %v3046_v0, %v1819_v13  ;;  %v2028_v19 = vpop.f32.mrf.mxu3  ;;  %v1540_v3 = vmul.f32 0.5, %v1412_v12  ;;  %2393 = vtanh.f32 %v1159_v32  ;;  %v777_v22 = vmul.f32 %v649_v26, %v3113_v4 }
 0x170   :  { %v1541_v1 = vmul.f32 0.5, %v1413_v60  ;;  %v904_v23 = vmul.f32 0.044715, %v776_v53 }
 0x171   :  { %v2029_v6 = vadd.f32 %v2028_v19, %v1820_v49  ;;  %v273_v24 = vpop.f32.mrf.mxu0  ;;  %v1668_v9 = vmul.f32 %v1540_v3, %v3074_v51  ;;  %v905_v29 = vmul.f32 0.044715, %v777_v22 }
 0x172   :  { %v3125_v10 = vadd.f32 %v273_v24, %v2747_v17  ;;  %v482_v30 = vpop.f32.mrf.mxu1  ;;  %v1669_v15 = vmul.f32 %v1541_v1, %v3079_v59  ;;  %v1032_v35 = vadd.f32 %v904_v23, %v3108_v44  ;;  %v124_v23 = vld [vmem:[#allocation2 + $0x150] sm:$0xff] }
 0x173   :  { %2212 = vst [vmem:[#allocation10 + $0x20] sm:$0xff] %v2029_v6  ;;  %v3130_v20 = vadd.f32 %v482_v30, %v2749_v18  ;;  %1869 = vmatmul.f32.gmra.mxu2 %v1668_v9  ;;  %v1033_v16 = vadd.f32 %v905_v29, %v3113_v4 }
 0x174   :  { %v2392_v39 = vpop.eup %2391  ;;  %v650_v51 = vmul.f32 %v3125_v10, %v3125_v10  ;;  %2078 = vmatmul.f32.gmra.mxu3 %v1669_v15  ;;  %320 = vmatmul.f32.gmra.mxu0 %v122_v27  ;;  %v1160_v33 = vmul.f32 0.7978846, %v1032_v35 }
 0x175   :  { %v2394_v25 = vpop.eup %2393  ;;  %v651_v59 = vmul.f32 %v3130_v20, %v3130_v20  ;;  %529 = vmatmul.f32.gmra.mxu1 %v122_v27  ;;  %v1414_v43 = vadd.f32 1.0, %v2392_v39  ;;  %v1161_v11 = vmul.f32 0.7978846, %v1033_v16 }
 0x176   :  { %v778_v45 = vmul.f32 %v650_v51, %v3125_v10  ;;  %v1822_v46 = vpop.f32.mrf.mxu2  ;;  %v1415_v14 = vadd.f32 1.0, %v2394_v25  ;;  %2395 = vtanh.f32 %v1160_v33 }
 0x177   :  { %v779_v31 = vmul.f32 %v651_v59, %v3130_v20  ;;  %v1823_v7 = vadd.f32 %v3046_v0, %v1822_v46  ;;  %v2031_v47 = vpop.f32.mrf.mxu3  ;;  %v1542_v36 = vmul.f32 0.5, %v1414_v43  ;;  %2397 = vtanh.f32 %v1161_v11 }
 0x178   :  { %v906_v28 = vmul.f32 0.044715, %v778_v45  ;;  %v1543_v52 = vmul.f32 0.5, %v1415_v14 }
 0x179   :  { %v907_v54 = vmul.f32 0.044715, %v779_v31  ;;  %v2032_v37 = vadd.f32 %v2031_v47, %v1823_v7  ;;  %v276_v55 = vpop.f32.mrf.mxu0  ;;  %v1670_v41 = vmul.f32 %v1542_v36, %v3091_v38 }
 0x17a   :  { %v3142_v34 = vadd.f32 %v276_v55, %v2747_v17  ;;  %v485_v61 = vpop.f32.mrf.mxu1  ;;  %v1671_v42 = vmul.f32 %v1543_v52, %v3096_v21  ;;  %v1034_v62 = vadd.f32 %v906_v28, %v3125_v10  ;;  %v125_v52 = vld [vmem:[#allocation2 + $0x158] sm:$0xff] }
 0x17b   :  { %2213 = vst [vmem:[#allocation10 + $0x28] sm:$0xff] %v2032_v37  ;;  %v3147_v48 = vadd.f32 %v485_v61, %v2749_v18  ;;  %1872 = vmatmul.f32.gmra.mxu2 %v1670_v41  ;;  %v1035_v63 = vadd.f32 %v907_v54, %v3130_v20 }
 0x17c   :  { %v2396_v50 = vpop.eup %2395  ;;  %v652_v38 = vmul.f32 %v3142_v34, %v3142_v34  ;;  %2081 = vmatmul.f32.gmra.mxu3 %v1671_v42  ;;  %323 = vmatmul.f32.gmra.mxu0 %v123_v58  ;;  %v1162_v2 = vmul.f32 0.7978846, %v1034_v62 }
 0x17d   :  { %v2398_v5 = vpop.eup %2397  ;;  %v653_v21 = vmul.f32 %v3147_v48, %v3147_v48  ;;  %532 = vmatmul.f32.gmra.mxu1 %v123_v58  ;;  %v1416_v56 = vadd.f32 1.0, %v2396_v50  ;;  %v1163_v40 = vmul.f32 0.7978846, %v1035_v63 }
 0x17e   :  { %v780_v8 = vmul.f32 %v652_v38, %v3142_v34  ;;  %v1825_v57 = vpop.f32.mrf.mxu2  ;;  %v1417_v26 = vadd.f32 1.0, %v2398_v5  ;;  %2399 = vtanh.f32 %v1162_v2 }
 0x17f   :  { %v781_v12 = vmul.f32 %v653_v21, %v3147_v48  ;;  %v1826_v32 = vadd.f32 %v3046_v0, %v1825_v57  ;;  %v2034_v13 = vpop.f32.mrf.mxu3  ;;  %v1544_v60 = vmul.f32 0.5, %v1416_v56  ;;  %2401 = vtanh.f32 %v1163_v40 }
 0x180   :  { %v908_v53 = vmul.f32 0.044715, %v780_v8  ;;  %v1545_v49 = vmul.f32 0.5, %v1417_v26 }
 0x181   :  { %v909_v19 = vmul.f32 0.044715, %v781_v12  ;;  %v2035_v3 = vadd.f32 %v2034_v13, %v1826_v32  ;;  %v279_v22 = vpop.f32.mrf.mxu0  ;;  %v1672_v1 = vmul.f32 %v1544_v60, %v3108_v44 }
 0x182   :  { %v3159_v6 = vadd.f32 %v279_v22, %v2747_v17  ;;  %v488_v24 = vpop.f32.mrf.mxu1  ;;  %v1673_v9 = vmul.f32 %v1545_v49, %v3113_v4  ;;  %v1036_v27 = vadd.f32 %v908_v53, %v3142_v34  ;;  %v126_v49 = vld [vmem:[#allocation2 + $0x160] sm:$0xff] }
 0x183   :  { %2214 = vst [vmem:[#allocation10 + $0x30] sm:$0xff] %v2035_v3  ;;  %v3164_v29 = vadd.f32 %v488_v24, %v2749_v18  ;;  %1875 = vmatmul.f32.gmra.mxu2 %v1672_v1  ;;  %v1037_v30 = vadd.f32 %v909_v19, %v3147_v48 }
 0x184   :  { %v2400_v15 = vpop.eup %2399  ;;  %v654_v44 = vmul.f32 %v3159_v6, %v3159_v6  ;;  %2084 = vmatmul.f32.gmra.mxu3 %v1673_v9  ;;  %326 = vmatmul.f32.gmra.mxu0 %v124_v23  ;;  %v1164_v35 = vmul.f32 0.7978846, %v1036_v27 }
 0x185   :  { %v2402_v16 = vpop.eup %2401  ;;  %v655_v4 = vmul.f32 %v3164_v29, %v3164_v29  ;;  %535 = vmatmul.f32.gmra.mxu1 %v124_v23  ;;  %v1418_v39 = vadd.f32 1.0, %v2400_v15  ;;  %v1165_v51 = vmul.f32 0.7978846, %v1037_v30 }
 0x186   :  { %v782_v33 = vmul.f32 %v654_v44, %v3159_v6  ;;  %v1828_v25 = vpop.f32.mrf.mxu2  ;;  %v1419_v59 = vadd.f32 1.0, %v2402_v16  ;;  %2403 = vtanh.f32 %v1164_v35 }
 0x187   :  { %v783_v43 = vmul.f32 %v655_v4, %v3164_v29  ;;  %v1829_v11 = vadd.f32 %v3046_v0, %v1828_v25  ;;  %v2037_v45 = vpop.f32.mrf.mxu3  ;;  %v1546_v46 = vmul.f32 0.5, %v1418_v39  ;;  %2405 = vtanh.f32 %v1165_v51 }
 0x188   :  { %v910_v14 = vmul.f32 0.044715, %v782_v33  ;;  %v1547_v31 = vmul.f32 0.5, %v1419_v59 }
 0x189   :  { %v911_v7 = vmul.f32 0.044715, %v783_v43  ;;  %v2038_v47 = vadd.f32 %v2037_v45, %v1829_v11  ;;  %v282_v36 = vpop.f32.mrf.mxu0  ;;  %v1674_v28 = vmul.f32 %v1546_v46, %v3125_v10 }
 0x18a   :  { %v3176_v54 = vadd.f32 %v282_v36, %v2747_v17  ;;  %v491_v37 = vpop.f32.mrf.mxu1  ;;  %v1675_v55 = vmul.f32 %v1547_v31, %v3130_v20  ;;  %v1038_v41 = vadd.f32 %v910_v14, %v3159_v6  ;;  %v127_v31 = vld [vmem:[#allocation2 + $0x168] sm:$0xff] }
 0x18b   :  { %2215 = vst [vmem:[#allocation10 + $0x38] sm:$0xff] %v2038_v47  ;;  %v3181_v58 = vadd.f32 %v491_v37, %v2749_v18  ;;  %1878 = vmatmul.f32.gmra.mxu2 %v1674_v28  ;;  %v1039_v61 = vadd.f32 %v911_v7, %v3164_v29 }
 0x18c   :  { %v2404_v42 = vpop.eup %2403  ;;  %v656_v10 = vmul.f32 %v3176_v54, %v3176_v54  ;;  %2087 = vmatmul.f32.gmra.mxu3 %v1675_v55  ;;  %329 = vmatmul.f32.gmra.mxu0 %v125_v52  ;;  %v1166_v62 = vmul.f32 0.7978846, %v1038_v41 }
 0x18d   :  { %v2406_v63 = vpop.eup %2405  ;;  %v657_v20 = vmul.f32 %v3181_v58, %v3181_v58  ;;  %538 = vmatmul.f32.gmra.mxu1 %v125_v52  ;;  %v1420_v50 = vadd.f32 1.0, %v2404_v42  ;;  %v1167_v38 = vmul.f32 0.7978846, %v1039_v61 }
 0x18e   :  { %v784_v2 = vmul.f32 %v656_v10, %v3176_v54  ;;  %v1831_v5 = vpop.f32.mrf.mxu2  ;;  %v1421_v21 = vadd.f32 1.0, %v2406_v63  ;;  %2407 = vtanh.f32 %v1166_v62 }
 0x18f   :  { %v785_v56 = vmul.f32 %v657_v20, %v3181_v58  ;;  %v1832_v40 = vadd.f32 %v3046_v0, %v1831_v5  ;;  %v2040_v8 = vpop.f32.mrf.mxu3  ;;  %v1548_v57 = vmul.f32 0.5, %v1420_v50  ;;  %2409 = vtanh.f32 %v1167_v38 }
 0x190   :  { %v912_v26 = vmul.f32 0.044715, %v784_v2  ;;  %v1549_v12 = vmul.f32 0.5, %v1421_v21 }
 0x191   :  { %v913_v32 = vmul.f32 0.044715, %v785_v56  ;;  %v2041_v13 = vadd.f32 %v2040_v8, %v1832_v40  ;;  %v285_v60 = vpop.f32.mrf.mxu0  ;;  %v1676_v53 = vmul.f32 %v1548_v57, %v3142_v34 }
 0x192   :  { %v3193_v19 = vadd.f32 %v285_v60, %v2747_v17  ;;  %v494_v3 = vpop.f32.mrf.mxu1  ;;  %v1677_v22 = vmul.f32 %v1549_v12, %v3147_v48  ;;  %v1040_v1 = vadd.f32 %v912_v26, %v3176_v54  ;;  %v128_v12 = vld [vmem:[#allocation2 + $0x170] sm:$0xff] }
 0x193   :  { %2216 = vst [vmem:[#allocation10 + $0x40] sm:$0xff] %v2041_v13  ;;  %v3198_v23 = vadd.f32 %v494_v3, %v2749_v18  ;;  %1881 = vmatmul.f32.gmra.mxu2 %v1676_v53  ;;  %v1041_v24 = vadd.f32 %v913_v32, %v3181_v58 }
 0x194   :  { %v2408_v9 = vpop.eup %2407  ;;  %v658_v34 = vmul.f32 %v3193_v19, %v3193_v19  ;;  %2090 = vmatmul.f32.gmra.mxu3 %v1677_v22  ;;  %332 = vmatmul.f32.gmra.mxu0 %v126_v49  ;;  %v1168_v27 = vmul.f32 0.7978846, %v1040_v1 }
 0x195   :  { %v2410_v30 = vpop.eup %2409  ;;  %v659_v48 = vmul.f32 %v3198_v23, %v3198_v23  ;;  %541 = vmatmul.f32.gmra.mxu1 %v126_v49  ;;  %v1422_v15 = vadd.f32 1.0, %v2408_v9  ;;  %v1169_v44 = vmul.f32 0.7978846, %v1041_v24 }
 0x196   :  { %v786_v35 = vmul.f32 %v658_v34, %v3193_v19  ;;  %v1834_v16 = vpop.f32.mrf.mxu2  ;;  %v1423_v4 = vadd.f32 1.0, %v2410_v30  ;;  %2411 = vtanh.f32 %v1168_v27 }
 0x197   :  { %v787_v39 = vmul.f32 %v659_v48, %v3198_v23  ;;  %v1835_v51 = vadd.f32 %v3046_v0, %v1834_v16  ;;  %v2043_v33 = vpop.f32.mrf.mxu3  ;;  %v1550_v25 = vmul.f32 0.5, %v1422_v15  ;;  %2413 = vtanh.f32 %v1169_v44 }
 0x198   :  { %v914_v59 = vmul.f32 0.044715, %v786_v35  ;;  %v1551_v43 = vmul.f32 0.5, %v1423_v4 }
 0x199   :  { %v915_v11 = vmul.f32 0.044715, %v787_v39  ;;  %v2044_v45 = vadd.f32 %v2043_v33, %v1835_v51  ;;  %v288_v46 = vpop.f32.mrf.mxu0  ;;  %v1678_v14 = vmul.f32 %v1550_v25, %v3159_v6 }
 0x19a   :  { %v3210_v7 = vadd.f32 %v288_v46, %v2747_v17  ;;  %v497_v47 = vpop.f32.mrf.mxu1  ;;  %v1679_v36 = vmul.f32 %v1551_v43, %v3164_v29  ;;  %v1042_v28 = vadd.f32 %v914_v59, %v3193_v19  ;;  %v129_v43 = vld [vmem:[#allocation2 + $0x178] sm:$0xff] }
 0x19b   :  { %2217 = vst [vmem:[#allocation10 + $0x48] sm:$0xff] %v2044_v45  ;;  %v3215_v52 = vadd.f32 %v497_v47, %v2749_v18  ;;  %1884 = vmatmul.f32.gmra.mxu2 %v1678_v14  ;;  %v1043_v37 = vadd.f32 %v915_v11, %v3198_v23 }
 0x19c   :  { %v2412_v55 = vpop.eup %2411  ;;  %v660_v6 = vmul.f32 %v3210_v7, %v3210_v7  ;;  %2093 = vmatmul.f32.gmra.mxu3 %v1679_v36  ;;  %335 = vmatmul.f32.gmra.mxu0 %v127_v31  ;;  %v1170_v41 = vmul.f32 0.7978846, %v1042_v28 }
 0x19d   :  { %v2414_v61 = vpop.eup %2413  ;;  %v661_v29 = vmul.f32 %v3215_v52, %v3215_v52  ;;  %544 = vmatmul.f32.gmra.mxu1 %v127_v31  ;;  %v1424_v42 = vadd.f32 1.0, %v2412_v55  ;;  %v1171_v10 = vmul.f32 0.7978846, %v1043_v37 }
 0x19e   :  { %v788_v62 = vmul.f32 %v660_v6, %v3210_v7  ;;  %v1837_v63 = vpop.f32.mrf.mxu2  ;;  %v1425_v20 = vadd.f32 1.0, %v2414_v61  ;;  %2415 = vtanh.f32 %v1170_v41 }
 0x19f   :  { %v789_v50 = vmul.f32 %v661_v29, %v3215_v52  ;;  %v1838_v38 = vadd.f32 %v3046_v0, %v1837_v63  ;;  %v2046_v2 = vpop.f32.mrf.mxu3  ;;  %v1552_v5 = vmul.f32 0.5, %v1424_v42  ;;  %2417 = vtanh.f32 %v1171_v10 }
 0x1a0   :  { %v916_v21 = vmul.f32 0.044715, %v788_v62  ;;  %v1553_v56 = vmul.f32 0.5, %v1425_v20 }
 0x1a1   :  { %v917_v40 = vmul.f32 0.044715, %v789_v50  ;;  %v2047_v8 = vadd.f32 %v2046_v2, %v1838_v38  ;;  %v291_v57 = vpop.f32.mrf.mxu0  ;;  %v1680_v26 = vmul.f32 %v1552_v5, %v3176_v54 }
 0x1a2   :  { %v3227_v32 = vadd.f32 %v291_v57, %v2747_v17  ;;  %v500_v13 = vpop.f32.mrf.mxu1  ;;  %v1681_v60 = vmul.f32 %v1553_v56, %v3181_v58  ;;  %v1044_v53 = vadd.f32 %v916_v21, %v3210_v7  ;;  %v130_v56 = vld [vmem:[#allocation2 + $0x180] sm:$0xff] }
 0x1a3   :  { %2218 = vst [vmem:[#allocation10 + $0x50] sm:$0xff] %v2047_v8  ;;  %v3232_v49 = vadd.f32 %v500_v13, %v2749_v18  ;;  %1887 = vmatmul.f32.gmra.mxu2 %v1680_v26  ;;  %v1045_v3 = vadd.f32 %v917_v40, %v3215_v52 }
 0x1a4   :  { %v2416_v22 = vpop.eup %2415  ;;  %v662_v54 = vmul.f32 %v3227_v32, %v3227_v32  ;;  %2096 = vmatmul.f32.gmra.mxu3 %v1681_v60  ;;  %338 = vmatmul.f32.gmra.mxu0 %v128_v12  ;;  %v1172_v1 = vmul.f32 0.7978846, %v1044_v53 }
 0x1a5   :  { %v2418_v24 = vpop.eup %2417  ;;  %v663_v58 = vmul.f32 %v3232_v49, %v3232_v49  ;;  %547 = vmatmul.f32.gmra.mxu1 %v128_v12  ;;  %v1426_v9 = vadd.f32 1.0, %v2416_v22  ;;  %v1173_v34 = vmul.f32 0.7978846, %v1045_v3 }
 0x1a6   :  { %v790_v27 = vmul.f32 %v662_v54, %v3227_v32  ;;  %v1840_v30 = vpop.f32.mrf.mxu2  ;;  %v1427_v48 = vadd.f32 1.0, %v2418_v24  ;;  %2419 = vtanh.f32 %v1172_v1 }
 0x1a7   :  { %v791_v15 = vmul.f32 %v663_v58, %v3232_v49  ;;  %v1841_v44 = vadd.f32 %v3046_v0, %v1840_v30  ;;  %v2049_v35 = vpop.f32.mrf.mxu3  ;;  %v1554_v16 = vmul.f32 0.5, %v1426_v9  ;;  %2421 = vtanh.f32 %v1173_v34 }
 0x1a8   :  { %v918_v4 = vmul.f32 0.044715, %v790_v27  ;;  %v1555_v39 = vmul.f32 0.5, %v1427_v48 }
 0x1a9   :  { %v919_v51 = vmul.f32 0.044715, %v791_v15  ;;  %v2050_v33 = vadd.f32 %v2049_v35, %v1841_v44  ;;  %v294_v25 = vpop.f32.mrf.mxu0  ;;  %v1682_v59 = vmul.f32 %v1554_v16, %v3193_v19 }
 0x1aa   :  { %v3244_v11 = vadd.f32 %v294_v25, %v2747_v17  ;;  %v503_v45 = vpop.f32.mrf.mxu1  ;;  %v1683_v46 = vmul.f32 %v1555_v39, %v3198_v23  ;;  %v1046_v14 = vadd.f32 %v918_v4, %v3227_v32  ;;  %v131_v39 = vld [vmem:[#allocation2 + $0x188] sm:$0xff] }
 0x1ab   :  { %2219 = vst [vmem:[#allocation10 + $0x58] sm:$0xff] %v2050_v33  ;;  %v3249_v31 = vadd.f32 %v503_v45, %v2749_v18  ;;  %1890 = vmatmul.f32.gmra.mxu2 %v1682_v59  ;;  %v1047_v47 = vadd.f32 %v919_v51, %v3232_v49 }
 0x1ac   :  { %v2420_v36 = vpop.eup %2419  ;;  %v664_v19 = vmul.f32 %v3244_v11, %v3244_v11  ;;  %2099 = vmatmul.f32.gmra.mxu3 %v1683_v46  ;;  %341 = vmatmul.f32.gmra.mxu0 %v129_v43  ;;  %v1174_v28 = vmul.f32 0.7978846, %v1046_v14 }
 0x1ad   :  { %v2422_v37 = vpop.eup %2421  ;;  %v665_v23 = vmul.f32 %v3249_v31, %v3249_v31  ;;  %550 = vmatmul.f32.gmra.mxu1 %v129_v43  ;;  %v1428_v55 = vadd.f32 1.0, %v2420_v36  ;;  %v1175_v6 = vmul.f32 0.7978846, %v1047_v47 }
 0x1ae   :  { %v792_v41 = vmul.f32 %v664_v19, %v3244_v11  ;;  %v1843_v61 = vpop.f32.mrf.mxu2  ;;  %v1429_v29 = vadd.f32 1.0, %v2422_v37  ;;  %2423 = vtanh.f32 %v1174_v28 }
 0x1af   :  { %v793_v42 = vmul.f32 %v665_v23, %v3249_v31  ;;  %v1844_v10 = vadd.f32 %v3046_v0, %v1843_v61  ;;  %v2052_v62 = vpop.f32.mrf.mxu3  ;;  %v1556_v63 = vmul.f32 0.5, %v1428_v55  ;;  %2425 = vtanh.f32 %v1175_v6 }
 0x1b0   :  { %v920_v20 = vmul.f32 0.044715, %v792_v41  ;;  %v1557_v50 = vmul.f32 0.5, %v1429_v29 }
 0x1b1   :  { %v921_v38 = vmul.f32 0.044715, %v793_v42  ;;  %v2053_v2 = vadd.f32 %v2052_v62, %v1844_v10  ;;  %v297_v5 = vpop.f32.mrf.mxu0  ;;  %v1684_v21 = vmul.f32 %v1556_v63, %v3210_v7 }
 0x1b2   :  { %v3261_v40 = vadd.f32 %v297_v5, %v2747_v17  ;;  %v506_v8 = vpop.f32.mrf.mxu1  ;;  %v1685_v57 = vmul.f32 %v1557_v50, %v3215_v52  ;;  %v1048_v26 = vadd.f32 %v920_v20, %v3244_v11  ;;  %v132_v50 = vld [vmem:[#allocation2 + $0x190] sm:$0xff] }
 0x1b3   :  { %2220 = vst [vmem:[#allocation10 + $0x60] sm:$0xff] %v2053_v2  ;;  %v3266_v12 = vadd.f32 %v506_v8, %v2749_v18  ;;  %1893 = vmatmul.f32.gmra.mxu2 %v1684_v21  ;;  %v1049_v13 = vadd.f32 %v921_v38, %v3249_v31 }
 0x1b4   :  { %v2424_v60 = vpop.eup %2423  ;;  %v666_v7 = vmul.f32 %v3261_v40, %v3261_v40  ;;  %2102 = vmatmul.f32.gmra.mxu3 %v1685_v57  ;;  %344 = vmatmul.f32.gmra.mxu0 %v130_v56  ;;  %v1176_v53 = vmul.f32 0.7978846, %v1048_v26 }
 0x1b5   :  { %v2426_v3 = vpop.eup %2425  ;;  %v667_v52 = vmul.f32 %v3266_v12, %v3266_v12  ;;  %553 = vmatmul.f32.gmra.mxu1 %v130_v56  ;;  %v1430_v22 = vadd.f32 1.0, %v2424_v60  ;;  %v1177_v54 = vmul.f32 0.7978846, %v1049_v13 }
 0x1b6   :  { %v794_v1 = vmul.f32 %v666_v7, %v3261_v40  ;;  %v1846_v24 = vpop.f32.mrf.mxu2  ;;  %v1431_v58 = vadd.f32 1.0, %v2426_v3  ;;  %2427 = vtanh.f32 %v1176_v53 }
 0x1b7   :  { %v795_v9 = vmul.f32 %v667_v52, %v3266_v12  ;;  %v1847_v34 = vadd.f32 %v3046_v0, %v1846_v24  ;;  %v2055_v27 = vpop.f32.mrf.mxu3  ;;  %v1558_v30 = vmul.f32 0.5, %v1430_v22  ;;  %2429 = vtanh.f32 %v1177_v54  ;;  %v3312_v22 = vld [vmem:[%s3841_s4] ss:$0 sm:$0xff] }
 0x1b8   :  { %v922_v48 = vmul.f32 0.044715, %v794_v1  ;;  %v1559_v15 = vmul.f32 0.5, %v1431_v58 }
 0x1b9   :  { %v923_v44 = vmul.f32 0.044715, %v795_v9  ;;  %v2056_v35 = vadd.f32 %v2055_v27, %v1847_v34  ;;  %v300_v16 = vpop.f32.mrf.mxu0  ;;  %v1686_v4 = vmul.f32 %v1558_v30, %v3227_v32 }
 0x1ba   :  { %v3278_v51 = vadd.f32 %v300_v16, %v2747_v17  ;;  %v509_v33 = vpop.f32.mrf.mxu1  ;;  %v1687_v25 = vmul.f32 %v1559_v15, %v3232_v49  ;;  %v1050_v59 = vadd.f32 %v922_v48, %v3261_v40  ;;  %v133_v15 = vld [vmem:[#allocation2 + $0x198] sm:$0xff] }
 0x1bb   :  { %2221 = vst [vmem:[#allocation10 + $0x68] sm:$0xff] %v2056_v35  ;;  %v3283_v43 = vadd.f32 %v509_v33, %v2749_v18  ;;  %1896 = vmatmul.f32.gmra.mxu2 %v1686_v4  ;;  %v1051_v45 = vadd.f32 %v923_v44, %v3266_v12 }
 0x1bc   :  { %v2428_v46 = vpop.eup %2427  ;;  %v668_v32 = vmul.f32 %v3278_v51, %v3278_v51  ;;  %2105 = vmatmul.f32.gmra.mxu3 %v1687_v25  ;;  %347 = vmatmul.f32.gmra.mxu0 %v131_v39  ;;  %v1178_v14 = vmul.f32 0.7978846, %v1050_v59 }
 0x1bd   :  { %v2430_v47 = vpop.eup %2429  ;;  %v669_v49 = vmul.f32 %v3283_v43, %v3283_v43  ;;  %556 = vmatmul.f32.gmra.mxu1 %v131_v39  ;;  %v1432_v36 = vadd.f32 1.0, %v2428_v46  ;;  %v1179_v19 = vmul.f32 0.7978846, %v1051_v45 }
 0x1be   :  { %v796_v28 = vmul.f32 %v668_v32, %v3278_v51  ;;  %v1849_v37 = vpop.f32.mrf.mxu2  ;;  %v1433_v23 = vadd.f32 1.0, %v2430_v47  ;;  %2431 = vtanh.f32 %v1178_v14 }
 0x1bf   :  { %v797_v55 = vmul.f32 %v669_v49, %v3283_v43  ;;  %v1850_v6 = vadd.f32 %v3046_v0, %v1849_v37  ;;  %v2058_v41 = vpop.f32.mrf.mxu3  ;;  %v1560_v61 = vmul.f32 0.5, %v1432_v36  ;;  %2433 = vtanh.f32 %v1179_v19 }
 0x1c0   :  { %v924_v29 = vmul.f32 0.044715, %v796_v28  ;;  %v1561_v42 = vmul.f32 0.5, %v1433_v23 }
 0x1c1   :  { %v925_v10 = vmul.f32 0.044715, %v797_v55  ;;  %v2059_v62 = vadd.f32 %v2058_v41, %v1850_v6  ;;  %v303_v63 = vpop.f32.mrf.mxu0  ;;  %v1688_v20 = vmul.f32 %v1560_v61, %v3244_v11 }
 0x1c2   :  { %v3295_v38 = vadd.f32 %v303_v63, %v2747_v17  ;;  %v512_v2 = vpop.f32.mrf.mxu1  ;;  %v1689_v5 = vmul.f32 %v1561_v42, %v3249_v31  ;;  %v1052_v21 = vadd.f32 %v924_v29, %v3278_v51  ;;  %v134_v42 = vld [vmem:[#allocation2 + $0x1a0] sm:$0xff] }
 0x1c3   :  { %2222 = vst [vmem:[#allocation10 + $0x70] sm:$0xff] %v2059_v62  ;;  %v3300_v0 = vadd.f32 %v512_v2, %v2749_v18  ;;  %1899 = vmatmul.f32.gmra.mxu2 %v1688_v20  ;;  %v1053_v56 = vadd.f32 %v925_v10, %v3283_v43 }
 0x1c4   :  { %v2432_v8 = vpop.eup %2431  ;;  %v670_v11 = vmul.f32 %v3295_v38, %v3295_v38  ;;  %2108 = vmatmul.f32.gmra.mxu3 %v1689_v5  ;;  %350 = vmatmul.f32.gmra.mxu0 %v132_v50  ;;  %v1180_v57 = vmul.f32 0.7978846, %v1052_v21 }
 0x1c5   :  { %v2434_v26 = vpop.eup %2433  ;;  %v671_v31 = vmul.f32 %v3300_v0, %v3300_v0  ;;  %559 = vmatmul.f32.gmra.mxu1 %v132_v50  ;;  %v1434_v13 = vadd.f32 1.0, %v2432_v8  ;;  %v1181_v60 = vmul.f32 0.7978846, %v1053_v56 }
 0x1c6   :  { %v798_v7 = vmul.f32 %v670_v11, %v3295_v38  ;;  %v1852_v53 = vpop.f32.mrf.mxu2  ;;  %v1435_v3 = vadd.f32 1.0, %v2434_v26  ;;  %2435 = vtanh.f32 %v1180_v57 }
 0x1c7   :  { %v799_v52 = vmul.f32 %v671_v31, %v3300_v0  ;;  %v1853_v54 = vadd.f32 %v3312_v22, %v1852_v53  ;;  %v2061_v1 = vpop.f32.mrf.mxu3  ;;  %v1562_v24 = vmul.f32 0.5, %v1434_v13  ;;  %2437 = vtanh.f32 %v1181_v60 }
 0x1c8   :  { %v926_v58 = vmul.f32 0.044715, %v798_v7  ;;  %v1563_v9 = vmul.f32 0.5, %v1435_v3 }
 0x1c9   :  { %v927_v34 = vmul.f32 0.044715, %v799_v52  ;;  %v2062_v27 = vadd.f32 %v2061_v1, %v1853_v54  ;;  %v306_v30 = vpop.f32.mrf.mxu0  ;;  %v1690_v48 = vmul.f32 %v1562_v24, %v3261_v40 }
 0x1ca   :  { %v3317_v44 = vadd.f32 %v306_v30, %v2747_v17  ;;  %v515_v35 = vpop.f32.mrf.mxu1  ;;  %v1691_v16 = vmul.f32 %v1563_v9, %v3266_v12  ;;  %v1054_v4 = vadd.f32 %v926_v58, %v3295_v38  ;;  %v135_v9 = vld [vmem:[#allocation2 + $0x1a8] sm:$0xff] }
 0x1cb   :  { %2223 = vst [vmem:[#allocation10 + $0x78] sm:$0xff] %v2062_v27  ;;  %v3322_v39 = vadd.f32 %v515_v35, %v2749_v18  ;;  %1902 = vmatmul.f32.gmra.mxu2 %v1690_v48  ;;  %v1055_v33 = vadd.f32 %v927_v34, %v3300_v0 }
 0x1cc   :  { %v2436_v25 = vpop.eup %2435  ;;  %v672_v40 = vmul.f32 %v3317_v44, %v3317_v44  ;;  %2111 = vmatmul.f32.gmra.mxu3 %v1691_v16  ;;  %353 = vmatmul.f32.gmra.mxu0 %v133_v15  ;;  %v1182_v59 = vmul.f32 0.7978846, %v1054_v4 }
 0x1cd   :  { %v2438_v45 = vpop.eup %2437  ;;  %v673_v12 = vmul.f32 %v3322_v39, %v3322_v39  ;;  %562 = vmatmul.f32.gmra.mxu1 %v133_v15  ;;  %v1436_v46 = vadd.f32 1.0, %v2436_v25  ;;  %v1183_v32 = vmul.f32 0.7978846, %v1055_v33 }
 0x1ce   :  { %v800_v14 = vmul.f32 %v672_v40, %v3317_v44  ;;  %v1855_v47 = vpop.f32.mrf.mxu2  ;;  %v1437_v49 = vadd.f32 1.0, %v2438_v45  ;;  %2439 = vtanh.f32 %v1182_v59 }
 0x1cf   :  { %v801_v36 = vmul.f32 %v673_v12, %v3322_v39  ;;  %v1856_v19 = vadd.f32 %v3312_v22, %v1855_v47  ;;  %v2064_v28 = vpop.f32.mrf.mxu3  ;;  %v1564_v37 = vmul.f32 0.5, %v1436_v46  ;;  %2441 = vtanh.f32 %v1183_v32 }
 0x1d0   :  { %v928_v23 = vmul.f32 0.044715, %v800_v14  ;;  %v1565_v55 = vmul.f32 0.5, %v1437_v49 }
 0x1d1   :  { %v929_v6 = vmul.f32 0.044715, %v801_v36  ;;  %v2065_v41 = vadd.f32 %v2064_v28, %v1856_v19  ;;  %v309_v61 = vpop.f32.mrf.mxu0  ;;  %v1692_v29 = vmul.f32 %v1564_v37, %v3278_v51 }
 0x1d2   :  { %v3334_v10 = vadd.f32 %v309_v61, %v2747_v17  ;;  %v518_v62 = vpop.f32.mrf.mxu1  ;;  %v1693_v63 = vmul.f32 %v1565_v55, %v3283_v43  ;;  %v1056_v20 = vadd.f32 %v928_v23, %v3317_v44  ;;  %v136_v55 = vld [vmem:[#allocation2 + $0x1b0] sm:$0xff] }
 0x1d3   :  { %2224 = vst [vmem:[#allocation10 + $0x80] sm:$0xff] %v2065_v41  ;;  %v3339_v50 = vadd.f32 %v518_v62, %v2749_v18  ;;  %1905 = vmatmul.f32.gmra.mxu2 %v1692_v29  ;;  %v1057_v2 = vadd.f32 %v929_v6, %v3322_v39 }
 0x1d4   :  { %v2440_v5 = vpop.eup %2439  ;;  %v674_v51 = vmul.f32 %v3334_v10, %v3334_v10  ;;  %2114 = vmatmul.f32.gmra.mxu3 %v1693_v63  ;;  %356 = vmatmul.f32.gmra.mxu0 %v134_v42  ;;  %v1184_v21 = vmul.f32 0.7978846, %v1056_v20 }
 0x1d5   :  { %v2442_v56 = vpop.eup %2441  ;;  %v675_v43 = vmul.f32 %v3339_v50, %v3339_v50  ;;  %565 = vmatmul.f32.gmra.mxu1 %v134_v42  ;;  %v1438_v8 = vadd.f32 1.0, %v2440_v5  ;;  %v1185_v11 = vmul.f32 0.7978846, %v1057_v2 }
 0x1d6   :  { %v802_v57 = vmul.f32 %v674_v51, %v3334_v10  ;;  %v1858_v26 = vpop.f32.mrf.mxu2  ;;  %v1439_v31 = vadd.f32 1.0, %v2442_v56  ;;  %2443 = vtanh.f32 %v1184_v21 }
 0x1d7   :  { %v803_v13 = vmul.f32 %v675_v43, %v3339_v50  ;;  %v1859_v60 = vadd.f32 %v3312_v22, %v1858_v26  ;;  %v2067_v7 = vpop.f32.mrf.mxu3  ;;  %v1566_v53 = vmul.f32 0.5, %v1438_v8  ;;  %2445 = vtanh.f32 %v1185_v11 }
 0x1d8   :  { %v930_v3 = vmul.f32 0.044715, %v802_v57  ;;  %v1567_v52 = vmul.f32 0.5, %v1439_v31 }
 0x1d9   :  { %v931_v54 = vmul.f32 0.044715, %v803_v13  ;;  %v2068_v1 = vadd.f32 %v2067_v7, %v1859_v60  ;;  %v312_v24 = vpop.f32.mrf.mxu0  ;;  %v1694_v58 = vmul.f32 %v1566_v53, %v3295_v38 }
 0x1da   :  { %v3351_v34 = vadd.f32 %v312_v24, %v2747_v17  ;;  %v521_v27 = vpop.f32.mrf.mxu1  ;;  %v1695_v30 = vmul.f32 %v1567_v52, %v3300_v0  ;;  %v1058_v48 = vadd.f32 %v930_v3, %v3334_v10  ;;  %v137_v52 = vld [vmem:[#allocation2 + $0x1b8] sm:$0xff] }
 0x1db   :  { %2225 = vst [vmem:[#allocation10 + $0x88] sm:$0xff] %v2068_v1  ;;  %v3356_v15 = vadd.f32 %v521_v27, %v2749_v18  ;;  %1908 = vmatmul.f32.gmra.mxu2 %v1694_v58  ;;  %v1059_v35 = vadd.f32 %v931_v54, %v3339_v50 }
 0x1dc   :  { %v2444_v16 = vpop.eup %2443  ;;  %v676_v38 = vmul.f32 %v3351_v34, %v3351_v34  ;;  %2117 = vmatmul.f32.gmra.mxu3 %v1695_v30  ;;  %359 = vmatmul.f32.gmra.mxu0 %v135_v9  ;;  %v1186_v4 = vmul.f32 0.7978846, %v1058_v48 }
 0x1dd   :  { %v2446_v33 = vpop.eup %2445  ;;  %v677_v0 = vmul.f32 %v3356_v15, %v3356_v15  ;;  %568 = vmatmul.f32.gmra.mxu1 %v135_v9  ;;  %v1440_v25 = vadd.f32 1.0, %v2444_v16  ;;  %v1187_v40 = vmul.f32 0.7978846, %v1059_v35 }
 0x1de   :  { %v804_v59 = vmul.f32 %v676_v38, %v3351_v34  ;;  %v1861_v45 = vpop.f32.mrf.mxu2  ;;  %v1441_v12 = vadd.f32 1.0, %v2446_v33  ;;  %2447 = vtanh.f32 %v1186_v4 }
 0x1df   :  { %v805_v46 = vmul.f32 %v677_v0, %v3356_v15  ;;  %v1862_v32 = vadd.f32 %v3312_v22, %v1861_v45  ;;  %v2070_v14 = vpop.f32.mrf.mxu3  ;;  %v1568_v47 = vmul.f32 0.5, %v1440_v25  ;;  %2449 = vtanh.f32 %v1187_v40 }
 0x1e0   :  { %v932_v49 = vmul.f32 0.044715, %v804_v59  ;;  %v1569_v36 = vmul.f32 0.5, %v1441_v12 }
 0x1e1   :  { %v933_v19 = vmul.f32 0.044715, %v805_v46  ;;  %v2071_v28 = vadd.f32 %v2070_v14, %v1862_v32  ;;  %v315_v37 = vpop.f32.mrf.mxu0  ;;  %v1696_v23 = vmul.f32 %v1568_v47, %v3317_v44 }
 0x1e2   :  { %v3368_v6 = vadd.f32 %v315_v37, %v2747_v17  ;;  %v524_v41 = vpop.f32.mrf.mxu1  ;;  %v1697_v61 = vmul.f32 %v1569_v36, %v3322_v39  ;;  %v1060_v29 = vadd.f32 %v932_v49, %v3351_v34  ;;  %v138_v36 = vld [vmem:[#allocation2 + $0x1c0] sm:$0xff] }
 0x1e3   :  { %2226 = vst [vmem:[#allocation10 + $0x90] sm:$0xff] %v2071_v28  ;;  %v3373_v42 = vadd.f32 %v524_v41, %v2749_v18  ;;  %1911 = vmatmul.f32.gmra.mxu2 %v1696_v23  ;;  %v1061_v62 = vadd.f32 %v933_v19, %v3356_v15 }
 0x1e4   :  { %v2448_v63 = vpop.eup %2447  ;;  %v678_v44 = vmul.f32 %v3368_v6, %v3368_v6  ;;  %2120 = vmatmul.f32.gmra.mxu3 %v1697_v61  ;;  %362 = vmatmul.f32.gmra.mxu0 %v136_v55  ;;  %v1188_v20 = vmul.f32 0.7978846, %v1060_v29 }
 0x1e5   :  { %v2450_v2 = vpop.eup %2449  ;;  %v679_v39 = vmul.f32 %v3373_v42, %v3373_v42  ;;  %571 = vmatmul.f32.gmra.mxu1 %v136_v55  ;;  %v1442_v5 = vadd.f32 1.0, %v2448_v63  ;;  %v1189_v51 = vmul.f32 0.7978846, %v1061_v62 }
 0x1e6   :  { %v806_v21 = vmul.f32 %v678_v44, %v3368_v6  ;;  %v1864_v56 = vpop.f32.mrf.mxu2  ;;  %v1443_v43 = vadd.f32 1.0, %v2450_v2  ;;  %2451 = vtanh.f32 %v1188_v20 }
 0x1e7   :  { %v807_v8 = vmul.f32 %v679_v39, %v3373_v42  ;;  %v1865_v11 = vadd.f32 %v3312_v22, %v1864_v56  ;;  %v2073_v57 = vpop.f32.mrf.mxu3  ;;  %v1570_v26 = vmul.f32 0.5, %v1442_v5  ;;  %2453 = vtanh.f32 %v1189_v51 }
 0x1e8   :  { %v934_v31 = vmul.f32 0.044715, %v806_v21  ;;  %v1571_v13 = vmul.f32 0.5, %v1443_v43 }
 0x1e9   :  { %v935_v60 = vmul.f32 0.044715, %v807_v8  ;;  %v2074_v7 = vadd.f32 %v2073_v57, %v1865_v11  ;;  %v318_v53 = vpop.f32.mrf.mxu0  ;;  %v1698_v3 = vmul.f32 %v1570_v26, %v3334_v10 }
 0x1ea   :  { %v3385_v54 = vadd.f32 %v318_v53, %v2747_v17  ;;  %v527_v1 = vpop.f32.mrf.mxu1  ;;  %v1699_v24 = vmul.f32 %v1571_v13, %v3339_v50  ;;  %v1062_v58 = vadd.f32 %v934_v31, %v3368_v6  ;;  %v139_v13 = vld [vmem:[#allocation2 + $0x1c8] sm:$0xff] }
 0x1eb   :  { %2227 = vst [vmem:[#allocation10 + $0x98] sm:$0xff] %v2074_v7  ;;  %v3390_v9 = vadd.f32 %v527_v1, %v2749_v18  ;;  %1914 = vmatmul.f32.gmra.mxu2 %v1698_v3  ;;  %v1063_v27 = vadd.f32 %v935_v60, %v3373_v42 }
 0x1ec   :  { %v2452_v30 = vpop.eup %2451  ;;  %v680_v10 = vmul.f32 %v3385_v54, %v3385_v54  ;;  %2123 = vmatmul.f32.gmra.mxu3 %v1699_v24  ;;  %365 = vmatmul.f32.gmra.mxu0 %v137_v52  ;;  %v1190_v48 = vmul.f32 0.7978846, %v1062_v58 }
 0x1ed   :  { %v2454_v35 = vpop.eup %2453  ;;  %v681_v50 = vmul.f32 %v3390_v9, %v3390_v9  ;;  %574 = vmatmul.f32.gmra.mxu1 %v137_v52  ;;  %v1444_v16 = vadd.f32 1.0, %v2452_v30  ;;  %v1191_v38 = vmul.f32 0.7978846, %v1063_v27 }
 0x1ee   :  { %v808_v4 = vmul.f32 %v680_v10, %v3385_v54  ;;  %v1867_v33 = vpop.f32.mrf.mxu2  ;;  %v1445_v0 = vadd.f32 1.0, %v2454_v35  ;;  %2455 = vtanh.f32 %v1190_v48 }
 0x1ef   :  { %v809_v25 = vmul.f32 %v681_v50, %v3390_v9  ;;  %v1868_v40 = vadd.f32 %v3312_v22, %v1867_v33  ;;  %v2076_v59 = vpop.f32.mrf.mxu3  ;;  %v1572_v45 = vmul.f32 0.5, %v1444_v16  ;;  %2457 = vtanh.f32 %v1191_v38 }
 0x1f0   :  { %v936_v12 = vmul.f32 0.044715, %v808_v4  ;;  %v1573_v46 = vmul.f32 0.5, %v1445_v0 }
 0x1f1   :  { %v937_v32 = vmul.f32 0.044715, %v809_v25  ;;  %v2077_v14 = vadd.f32 %v2076_v59, %v1868_v40  ;;  %v321_v47 = vpop.f32.mrf.mxu0  ;;  %v1700_v49 = vmul.f32 %v1572_v45, %v3351_v34 }
 0x1f2   :  { %v3402_v19 = vadd.f32 %v321_v47, %v2747_v17  ;;  %v530_v28 = vpop.f32.mrf.mxu1  ;;  %v1701_v37 = vmul.f32 %v1573_v46, %v3356_v15  ;;  %v1064_v23 = vadd.f32 %v936_v12, %v3385_v54  ;;  %v140_v46 = vld [vmem:[#allocation2 + $0x1d0] sm:$0xff] }
 0x1f3   :  { %2228 = vst [vmem:[#allocation10 + $0xa0] sm:$0xff] %v2077_v14  ;;  %v3407_v55 = vadd.f32 %v530_v28, %v2749_v18  ;;  %1917 = vmatmul.f32.gmra.mxu2 %v1700_v49  ;;  %v1065_v41 = vadd.f32 %v937_v32, %v3390_v9 }
 0x1f4   :  { %v2456_v61 = vpop.eup %2455  ;;  %v682_v34 = vmul.f32 %v3402_v19, %v3402_v19  ;;  %2126 = vmatmul.f32.gmra.mxu3 %v1701_v37  ;;  %368 = vmatmul.f32.gmra.mxu0 %v138_v36  ;;  %v1192_v29 = vmul.f32 0.7978846, %v1064_v23 }
 0x1f5   :  { %v2458_v62 = vpop.eup %2457  ;;  %v683_v15 = vmul.f32 %v3407_v55, %v3407_v55  ;;  %577 = vmatmul.f32.gmra.mxu1 %v138_v36  ;;  %v1446_v63 = vadd.f32 1.0, %v2456_v61  ;;  %v1193_v44 = vmul.f32 0.7978846, %v1065_v41 }
 0x1f6   :  { %v810_v20 = vmul.f32 %v682_v34, %v3402_v19  ;;  %v1870_v2 = vpop.f32.mrf.mxu2  ;;  %v1447_v39 = vadd.f32 1.0, %v2458_v62  ;;  %2459 = vtanh.f32 %v1192_v29 }
 0x1f7   :  { %v811_v5 = vmul.f32 %v683_v15, %v3407_v55  ;;  %v1871_v51 = vadd.f32 %v3312_v22, %v1870_v2  ;;  %v2079_v21 = vpop.f32.mrf.mxu3  ;;  %v1574_v56 = vmul.f32 0.5, %v1446_v63  ;;  %2461 = vtanh.f32 %v1193_v44 }
 0x1f8   :  { %v938_v43 = vmul.f32 0.044715, %v810_v20  ;;  %v1575_v8 = vmul.f32 0.5, %v1447_v39 }
 0x1f9   :  { %v939_v11 = vmul.f32 0.044715, %v811_v5  ;;  %v2080_v57 = vadd.f32 %v2079_v21, %v1871_v51  ;;  %v324_v26 = vpop.f32.mrf.mxu0  ;;  %v1702_v31 = vmul.f32 %v1574_v56, %v3368_v6 }
 0x1fa   :  { %v1066_v60 = vadd.f32 %v938_v43, %v3402_v19  ;;  %v3420_v7 = vadd.f32 %v324_v26, %v2747_v17  ;;  %v533_v53 = vpop.f32.mrf.mxu1  ;;  %v1703_v3 = vmul.f32 %v1575_v8, %v3373_v42  ;;  %v141_v8 = vld [vmem:[#allocation2 + $0x1d8] sm:$0xff] }
 0x1fb   :  { %v1067_v52 = vadd.f32 %v939_v11, %v3407_v55  ;;  %2229 = vst [vmem:[#allocation10 + $0xa8] sm:$0xff] %v2080_v57  ;;  %v3425_v1 = vadd.f32 %v533_v53, %v2749_v18  ;;  %1920 = vmatmul.f32.gmra.mxu2 %v1702_v31 }
 0x1fc   :  { %v2460_v24 = vpop.eup %2459  ;;  %v684_v6 = vmul.f32 %v3420_v7, %v3420_v7  ;;  %2129 = vmatmul.f32.gmra.mxu3 %v1703_v3  ;;  %371 = vmatmul.f32.gmra.mxu0 %v139_v13  ;;  %v1194_v58 = vmul.f32 0.7978846, %v1066_v60 }
 0x1fd   :  { %v2462_v27 = vpop.eup %2461  ;;  %v685_v30 = vmul.f32 %v3425_v1, %v3425_v1  ;;  %580 = vmatmul.f32.gmra.mxu1 %v139_v13  ;;  %v1448_v42 = vadd.f32 1.0, %v2460_v24  ;;  %v1195_v10 = vmul.f32 0.7978846, %v1067_v52 }
 0x1fe   :  { %v812_v48 = vmul.f32 %v684_v6, %v3420_v7  ;;  %v1873_v35 = vpop.f32.mrf.mxu2  ;;  %v1449_v50 = vadd.f32 1.0, %v2462_v27  ;;  %2463 = vtanh.f32 %v1194_v58 }
 0x1ff   :  { %v813_v16 = vmul.f32 %v685_v30, %v3425_v1  ;;  %v1874_v38 = vadd.f32 %v3312_v22, %v1873_v35  ;;  %v2082_v4 = vpop.f32.mrf.mxu3  ;;  %v1576_v33 = vmul.f32 0.5, %v1448_v42  ;;  %2465 = vtanh.f32 %v1195_v10 }
 0x200   :  { %v940_v0 = vmul.f32 0.044715, %v812_v48  ;;  %v1577_v25 = vmul.f32 0.5, %v1449_v50 }
 0x201   :  { %v941_v40 = vmul.f32 0.044715, %v813_v16  ;;  %v2083_v59 = vadd.f32 %v2082_v4, %v1874_v38  ;;  %v327_v45 = vpop.f32.mrf.mxu0  ;;  %v1704_v12 = vmul.f32 %v1576_v33, %v3385_v54 }
 0x202   :  { %v1068_v32 = vadd.f32 %v940_v0, %v3420_v7  ;;  %v3437_v14 = vadd.f32 %v327_v45, %v2747_v17  ;;  %v536_v47 = vpop.f32.mrf.mxu1  ;;  %v1705_v49 = vmul.f32 %v1577_v25, %v3390_v9  ;;  %v142_v25 = vld [vmem:[#allocation2 + $0x1e0] sm:$0xff] }
 0x203   :  { %v1069_v36 = vadd.f32 %v941_v40, %v3425_v1  ;;  %2230 = vst [vmem:[#allocation10 + $0xb0] sm:$0xff] %v2083_v59  ;;  %v3442_v28 = vadd.f32 %v536_v47, %v2749_v18  ;;  %1923 = vmatmul.f32.gmra.mxu2 %v1704_v12 }
 0x204   :  { %v2464_v37 = vpop.eup %2463  ;;  %v686_v54 = vmul.f32 %v3437_v14, %v3437_v14  ;;  %2132 = vmatmul.f32.gmra.mxu3 %v1705_v49  ;;  %374 = vmatmul.f32.gmra.mxu0 %v140_v46  ;;  %v1196_v23 = vmul.f32 0.7978846, %v1068_v32 }
 0x205   :  { %v2466_v41 = vpop.eup %2465  ;;  %v687_v61 = vmul.f32 %v3442_v28, %v3442_v28  ;;  %583 = vmatmul.f32.gmra.mxu1 %v140_v46  ;;  %v1450_v9 = vadd.f32 1.0, %v2464_v37  ;;  %v1197_v34 = vmul.f32 0.7978846, %v1069_v36 }
 0x206   :  { %v814_v29 = vmul.f32 %v686_v54, %v3437_v14  ;;  %v1876_v62 = vpop.f32.mrf.mxu2  ;;  %v1451_v15 = vadd.f32 1.0, %v2466_v41  ;;  %2467 = vtanh.f32 %v1196_v23 }
 0x207   :  { %v815_v63 = vmul.f32 %v687_v61, %v3442_v28  ;;  %v1877_v44 = vadd.f32 %v3312_v22, %v1876_v62  ;;  %v2085_v20 = vpop.f32.mrf.mxu3  ;;  %v1578_v2 = vmul.f32 0.5, %v1450_v9  ;;  %2469 = vtanh.f32 %v1197_v34 }
 0x208   :  { %v942_v39 = vmul.f32 0.044715, %v814_v29  ;;  %v1579_v5 = vmul.f32 0.5, %v1451_v15 }
 0x209   :  { %v943_v51 = vmul.f32 0.044715, %v815_v63  ;;  %v2086_v21 = vadd.f32 %v2085_v20, %v1877_v44  ;;  %v330_v56 = vpop.f32.mrf.mxu0  ;;  %v1706_v43 = vmul.f32 %v1578_v2, %v3402_v19 }
 0x20a   :  { %v1070_v11 = vadd.f32 %v942_v39, %v3437_v14  ;;  %v3454_v57 = vadd.f32 %v330_v56, %v2747_v17  ;;  %v539_v26 = vpop.f32.mrf.mxu1  ;;  %v1707_v31 = vmul.f32 %v1579_v5, %v3407_v55  ;;  %v143_v5 = vld [vmem:[#allocation2 + $0x1e8] sm:$0xff] }
 0x20b   :  { %v1071_v13 = vadd.f32 %v943_v51, %v3442_v28  ;;  %2231 = vst [vmem:[#allocation10 + $0xb8] sm:$0xff] %v2086_v21  ;;  %v3459_v60 = vadd.f32 %v539_v26, %v2749_v18  ;;  %1926 = vmatmul.f32.gmra.mxu2 %v1706_v43 }
 0x20c   :  { %v2468_v53 = vpop.eup %2467  ;;  %v688_v19 = vmul.f32 %v3454_v57, %v3454_v57  ;;  %2135 = vmatmul.f32.gmra.mxu3 %v1707_v31  ;;  %377 = vmatmul.f32.gmra.mxu0 %v141_v8  ;;  %v1198_v3 = vmul.f32 0.7978846, %v1070_v11 }
 0x20d   :  { %v2470_v52 = vpop.eup %2469  ;;  %v689_v24 = vmul.f32 %v3459_v60, %v3459_v60  ;;  %586 = vmatmul.f32.gmra.mxu1 %v141_v8  ;;  %v1452_v55 = vadd.f32 1.0, %v2468_v53  ;;  %v1199_v6 = vmul.f32 0.7978846, %v1071_v13 }
 0x20e   :  { %v816_v58 = vmul.f32 %v688_v19, %v3454_v57  ;;  %v1879_v27 = vpop.f32.mrf.mxu2  ;;  %v1453_v30 = vadd.f32 1.0, %v2470_v52  ;;  %2471 = vtanh.f32 %v1198_v3 }
 0x20f   :  { %v817_v42 = vmul.f32 %v689_v24, %v3459_v60  ;;  %v1880_v10 = vadd.f32 %v3312_v22, %v1879_v27  ;;  %v2088_v48 = vpop.f32.mrf.mxu3  ;;  %v1580_v35 = vmul.f32 0.5, %v1452_v55  ;;  %2473 = vtanh.f32 %v1199_v6 }
 0x210   :  { %v944_v50 = vmul.f32 0.044715, %v816_v58  ;;  %v1581_v16 = vmul.f32 0.5, %v1453_v30 }
 0x211   :  { %v945_v38 = vmul.f32 0.044715, %v817_v42  ;;  %v2089_v4 = vadd.f32 %v2088_v48, %v1880_v10  ;;  %v333_v33 = vpop.f32.mrf.mxu0  ;;  %v1708_v0 = vmul.f32 %v1580_v35, %v3420_v7 }
 0x212   :  { %v1072_v40 = vadd.f32 %v944_v50, %v3454_v57  ;;  %v3471_v59 = vadd.f32 %v333_v33, %v2747_v17  ;;  %v542_v45 = vpop.f32.mrf.mxu1  ;;  %v1709_v12 = vmul.f32 %v1581_v16, %v3425_v1  ;;  %v144_v16 = vld [vmem:[#allocation2 + $0x1f0] sm:$0xff] }
 0x213   :  { %v1073_v46 = vadd.f32 %v945_v38, %v3459_v60  ;;  %2232 = vst [vmem:[#allocation10 + $0xc0] sm:$0xff] %v2089_v4  ;;  %v3476_v32 = vadd.f32 %v542_v45, %v2749_v18  ;;  %1929 = vmatmul.f32.gmra.mxu2 %v1708_v0 }
 0x214   :  { %v2472_v47 = vpop.eup %2471  ;;  %v690_v7 = vmul.f32 %v3471_v59, %v3471_v59  ;;  %2138 = vmatmul.f32.gmra.mxu3 %v1709_v12  ;;  %380 = vmatmul.f32.gmra.mxu0 %v142_v25  ;;  %v1200_v49 = vmul.f32 0.7978846, %v1072_v40 }
 0x215   :  { %v2474_v36 = vpop.eup %2473  ;;  %v691_v37 = vmul.f32 %v3476_v32, %v3476_v32  ;;  %589 = vmatmul.f32.gmra.mxu1 %v142_v25  ;;  %v1454_v1 = vadd.f32 1.0, %v2472_v47  ;;  %v1201_v54 = vmul.f32 0.7978846, %v1073_v46 }
 0x216   :  { %v818_v23 = vmul.f32 %v690_v7, %v3471_v59  ;;  %v1882_v41 = vpop.f32.mrf.mxu2  ;;  %v1455_v61 = vadd.f32 1.0, %v2474_v36  ;;  %2475 = vtanh.f32 %v1200_v49 }
 0x217   :  { %v819_v9 = vmul.f32 %v691_v37, %v3476_v32  ;;  %v1883_v34 = vadd.f32 %v3312_v22, %v1882_v41  ;;  %v2091_v29 = vpop.f32.mrf.mxu3  ;;  %v1582_v62 = vmul.f32 0.5, %v1454_v1  ;;  %2477 = vtanh.f32 %v1201_v54 }
 0x218   :  { %v946_v15 = vmul.f32 0.044715, %v818_v23  ;;  %v1583_v63 = vmul.f32 0.5, %v1455_v61 }
 0x219   :  { %v947_v44 = vmul.f32 0.044715, %v819_v9  ;;  %v2092_v20 = vadd.f32 %v2091_v29, %v1883_v34  ;;  %v336_v2 = vpop.f32.mrf.mxu0  ;;  %v1710_v39 = vmul.f32 %v1582_v62, %v3437_v14 }
 0x21a   :  { %v1074_v51 = vadd.f32 %v946_v15, %v3471_v59  ;;  %v3488_v21 = vadd.f32 %v336_v2, %v2747_v17  ;;  %v545_v56 = vpop.f32.mrf.mxu1  ;;  %v1711_v43 = vmul.f32 %v1583_v63, %v3442_v28  ;;  %v145_v63 = vld [vmem:[#allocation2 + $0x1f8] sm:$0xff] }
 0x21b   :  { %v1075_v8 = vadd.f32 %v947_v44, %v3476_v32  ;;  %2233 = vst [vmem:[#allocation10 + $0xc8] sm:$0xff] %v2092_v20  ;;  %v3493_v11 = vadd.f32 %v545_v56, %v2749_v18  ;;  %1932 = vmatmul.f32.gmra.mxu2 %v1710_v39 }
 0x21c   :  { %v2476_v26 = vpop.eup %2475  ;;  %v692_v14 = vmul.f32 %v3488_v21, %v3488_v21  ;;  %2141 = vmatmul.f32.gmra.mxu3 %v1711_v43  ;;  %383 = vmatmul.f32.gmra.mxu0 %v143_v5  ;;  %v1202_v31 = vmul.f32 0.7978846, %v1074_v51 }
 0x21d   :  { %v2478_v13 = vpop.eup %2477  ;;  %v693_v53 = vmul.f32 %v3493_v11, %v3493_v11  ;;  %592 = vmatmul.f32.gmra.mxu1 %v143_v5  ;;  %v1456_v28 = vadd.f32 1.0, %v2476_v26  ;;  %v1203_v19 = vmul.f32 0.7978846, %v1075_v8 }
 0x21e   :  { %v820_v3 = vmul.f32 %v692_v14, %v3488_v21  ;;  %v1885_v52 = vpop.f32.mrf.mxu2  ;;  %v1457_v24 = vadd.f32 1.0, %v2478_v13  ;;  %2479 = vtanh.f32 %v1202_v31 }
 0x21f   :  { %v821_v55 = vmul.f32 %v693_v53, %v3493_v11  ;;  %v1886_v6 = vadd.f32 %v3312_v22, %v1885_v52  ;;  %v2094_v58 = vpop.f32.mrf.mxu3  ;;  %v1584_v27 = vmul.f32 0.5, %v1456_v28  ;;  %2481 = vtanh.f32 %v1203_v19 }
 0x220   :  { %v948_v30 = vmul.f32 0.044715, %v820_v3  ;;  %v1585_v42 = vmul.f32 0.5, %v1457_v24 }
 0x221   :  { %v949_v10 = vmul.f32 0.044715, %v821_v55  ;;  %v2095_v48 = vadd.f32 %v2094_v58, %v1886_v6  ;;  %v339_v35 = vpop.f32.mrf.mxu0  ;;  %v1712_v50 = vmul.f32 %v1584_v27, %v3454_v57 }
 0x222   :  { %v1076_v38 = vadd.f32 %v948_v30, %v3488_v21  ;;  %v3505_v4 = vadd.f32 %v339_v35, %v2747_v17  ;;  %v548_v33 = vpop.f32.mrf.mxu1  ;;  %v1713_v0 = vmul.f32 %v1585_v42, %v3459_v60 }
 0x223   :  { %v1077_v25 = vadd.f32 %v949_v10, %v3493_v11  ;;  %2234 = vst [vmem:[#allocation10 + $0xd0] sm:$0xff] %v2095_v48  ;;  %v3510_v40 = vadd.f32 %v548_v33, %v2749_v18  ;;  %1935 = vmatmul.f32.gmra.mxu2 %v1712_v50 }
 0x224   :  { %v2480_v45 = vpop.eup %2479  ;;  %v694_v57 = vmul.f32 %v3505_v4, %v3505_v4  ;;  %2144 = vmatmul.f32.gmra.mxu3 %v1713_v0  ;;  %386 = vmatmul.f32.gmra.mxu0 %v144_v16  ;;  %v1204_v12 = vmul.f32 0.7978846, %v1076_v38 }
 0x225   :  { %v2482_v46 = vpop.eup %2481  ;;  %v695_v47 = vmul.f32 %v3510_v40, %v3510_v40  ;;  %595 = vmatmul.f32.gmra.mxu1 %v144_v16  ;;  %v1458_v60 = vadd.f32 1.0, %v2480_v45  ;;  %v1205_v7 = vmul.f32 0.7978846, %v1077_v25 }
 0x226   :  { %v822_v49 = vmul.f32 %v694_v57, %v3505_v4  ;;  %v1888_v36 = vpop.f32.mrf.mxu2  ;;  %v1459_v37 = vadd.f32 1.0, %v2482_v46  ;;  %2483 = vtanh.f32 %v1204_v12 }
 0x227   :  { %v823_v1 = vmul.f32 %v695_v47, %v3510_v40  ;;  %v1889_v54 = vadd.f32 %v3312_v22, %v1888_v36  ;;  %v2097_v23 = vpop.f32.mrf.mxu3  ;;  %v1586_v41 = vmul.f32 0.5, %v1458_v60  ;;  %2485 = vtanh.f32 %v1205_v7 }
 0x228   :  { %v950_v61 = vmul.f32 0.044715, %v822_v49  ;;  %v1587_v9 = vmul.f32 0.5, %v1459_v37 }
 0x229   :  { %v951_v34 = vmul.f32 0.044715, %v823_v1  ;;  %v2098_v29 = vadd.f32 %v2097_v23, %v1889_v54  ;;  %v342_v62 = vpop.f32.mrf.mxu0  ;;  %v1714_v15 = vmul.f32 %v1586_v41, %v3471_v59 }
 0x22a   :  { %v1078_v44 = vadd.f32 %v950_v61, %v3505_v4  ;;  %v3522_v20 = vadd.f32 %v342_v62, %v2747_v17  ;;  %v551_v2 = vpop.f32.mrf.mxu1  ;;  %v1715_v39 = vmul.f32 %v1587_v9, %v3476_v32 }
 0x22b   :  { %v1079_v5 = vadd.f32 %v951_v34, %v3510_v40  ;;  %2235 = vst [vmem:[#allocation10 + $0xd8] sm:$0xff] %v2098_v29  ;;  %v3527_v51 = vadd.f32 %v551_v2, %v2749_v18  ;;  %1938 = vmatmul.f32.gmra.mxu2 %v1714_v15 }
 0x22c   :  { %v2484_v56 = vpop.eup %2483  ;;  %v696_v59 = vmul.f32 %v3522_v20, %v3522_v20  ;;  %2147 = vmatmul.f32.gmra.mxu3 %v1715_v39  ;;  %389 = vmatmul.f32.gmra.mxu0 %v145_v63  ;;  %v1206_v43 = vmul.f32 0.7978846, %v1078_v44 }
 0x22d   :  { %v2486_v8 = vpop.eup %2485  ;;  %v697_v26 = vmul.f32 %v3527_v51, %v3527_v51  ;;  %598 = vmatmul.f32.gmra.mxu1 %v145_v63  ;;  %v1460_v32 = vadd.f32 1.0, %v2484_v56  ;;  %v1207_v14 = vmul.f32 0.7978846, %v1079_v5 }
 0x22e   :  { %v824_v31 = vmul.f32 %v696_v59, %v3522_v20  ;;  %v1891_v13 = vpop.f32.mrf.mxu2  ;;  %v1461_v53 = vadd.f32 1.0, %v2486_v8  ;;  %2487 = vtanh.f32 %v1206_v43 }
 0x22f   :  { %v825_v28 = vmul.f32 %v697_v26, %v3527_v51  ;;  %v1892_v19 = vadd.f32 %v3312_v22, %v1891_v13  ;;  %v2100_v3 = vpop.f32.mrf.mxu3  ;;  %v1588_v52 = vmul.f32 0.5, %v1460_v32  ;;  %2489 = vtanh.f32 %v1207_v14 }
 0x230   :  { %v952_v24 = vmul.f32 0.044715, %v824_v31  ;;  %v1589_v55 = vmul.f32 0.5, %v1461_v53 }
 0x231   :  { %v953_v6 = vmul.f32 0.044715, %v825_v28  ;;  %v2101_v58 = vadd.f32 %v2100_v3, %v1892_v19  ;;  %v345_v27 = vpop.f32.mrf.mxu0  ;;  %v1716_v30 = vmul.f32 %v1588_v52, %v3488_v21 }
 0x232   :  { %v1080_v42 = vadd.f32 %v952_v24, %v3522_v20  ;;  %v3539_v10 = vadd.f32 %v345_v27, %v2747_v17  ;;  %v554_v48 = vpop.f32.mrf.mxu1  ;;  %v1717_v35 = vmul.f32 %v1589_v55, %v3493_v11 }
 0x233   :  { %v1081_v50 = vadd.f32 %v953_v6, %v3527_v51  ;;  %2236 = vst [vmem:[#allocation10 + $0xe0] sm:$0xff] %v2101_v58  ;;  %v3544_v16 = vadd.f32 %v554_v48, %v2749_v18  ;;  %1941 = vmatmul.f32.gmra.mxu2 %v1716_v30 }
 0x234   :  { %v2488_v38 = vpop.eup %2487  ;;  %v698_v33 = vmul.f32 %v3539_v10, %v3539_v10  ;;  %2150 = vmatmul.f32.gmra.mxu3 %v1717_v35  ;;  %v1208_v21 = vmul.f32 0.7978846, %v1080_v42 }
 0x235   :  { %v2490_v0 = vpop.eup %2489  ;;  %v699_v25 = vmul.f32 %v3544_v16, %v3544_v16  ;;  %v1462_v45 = vadd.f32 1.0, %v2488_v38  ;;  %v1209_v57 = vmul.f32 0.7978846, %v1081_v50 }
 0x236   :  { %v826_v11 = vmul.f32 %v698_v33, %v3539_v10  ;;  %v1894_v12 = vpop.f32.mrf.mxu2  ;;  %v1463_v46 = vadd.f32 1.0, %v2490_v0  ;;  %2491 = vtanh.f32 %v1208_v21  ;;  %v3589_v0 = vld [vmem:[%s3841_s4] ss:$0 sm:$0xff] }
 0x237   :  { %v827_v47 = vmul.f32 %v699_v25, %v3544_v16  ;;  %v1895_v60 = vadd.f32 %v3312_v22, %v1894_v12  ;;  %v2103_v7 = vpop.f32.mrf.mxu3  ;;  %v1590_v49 = vmul.f32 0.5, %v1462_v45  ;;  %2493 = vtanh.f32 %v1209_v57 }
 0x238   :  { %v954_v36 = vmul.f32 0.044715, %v826_v11  ;;  %v1591_v37 = vmul.f32 0.5, %v1463_v46 }
 0x239   :  { %v955_v1 = vmul.f32 0.044715, %v827_v47  ;;  %v2104_v54 = vadd.f32 %v2103_v7, %v1895_v60  ;;  %v348_v23 = vpop.f32.mrf.mxu0  ;;  %v1718_v41 = vmul.f32 %v1590_v49, %v3505_v4 }
 0x23a   :  { %v1082_v61 = vadd.f32 %v954_v36, %v3539_v10  ;;  %v3556_v9 = vadd.f32 %v348_v23, %v2747_v17  ;;  %v557_v34 = vpop.f32.mrf.mxu1  ;;  %v1719_v29 = vmul.f32 %v1591_v37, %v3510_v40 }
 0x23b   :  { %v1083_v62 = vadd.f32 %v955_v1, %v3544_v16  ;;  %2237 = vst [vmem:[#allocation10 + $0xe8] sm:$0xff] %v2104_v54  ;;  %v3561_v15 = vadd.f32 %v557_v34, %v2749_v18  ;;  %1944 = vmatmul.f32.gmra.mxu2 %v1718_v41 }
 0x23c   :  { %v2492_v63 = vpop.eup %2491  ;;  %v700_v44 = vmul.f32 %v3556_v9, %v3556_v9  ;;  %2153 = vmatmul.f32.gmra.mxu3 %v1719_v29  ;;  %v1210_v4 = vmul.f32 0.7978846, %v1082_v61 }
 0x23d   :  { %v2494_v2 = vpop.eup %2493  ;;  %v701_v39 = vmul.f32 %v3561_v15, %v3561_v15  ;;  %v1464_v5 = vadd.f32 1.0, %v2492_v63  ;;  %v1211_v56 = vmul.f32 0.7978846, %v1083_v62 }
 0x23e   :  { %v828_v40 = vmul.f32 %v700_v44, %v3556_v9  ;;  %v1897_v59 = vpop.f32.mrf.mxu2  ;;  %v1465_v43 = vadd.f32 1.0, %v2494_v2  ;;  %2495 = vtanh.f32 %v1210_v4 }
 0x23f   :  { %v829_v8 = vmul.f32 %v701_v39, %v3561_v15  ;;  %v1898_v26 = vadd.f32 %v3312_v22, %v1897_v59  ;;  %v2106_v32 = vpop.f32.mrf.mxu3  ;;  %v1592_v14 = vmul.f32 0.5, %v1464_v5  ;;  %2497 = vtanh.f32 %v1211_v56 }
 0x240   :  { %v956_v31 = vmul.f32 0.044715, %v828_v40  ;;  %v1593_v13 = vmul.f32 0.5, %v1465_v43 }
 0x241   :  { %v957_v53 = vmul.f32 0.044715, %v829_v8  ;;  %v2107_v28 = vadd.f32 %v2106_v32, %v1898_v26  ;;  %v351_v19 = vpop.f32.mrf.mxu0  ;;  %v1720_v3 = vmul.f32 %v1592_v14, %v3522_v20 }
 0x242   :  { %v1084_v52 = vadd.f32 %v956_v31, %v3556_v9  ;;  %v3573_v24 = vadd.f32 %v351_v19, %v2747_v17  ;;  %v560_v55 = vpop.f32.mrf.mxu1  ;;  %v1721_v6 = vmul.f32 %v1593_v13, %v3527_v51 }
 0x243   :  { %v1085_v22 = vadd.f32 %v957_v53, %v3561_v15  ;;  %2238 = vst [vmem:[#allocation10 + $0xf0] sm:$0xff] %v2107_v28  ;;  %v3578_v58 = vadd.f32 %v560_v55, %v2749_v18  ;;  %1947 = vmatmul.f32.gmra.mxu2 %v1720_v3 }
 0x244   :  { %v2496_v27 = vpop.eup %2495  ;;  %v702_v30 = vmul.f32 %v3573_v24, %v3573_v24  ;;  %2156 = vmatmul.f32.gmra.mxu3 %v1721_v6  ;;  %v1212_v20 = vmul.f32 0.7978846, %v1084_v52 }
 0x245   :  { %v2498_v42 = vpop.eup %2497  ;;  %v703_v48 = vmul.f32 %v3578_v58, %v3578_v58  ;;  %v1466_v35 = vadd.f32 1.0, %v2496_v27  ;;  %v1213_v50 = vmul.f32 0.7978846, %v1085_v22 }
 0x246   :  { %v830_v51 = vmul.f32 %v702_v30, %v3573_v24  ;;  %v1900_v38 = vpop.f32.mrf.mxu2  ;;  %v1467_v33 = vadd.f32 1.0, %v2498_v42  ;;  %2499 = vtanh.f32 %v1212_v20 }
 0x247   :  { %v831_v21 = vmul.f32 %v703_v48, %v3578_v58  ;;  %v1901_v25 = vadd.f32 %v3589_v0, %v1900_v38  ;;  %v2109_v45 = vpop.f32.mrf.mxu3  ;;  %v1594_v57 = vmul.f32 0.5, %v1466_v35  ;;  %2501 = vtanh.f32 %v1213_v50 }
 0x248   :  { %v958_v11 = vmul.f32 0.044715, %v830_v51  ;;  %v1595_v12 = vmul.f32 0.5, %v1467_v33 }
 0x249   :  { %v959_v46 = vmul.f32 0.044715, %v831_v21  ;;  %v2110_v47 = vadd.f32 %v2109_v45, %v1901_v25  ;;  %v354_v60 = vpop.f32.mrf.mxu0  ;;  %v1722_v7 = vmul.f32 %v1594_v57, %v3539_v10 }
 0x24a   :  { %v1086_v49 = vadd.f32 %v958_v11, %v3573_v24  ;;  %v3595_v36 = vadd.f32 %v354_v60, %v2747_v17  ;;  %v563_v37 = vpop.f32.mrf.mxu1  ;;  %v1723_v1 = vmul.f32 %v1595_v12, %v3544_v16 }
 0x24b   :  { %v1087_v54 = vadd.f32 %v959_v46, %v3578_v58  ;;  %2239 = vst [vmem:[#allocation10 + $0xf8] sm:$0xff] %v2110_v47  ;;  %v3600_v23 = vadd.f32 %v563_v37, %v2749_v18  ;;  %1950 = vmatmul.f32.gmra.mxu2 %v1722_v7 }
 0x24c   :  { %v2500_v41 = vpop.eup %2499  ;;  %v704_v61 = vmul.f32 %v3595_v36, %v3595_v36  ;;  %2159 = vmatmul.f32.gmra.mxu3 %v1723_v1  ;;  %v1214_v10 = vmul.f32 0.7978846, %v1086_v49 }
 0x24d   :  { %v2502_v34 = vpop.eup %2501  ;;  %v705_v29 = vmul.f32 %v3600_v23, %v3600_v23  ;;  %v1468_v62 = vadd.f32 1.0, %v2500_v41  ;;  %v1215_v63 = vmul.f32 0.7978846, %v1087_v54 }
 0x24e   :  { %v832_v16 = vmul.f32 %v704_v61, %v3595_v36  ;;  %v1903_v44 = vpop.f32.mrf.mxu2  ;;  %v1469_v4 = vadd.f32 1.0, %v2502_v34  ;;  %2503 = vtanh.f32 %v1214_v10 }
 0x24f   :  { %v833_v2 = vmul.f32 %v705_v29, %v3600_v23  ;;  %v1904_v39 = vadd.f32 %v3589_v0, %v1903_v44  ;;  %v2112_v5 = vpop.f32.mrf.mxu3  ;;  %v1596_v56 = vmul.f32 0.5, %v1468_v62  ;;  %2505 = vtanh.f32 %v1215_v63 }
 0x250   :  { %v960_v40 = vmul.f32 0.044715, %v832_v16  ;;  %v1597_v59 = vmul.f32 0.5, %v1469_v4 }
 0x251   :  { %v961_v43 = vmul.f32 0.044715, %v833_v2  ;;  %v2113_v8 = vadd.f32 %v2112_v5, %v1904_v39  ;;  %v357_v26 = vpop.f32.mrf.mxu0  ;;  %v1724_v32 = vmul.f32 %v1596_v56, %v3556_v9 }
 0x252   :  { %v1088_v14 = vadd.f32 %v960_v40, %v3595_v36  ;;  %v3612_v31 = vadd.f32 %v357_v26, %v2747_v17  ;;  %v566_v13 = vpop.f32.mrf.mxu1  ;;  %v1725_v53 = vmul.f32 %v1597_v59, %v3561_v15 }
 0x253   :  { %v1089_v28 = vadd.f32 %v961_v43, %v3600_v23  ;;  %2240 = vst [vmem:[#allocation10 + $0x100] sm:$0xff] %v2113_v8  ;;  %v3617_v19 = vadd.f32 %v566_v13, %v2749_v18  ;;  %1953 = vmatmul.f32.gmra.mxu2 %v1724_v32 }
 0x254   :  { %v2504_v3 = vpop.eup %2503  ;;  %v706_v52 = vmul.f32 %v3612_v31, %v3612_v31  ;;  %2162 = vmatmul.f32.gmra.mxu3 %v1725_v53  ;;  %v1216_v9 = vmul.f32 0.7978846, %v1088_v14 }
 0x255   :  { %v2506_v55 = vpop.eup %2505  ;;  %v707_v6 = vmul.f32 %v3617_v19, %v3617_v19  ;;  %v1470_v22 = vadd.f32 1.0, %v2504_v3  ;;  %v1217_v27 = vmul.f32 0.7978846, %v1089_v28 }
 0x256   :  { %v834_v15 = vmul.f32 %v706_v52, %v3612_v31  ;;  %v1906_v30 = vpop.f32.mrf.mxu2  ;;  %v1471_v20 = vadd.f32 1.0, %v2506_v55  ;;  %2507 = vtanh.f32 %v1216_v9 }
 0x257   :  { %v835_v42 = vmul.f32 %v707_v6, %v3617_v19  ;;  %v1907_v48 = vadd.f32 %v3589_v0, %v1906_v30  ;;  %v2115_v35 = vpop.f32.mrf.mxu3  ;;  %v1598_v50 = vmul.f32 0.5, %v1470_v22  ;;  %2509 = vtanh.f32 %v1217_v27 }
 0x258   :  { %v962_v51 = vmul.f32 0.044715, %v834_v15  ;;  %v1599_v38 = vmul.f32 0.5, %v1471_v20 }
 0x259   :  { %v963_v33 = vmul.f32 0.044715, %v835_v42  ;;  %v2116_v21 = vadd.f32 %v2115_v35, %v1907_v48  ;;  %v360_v25 = vpop.f32.mrf.mxu0  ;;  %v1726_v45 = vmul.f32 %v1598_v50, %v3573_v24 }
 0x25a   :  { %v1090_v57 = vadd.f32 %v962_v51, %v3612_v31  ;;  %v3629_v11 = vadd.f32 %v360_v25, %v2747_v17  ;;  %v569_v12 = vpop.f32.mrf.mxu1  ;;  %v1727_v46 = vmul.f32 %v1599_v38, %v3578_v58 }
 0x25b   :  { %v1091_v47 = vadd.f32 %v963_v33, %v3617_v19  ;;  %2241 = vst [vmem:[#allocation10 + $0x108] sm:$0xff] %v2116_v21  ;;  %v3634_v60 = vadd.f32 %v569_v12, %v2749_v18  ;;  %1956 = vmatmul.f32.gmra.mxu2 %v1726_v45 }
 0x25c   :  { %v2508_v7 = vpop.eup %2507  ;;  %v708_v49 = vmul.f32 %v3629_v11, %v3629_v11  ;;  %2165 = vmatmul.f32.gmra.mxu3 %v1727_v46  ;;  %v1218_v24 = vmul.f32 0.7978846, %v1090_v57 }
 0x25d   :  { %v2510_v37 = vpop.eup %2509  ;;  %v709_v1 = vmul.f32 %v3634_v60, %v3634_v60  ;;  %v1472_v54 = vadd.f32 1.0, %v2508_v7  ;;  %v1219_v41 = vmul.f32 0.7978846, %v1091_v47 }
 0x25e   :  { %v836_v58 = vmul.f32 %v708_v49, %v3629_v11  ;;  %v1909_v61 = vpop.f32.mrf.mxu2  ;;  %v1473_v10 = vadd.f32 1.0, %v2510_v37  ;;  %2511 = vtanh.f32 %v1218_v24 }
 0x25f   :  { %v837_v34 = vmul.f32 %v709_v1, %v3634_v60  ;;  %v1910_v29 = vadd.f32 %v3589_v0, %v1909_v61  ;;  %v2118_v62 = vpop.f32.mrf.mxu3  ;;  %v1600_v63 = vmul.f32 0.5, %v1472_v54  ;;  %2513 = vtanh.f32 %v1219_v41 }
 0x260   :  { %v964_v16 = vmul.f32 0.044715, %v836_v58  ;;  %v1601_v44 = vmul.f32 0.5, %v1473_v10 }
 0x261   :  { %v965_v4 = vmul.f32 0.044715, %v837_v34  ;;  %v2119_v2 = vadd.f32 %v2118_v62, %v1910_v29  ;;  %v363_v39 = vpop.f32.mrf.mxu0  ;;  %v1728_v5 = vmul.f32 %v1600_v63, %v3595_v36 }
 0x262   :  { %v1092_v56 = vadd.f32 %v964_v16, %v3629_v11  ;;  %v3646_v40 = vadd.f32 %v363_v39, %v2747_v17  ;;  %v572_v59 = vpop.f32.mrf.mxu1  ;;  %v1729_v43 = vmul.f32 %v1601_v44, %v3600_v23 }
 0x263   :  { %v1093_v8 = vadd.f32 %v965_v4, %v3634_v60  ;;  %2242 = vst [vmem:[#allocation10 + $0x110] sm:$0xff] %v2119_v2  ;;  %v3651_v26 = vadd.f32 %v572_v59, %v2749_v18  ;;  %1959 = vmatmul.f32.gmra.mxu2 %v1728_v5 }
 0x264   :  { %v2512_v32 = vpop.eup %2511  ;;  %v710_v14 = vmul.f32 %v3646_v40, %v3646_v40  ;;  %2168 = vmatmul.f32.gmra.mxu3 %v1729_v43  ;;  %v1220_v36 = vmul.f32 0.7978846, %v1092_v56 }
 0x265   :  { %v2514_v13 = vpop.eup %2513  ;;  %v711_v53 = vmul.f32 %v3651_v26, %v3651_v26  ;;  %v1474_v28 = vadd.f32 1.0, %v2512_v32  ;;  %v1221_v3 = vmul.f32 0.7978846, %v1093_v8 }
 0x266   :  { %v838_v23 = vmul.f32 %v710_v14, %v3646_v40  ;;  %v1912_v52 = vpop.f32.mrf.mxu2  ;;  %v1475_v9 = vadd.f32 1.0, %v2514_v13  ;;  %2515 = vtanh.f32 %v1220_v36 }
 0x267   :  { %v839_v55 = vmul.f32 %v711_v53, %v3651_v26  ;;  %v1913_v6 = vadd.f32 %v3589_v0, %v1912_v52  ;;  %v2121_v22 = vpop.f32.mrf.mxu3  ;;  %v1602_v27 = vmul.f32 0.5, %v1474_v28  ;;  %2517 = vtanh.f32 %v1221_v3 }
 0x268   :  { %v966_v15 = vmul.f32 0.044715, %v838_v23  ;;  %v1603_v30 = vmul.f32 0.5, %v1475_v9 }
 0x269   :  { %v967_v20 = vmul.f32 0.044715, %v839_v55  ;;  %v2122_v42 = vadd.f32 %v2121_v22, %v1913_v6  ;;  %v366_v48 = vpop.f32.mrf.mxu0  ;;  %v1730_v35 = vmul.f32 %v1602_v27, %v3612_v31 }
 0x26a   :  { %v1094_v50 = vadd.f32 %v966_v15, %v3646_v40  ;;  %v3663_v51 = vadd.f32 %v366_v48, %v2747_v17  ;;  %v575_v38 = vpop.f32.mrf.mxu1  ;;  %v1731_v33 = vmul.f32 %v1603_v30, %v3617_v19 }
 0x26b   :  { %v1095_v21 = vadd.f32 %v967_v20, %v3651_v26  ;;  %2243 = vst [vmem:[#allocation10 + $0x118] sm:$0xff] %v2122_v42  ;;  %v3668_v25 = vadd.f32 %v575_v38, %v2749_v18  ;;  %1962 = vmatmul.f32.gmra.mxu2 %v1730_v35 }
 0x26c   :  { %v2516_v45 = vpop.eup %2515  ;;  %v712_v57 = vmul.f32 %v3663_v51, %v3663_v51  ;;  %2171 = vmatmul.f32.gmra.mxu3 %v1731_v33  ;;  %v1222_v31 = vmul.f32 0.7978846, %v1094_v50 }
 0x26d   :  { %v2518_v12 = vpop.eup %2517  ;;  %v713_v46 = vmul.f32 %v3668_v25, %v3668_v25  ;;  %v1476_v47 = vadd.f32 1.0, %v2516_v45  ;;  %v1223_v7 = vmul.f32 0.7978846, %v1095_v21 }
 0x26e   :  { %v840_v19 = vmul.f32 %v712_v57, %v3663_v51  ;;  %v1915_v49 = vpop.f32.mrf.mxu2  ;;  %v1477_v24 = vadd.f32 1.0, %v2518_v12  ;;  %2519 = vtanh.f32 %v1222_v31 }
 0x26f   :  { %v841_v37 = vmul.f32 %v713_v46, %v3668_v25  ;;  %v1916_v1 = vadd.f32 %v3589_v0, %v1915_v49  ;;  %v2124_v54 = vpop.f32.mrf.mxu3  ;;  %v1604_v41 = vmul.f32 0.5, %v1476_v47  ;;  %2521 = vtanh.f32 %v1223_v7 }
 0x270   :  { %v968_v58 = vmul.f32 0.044715, %v840_v19  ;;  %v1605_v61 = vmul.f32 0.5, %v1477_v24 }
 0x271   :  { %v969_v10 = vmul.f32 0.044715, %v841_v37  ;;  %v2125_v34 = vadd.f32 %v2124_v54, %v1916_v1  ;;  %v369_v29 = vpop.f32.mrf.mxu0  ;;  %v1732_v62 = vmul.f32 %v1604_v41, %v3629_v11 }
 0x272   :  { %v1096_v63 = vadd.f32 %v968_v58, %v3663_v51  ;;  %v3680_v16 = vadd.f32 %v369_v29, %v2747_v17  ;;  %v578_v44 = vpop.f32.mrf.mxu1  ;;  %v1733_v4 = vmul.f32 %v1605_v61, %v3634_v60 }
 0x273   :  { %v1097_v2 = vadd.f32 %v969_v10, %v3668_v25  ;;  %2244 = vst [vmem:[#allocation10 + $0x120] sm:$0xff] %v2125_v34  ;;  %v3685_v39 = vadd.f32 %v578_v44, %v2749_v18  ;;  %1965 = vmatmul.f32.gmra.mxu2 %v1732_v62 }
 0x274   :  { %v2520_v5 = vpop.eup %2519  ;;  %v714_v56 = vmul.f32 %v3680_v16, %v3680_v16  ;;  %2174 = vmatmul.f32.gmra.mxu3 %v1733_v4  ;;  %v1224_v11 = vmul.f32 0.7978846, %v1096_v63 }
 0x275   :  { %v2522_v59 = vpop.eup %2521  ;;  %v715_v43 = vmul.f32 %v3685_v39, %v3685_v39  ;;  %v1478_v8 = vadd.f32 1.0, %v2520_v5  ;;  %v1225_v32 = vmul.f32 0.7978846, %v1097_v2 }
 0x276   :  { %v842_v60 = vmul.f32 %v714_v56, %v3680_v16  ;;  %v1918_v14 = vpop.f32.mrf.mxu2  ;;  %v1479_v36 = vadd.f32 1.0, %v2522_v59  ;;  %2523 = vtanh.f32 %v1224_v11 }
 0x277   :  { %v843_v13 = vmul.f32 %v715_v43, %v3685_v39  ;;  %v1919_v53 = vadd.f32 %v3589_v0, %v1918_v14  ;;  %v2127_v28 = vpop.f32.mrf.mxu3  ;;  %v1606_v3 = vmul.f32 0.5, %v1478_v8  ;;  %2525 = vtanh.f32 %v1225_v32 }
 0x278   :  { %v970_v23 = vmul.f32 0.044715, %v842_v60  ;;  %v1607_v52 = vmul.f32 0.5, %v1479_v36 }
 0x279   :  { %v971_v9 = vmul.f32 0.044715, %v843_v13  ;;  %v2128_v55 = vadd.f32 %v2127_v28, %v1919_v53  ;;  %v372_v6 = vpop.f32.mrf.mxu0  ;;  %v1734_v22 = vmul.f32 %v1606_v3, %v3646_v40 }
 0x27a   :  { %v1098_v27 = vadd.f32 %v970_v23, %v3680_v16  ;;  %v3697_v15 = vadd.f32 %v372_v6, %v2747_v17  ;;  %v581_v30 = vpop.f32.mrf.mxu1  ;;  %v1735_v20 = vmul.f32 %v1607_v52, %v3651_v26 }
 0x27b   :  { %v1099_v42 = vadd.f32 %v971_v9, %v3685_v39  ;;  %2245 = vst [vmem:[#allocation10 + $0x128] sm:$0xff] %v2128_v55  ;;  %v3702_v48 = vadd.f32 %v581_v30, %v2749_v18  ;;  %1968 = vmatmul.f32.gmra.mxu2 %v1734_v22 }
 0x27c   :  { %v2524_v35 = vpop.eup %2523  ;;  %v716_v50 = vmul.f32 %v3697_v15, %v3697_v15  ;;  %2177 = vmatmul.f32.gmra.mxu3 %v1735_v20  ;;  %v1226_v40 = vmul.f32 0.7978846, %v1098_v27 }
 0x27d   :  { %v2526_v38 = vpop.eup %2525  ;;  %v717_v33 = vmul.f32 %v3702_v48, %v3702_v48  ;;  %v1480_v21 = vadd.f32 1.0, %v2524_v35  ;;  %v1227_v45 = vmul.f32 0.7978846, %v1099_v42 }
 0x27e   :  { %v844_v26 = vmul.f32 %v716_v50, %v3697_v15  ;;  %v1921_v57 = vpop.f32.mrf.mxu2  ;;  %v1481_v31 = vadd.f32 1.0, %v2526_v38  ;;  %2527 = vtanh.f32 %v1226_v40 }
 0x27f   :  { %v845_v12 = vmul.f32 %v717_v33, %v3702_v48  ;;  %v1922_v46 = vadd.f32 %v3589_v0, %v1921_v57  ;;  %v2130_v47 = vpop.f32.mrf.mxu3  ;;  %v1608_v7 = vmul.f32 0.5, %v1480_v21  ;;  %2529 = vtanh.f32 %v1227_v45 }
 0x280   :  { %v972_v19 = vmul.f32 0.044715, %v844_v26  ;;  %v1609_v49 = vmul.f32 0.5, %v1481_v31 }
 0x281   :  { %v973_v24 = vmul.f32 0.044715, %v845_v12  ;;  %v2131_v37 = vadd.f32 %v2130_v47, %v1922_v46  ;;  %v375_v1 = vpop.f32.mrf.mxu0  ;;  %v1736_v54 = vmul.f32 %v1608_v7, %v3663_v51 }
 0x282   :  { %v1100_v41 = vadd.f32 %v972_v19, %v3697_v15  ;;  %v3714_v58 = vadd.f32 %v375_v1, %v2747_v17  ;;  %v584_v61 = vpop.f32.mrf.mxu1  ;;  %v1737_v10 = vmul.f32 %v1609_v49, %v3668_v25 }
 0x283   :  { %v1101_v34 = vadd.f32 %v973_v24, %v3702_v48  ;;  %2246 = vst [vmem:[#allocation10 + $0x130] sm:$0xff] %v2131_v37  ;;  %v3719_v29 = vadd.f32 %v584_v61, %v2749_v18  ;;  %1971 = vmatmul.f32.gmra.mxu2 %v1736_v54 }
 0x284   :  { %v2528_v62 = vpop.eup %2527  ;;  %v718_v63 = vmul.f32 %v3714_v58, %v3714_v58  ;;  %2180 = vmatmul.f32.gmra.mxu3 %v1737_v10  ;;  %v1228_v51 = vmul.f32 0.7978846, %v1100_v41 }
 0x285   :  { %v2530_v44 = vpop.eup %2529  ;;  %v719_v4 = vmul.f32 %v3719_v29, %v3719_v29  ;;  %v1482_v2 = vadd.f32 1.0, %v2528_v62  ;;  %v1229_v5 = vmul.f32 0.7978846, %v1101_v34 }
 0x286   :  { %v846_v25 = vmul.f32 %v718_v63, %v3714_v58  ;;  %v1924_v56 = vpop.f32.mrf.mxu2  ;;  %v1483_v11 = vadd.f32 1.0, %v2530_v44  ;;  %2531 = vtanh.f32 %v1228_v51 }
 0x287   :  { %v847_v59 = vmul.f32 %v719_v4, %v3719_v29  ;;  %v1925_v43 = vadd.f32 %v3589_v0, %v1924_v56  ;;  %v2133_v8 = vpop.f32.mrf.mxu3  ;;  %v1610_v32 = vmul.f32 0.5, %v1482_v2  ;;  %2533 = vtanh.f32 %v1229_v5 }
 0x288   :  { %v974_v60 = vmul.f32 0.044715, %v846_v25  ;;  %v1611_v14 = vmul.f32 0.5, %v1483_v11 }
 0x289   :  { %v975_v36 = vmul.f32 0.044715, %v847_v59  ;;  %v2134_v13 = vadd.f32 %v2133_v8, %v1925_v43  ;;  %v378_v53 = vpop.f32.mrf.mxu0  ;;  %v1738_v28 = vmul.f32 %v1610_v32, %v3680_v16 }
 0x28a   :  { %v1102_v3 = vadd.f32 %v974_v60, %v3714_v58  ;;  %v3731_v23 = vadd.f32 %v378_v53, %v2747_v17  ;;  %v587_v52 = vpop.f32.mrf.mxu1  ;;  %v1739_v9 = vmul.f32 %v1611_v14, %v3685_v39 }
 0x28b   :  { %v1103_v55 = vadd.f32 %v975_v36, %v3719_v29  ;;  %2247 = vst [vmem:[#allocation10 + $0x138] sm:$0xff] %v2134_v13  ;;  %v3736_v6 = vadd.f32 %v587_v52, %v2749_v18  ;;  %1974 = vmatmul.f32.gmra.mxu2 %v1738_v28 }
 0x28c   :  { %v2532_v22 = vpop.eup %2531  ;;  %v720_v27 = vmul.f32 %v3731_v23, %v3731_v23  ;;  %2183 = vmatmul.f32.gmra.mxu3 %v1739_v9  ;;  %v1230_v16 = vmul.f32 0.7978846, %v1102_v3 }
 0x28d   :  { %v2534_v30 = vpop.eup %2533  ;;  %v721_v20 = vmul.f32 %v3736_v6, %v3736_v6  ;;  %v1484_v42 = vadd.f32 1.0, %v2532_v22  ;;  %v1231_v35 = vmul.f32 0.7978846, %v1103_v55 }
 0x28e   :  { %v848_v39 = vmul.f32 %v720_v27, %v3731_v23  ;;  %v1927_v50 = vpop.f32.mrf.mxu2  ;;  %v1485_v40 = vadd.f32 1.0, %v2534_v30  ;;  %2535 = vtanh.f32 %v1230_v16 }
 0x28f   :  { %v849_v38 = vmul.f32 %v721_v20, %v3736_v6  ;;  %v1928_v33 = vadd.f32 %v3589_v0, %v1927_v50  ;;  %v2136_v21 = vpop.f32.mrf.mxu3  ;;  %v1612_v45 = vmul.f32 0.5, %v1484_v42  ;;  %2537 = vtanh.f32 %v1231_v35 }
 0x290   :  { %v976_v26 = vmul.f32 0.044715, %v848_v39  ;;  %v1613_v57 = vmul.f32 0.5, %v1485_v40 }
 0x291   :  { %v977_v31 = vmul.f32 0.044715, %v849_v38  ;;  %v2137_v12 = vadd.f32 %v2136_v21, %v1928_v33  ;;  %v381_v46 = vpop.f32.mrf.mxu0  ;;  %v1740_v47 = vmul.f32 %v1612_v45, %v3697_v15 }
 0x292   :  { %v1104_v7 = vadd.f32 %v976_v26, %v3731_v23  ;;  %v3748_v19 = vadd.f32 %v381_v46, %v2747_v17  ;;  %v590_v49 = vpop.f32.mrf.mxu1  ;;  %v1741_v24 = vmul.f32 %v1613_v57, %v3702_v48 }
 0x293   :  { %v1105_v37 = vadd.f32 %v977_v31, %v3736_v6  ;;  %2248 = vst [vmem:[#allocation10 + $0x140] sm:$0xff] %v2137_v12  ;;  %v3753_v1 = vadd.f32 %v590_v49, %v2749_v18  ;;  %1977 = vmatmul.f32.gmra.mxu2 %v1740_v47 }
 0x294   :  { %v2536_v54 = vpop.eup %2535  ;;  %v722_v41 = vmul.f32 %v3748_v19, %v3748_v19  ;;  %2186 = vmatmul.f32.gmra.mxu3 %v1741_v24  ;;  %v1232_v15 = vmul.f32 0.7978846, %v1104_v7 }
 0x295   :  { %v2538_v61 = vpop.eup %2537  ;;  %v723_v10 = vmul.f32 %v3753_v1, %v3753_v1  ;;  %v1486_v34 = vadd.f32 1.0, %v2536_v54  ;;  %v1233_v62 = vmul.f32 0.7978846, %v1105_v37 }
 0x296   :  { %v850_v48 = vmul.f32 %v722_v41, %v3748_v19  ;;  %v1930_v63 = vpop.f32.mrf.mxu2  ;;  %v1487_v51 = vadd.f32 1.0, %v2538_v61  ;;  %2539 = vtanh.f32 %v1232_v15 }
 0x297   :  { %v851_v44 = vmul.f32 %v723_v10, %v3753_v1  ;;  %v1931_v4 = vadd.f32 %v3589_v0, %v1930_v63  ;;  %v2139_v2 = vpop.f32.mrf.mxu3  ;;  %v1614_v5 = vmul.f32 0.5, %v1486_v34  ;;  %2541 = vtanh.f32 %v1233_v62 }
 0x298   :  { %v978_v25 = vmul.f32 0.044715, %v850_v48  ;;  %v1615_v56 = vmul.f32 0.5, %v1487_v51 }
 0x299   :  { %v979_v11 = vmul.f32 0.044715, %v851_v44  ;;  %v2140_v59 = vadd.f32 %v2139_v2, %v1931_v4  ;;  %v384_v43 = vpop.f32.mrf.mxu0  ;;  %v1742_v8 = vmul.f32 %v1614_v5, %v3714_v58 }
 0x29a   :  { %v1106_v32 = vadd.f32 %v978_v25, %v3748_v19  ;;  %v3765_v60 = vadd.f32 %v384_v43, %v2747_v17  ;;  %v593_v14 = vpop.f32.mrf.mxu1  ;;  %v1743_v36 = vmul.f32 %v1615_v56, %v3719_v29 }
 0x29b   :  { %v1107_v13 = vadd.f32 %v979_v11, %v3753_v1  ;;  %2249 = vst [vmem:[#allocation10 + $0x148] sm:$0xff] %v2140_v59  ;;  %v3770_v53 = vadd.f32 %v593_v14, %v2749_v18  ;;  %1980 = vmatmul.f32.gmra.mxu2 %v1742_v8 }
 0x29c   :  { %v2540_v28 = vpop.eup %2539  ;;  %v724_v3 = vmul.f32 %v3765_v60, %v3765_v60  ;;  %2189 = vmatmul.f32.gmra.mxu3 %v1743_v36  ;;  %v1234_v58 = vmul.f32 0.7978846, %v1106_v32 }
 0x29d   :  { %v2542_v52 = vpop.eup %2541  ;;  %v725_v9 = vmul.f32 %v3770_v53, %v3770_v53  ;;  %v1488_v55 = vadd.f32 1.0, %v2540_v28  ;;  %v1235_v22 = vmul.f32 0.7978846, %v1107_v13 }
 0x29e   :  { %v852_v29 = vmul.f32 %v724_v3, %v3765_v60  ;;  %v1933_v27 = vpop.f32.mrf.mxu2  ;;  %v1489_v16 = vadd.f32 1.0, %v2542_v52  ;;  %2543 = vtanh.f32 %v1234_v58 }
 0x29f   :  { %v853_v30 = vmul.f32 %v725_v9, %v3770_v53  ;;  %v1934_v20 = vadd.f32 %v3589_v0, %v1933_v27  ;;  %v2142_v42 = vpop.f32.mrf.mxu3  ;;  %v1616_v35 = vmul.f32 0.5, %v1488_v55  ;;  %2545 = vtanh.f32 %v1235_v22 }
 0x2a0   :  { %v980_v39 = vmul.f32 0.044715, %v852_v29  ;;  %v1617_v50 = vmul.f32 0.5, %v1489_v16 }
 0x2a1   :  { %v981_v40 = vmul.f32 0.044715, %v853_v30  ;;  %v2143_v38 = vadd.f32 %v2142_v42, %v1934_v20  ;;  %v387_v33 = vpop.f32.mrf.mxu0  ;;  %v1744_v21 = vmul.f32 %v1616_v35, %v3731_v23 }
 0x2a2   :  { %v1108_v45 = vadd.f32 %v980_v39, %v3765_v60  ;;  %v3782_v26 = vadd.f32 %v387_v33, %v2747_v17  ;;  %v596_v57 = vpop.f32.mrf.mxu1  ;;  %v1745_v31 = vmul.f32 %v1617_v50, %v3736_v6 }
 0x2a3   :  { %v1109_v12 = vadd.f32 %v981_v40, %v3770_v53  ;;  %2250 = vst [vmem:[#allocation10 + $0x150] sm:$0xff] %v2143_v38  ;;  %v3787_v46 = vadd.f32 %v596_v57, %v2749_v18  ;;  %1983 = vmatmul.f32.gmra.mxu2 %v1744_v21 }
 0x2a4   :  { %v2544_v47 = vpop.eup %2543  ;;  %v726_v7 = vmul.f32 %v3782_v26, %v3782_v26  ;;  %2192 = vmatmul.f32.gmra.mxu3 %v1745_v31  ;;  %v1236_v23 = vmul.f32 0.7978846, %v1108_v45 }
 0x2a5   :  { %v2546_v49 = vpop.eup %2545  ;;  %v727_v24 = vmul.f32 %v3787_v46, %v3787_v46  ;;  %v1490_v37 = vadd.f32 1.0, %v2544_v47  ;;  %v1237_v54 = vmul.f32 0.7978846, %v1109_v12 }
 0x2a6   :  { %v854_v6 = vmul.f32 %v726_v7, %v3782_v26  ;;  %v1936_v41 = vpop.f32.mrf.mxu2  ;;  %v1491_v15 = vadd.f32 1.0, %v2546_v49  ;;  %2547 = vtanh.f32 %v1236_v23 }
 0x2a7   :  { %v855_v61 = vmul.f32 %v727_v24, %v3787_v46  ;;  %v1937_v10 = vadd.f32 %v3589_v0, %v1936_v41  ;;  %v2145_v34 = vpop.f32.mrf.mxu3  ;;  %v1618_v62 = vmul.f32 0.5, %v1490_v37  ;;  %2549 = vtanh.f32 %v1237_v54 }
 0x2a8   :  { %v982_v48 = vmul.f32 0.044715, %v854_v6  ;;  %v1619_v63 = vmul.f32 0.5, %v1491_v15 }
 0x2a9   :  { %v983_v51 = vmul.f32 0.044715, %v855_v61  ;;  %v2146_v44 = vadd.f32 %v2145_v34, %v1937_v10  ;;  %v390_v4 = vpop.f32.mrf.mxu0  ;;  %v1746_v2 = vmul.f32 %v1618_v62, %v3748_v19 }
 0x2aa   :  { %v1110_v5 = vadd.f32 %v982_v48, %v3782_v26  ;;  %v3799_v25 = vadd.f32 %v390_v4, %v2747_v17  ;;  %v599_v56 = vpop.f32.mrf.mxu1  ;;  %v1747_v11 = vmul.f32 %v1619_v63, %v3753_v1 }
 0x2ab   :  { %v1111_v59 = vadd.f32 %v983_v51, %v3787_v46  ;;  %2251 = vst [vmem:[#allocation10 + $0x158] sm:$0xff] %v2146_v44  ;;  %v600_v43 = vadd.f32 %v599_v56, %v2749_v18  ;;  %1986 = vmatmul.f32.gmra.mxu2 %v1746_v2 }
 0x2ac   :  { %v2548_v8 = vpop.eup %2547  ;;  %v728_v32 = vmul.f32 %v3799_v25, %v3799_v25  ;;  %2195 = vmatmul.f32.gmra.mxu3 %v1747_v11  ;;  %v1238_v19 = vmul.f32 0.7978846, %v1110_v5 }
 0x2ad   :  { %v2550_v14 = vpop.eup %2549  ;;  %v729_v36 = vmul.f32 %v600_v43, %v600_v43  ;;  %v1492_v13 = vadd.f32 1.0, %v2548_v8  ;;  %v1239_v17 = vmul.f32 0.7978846, %v1111_v59 }
 0x2ae   :  { %v856_v28 = vmul.f32 %v728_v32, %v3799_v25  ;;  %v1939_v3 = vpop.f32.mrf.mxu2  ;;  %v1493_v1 = vadd.f32 1.0, %v2550_v14  ;;  %2551 = vtanh.f32 %v1238_v19 }
 0x2af   :  { %v857_v58 = vmul.f32 %v729_v36, %v600_v43  ;;  %v1940_v52 = vadd.f32 %v3589_v0, %v1939_v3  ;;  %v2148_v18 = vpop.f32.mrf.mxu3  ;;  %v1620_v9 = vmul.f32 0.5, %v1492_v13  ;;  %2553 = vtanh.f32 %v1239_v17 }
 0x2b0   :  { %v984_v55 = vmul.f32 0.044715, %v856_v28  ;;  %v1621_v22 = vmul.f32 0.5, %v1493_v1 }
 0x2b1   :  { %v985_v29 = vmul.f32 0.044715, %v857_v58  ;;  %v2149_v27 = vadd.f32 %v2148_v18, %v1940_v52  ;;  %v1748_v16 = vmul.f32 %v1620_v9, %v3765_v60 }
 0x2b2   :  { %v1112_v30 = vadd.f32 %v984_v55, %v3799_v25  ;;  %v1749_v20 = vmul.f32 %v1621_v22, %v3770_v53 }
 0x2b3   :  { %v1113_v42 = vadd.f32 %v985_v29, %v600_v43  ;;  %2252 = vst [vmem:[#allocation10 + $0x160] sm:$0xff] %v2149_v27  ;;  %1989 = vmatmul.f32.gmra.mxu2 %v1748_v16 }
 0x2b4   :  { %v2552_v35 = vpop.eup %2551  ;;  %2198 = vmatmul.f32.gmra.mxu3 %v1749_v20  ;;  %v1240_v39 = vmul.f32 0.7978846, %v1112_v30 }
 0x2b5   :  { %v2554_v50 = vpop.eup %2553  ;;  %v1494_v40 = vadd.f32 1.0, %v2552_v35  ;;  %v1241_v38 = vmul.f32 0.7978846, %v1113_v42 }
 0x2b6   :  { %v1942_v33 = vpop.f32.mrf.mxu2  ;;  %v1495_v21 = vadd.f32 1.0, %v2554_v50  ;;  %2555 = vtanh.f32 %v1240_v39 }
 0x2b7   :  { %v1943_v45 = vadd.f32 %v3589_v0, %v1942_v33  ;;  %v2151_v57 = vpop.f32.mrf.mxu3  ;;  %v1622_v60 = vmul.f32 0.5, %v1494_v40  ;;  %2557 = vtanh.f32 %v1241_v38 }
 0x2b8   :  { %v1623_v31 = vmul.f32 0.5, %v1495_v21 }
 0x2b9   :  { %v2152_v12 = vadd.f32 %v2151_v57, %v1943_v45  ;;  %v1750_v53 = vmul.f32 %v1622_v60, %v3782_v26 }
 0x2ba   :  { %v1751_v47 = vmul.f32 %v1623_v31, %v3787_v46 }
 0x2bb   :  { %2253 = vst [vmem:[#allocation10 + $0x168] sm:$0xff] %v2152_v12  ;;  %1992 = vmatmul.f32.gmra.mxu2 %v1750_v53  ;;  %v2561_v53 = vld [vmem:[%s3841_s4] ss:$0 sm:$0xff]  ;;  %s2698_s4 = smov [#allocation10]  }
 0x2bc   :  { %v2556_v7 = vpop.eup %2555  ;;  %2201 = vmatmul.f32.gmra.mxu3 %v1751_v47  ;;  %s2276_s21 = sshll.u32 %s2698_s4, 4  ;;  %s2277_s21 = int_to_ptr.vmem [resolvable:$true] %s2276_s21 }
 0x2bd   :  { %v2558_v23 = vpop.eup %2557  ;;  %v1496_v49 = vadd.f32 1.0, %v2556_v7 }
 0x2be   :  { %v1945_v24 = vpop.f32.mrf.mxu2  ;;  %v1497_v37 = vadd.f32 1.0, %v2558_v23 }
 0x2bf   :  { %v1946_v54 = vadd.f32 %v3589_v0, %v1945_v24  ;;  %v2154_v6 = vpop.f32.mrf.mxu3  ;;  %v1624_v41 = vmul.f32 0.5, %v1496_v49 }
 0x2c0   :  { %v1625_v15 = vmul.f32 0.5, %v1497_v37 }
 0x2c1   :  { %v2155_v61 = vadd.f32 %v2154_v6, %v1946_v54  ;;  %v1752_v10 = vmul.f32 %v1624_v41, %v3799_v25 }
 0x2c2   :  { %v1753_v34 = vmul.f32 %v1625_v15, %v600_v43 }
 0x2c3   :  { %2254 = vst [vmem:[#allocation10 + $0x170] sm:$0xff] %v2155_v61  ;;  %1995 = vmatmul.f32.gmra.mxu2 %v1752_v10 }
 0x2c4   :  { %2204 = vmatmul.f32.gmra.mxu3 %v1753_v34 }
 0x2c6   :  { %v1948_v26 = vpop.f32.mrf.mxu2 }
 0x2c7   :  { %v1949_v46 = vadd.f32 %v3589_v0, %v1948_v26  ;;  %v2157_v62 = vpop.f32.mrf.mxu3 }
 0x2c9   :  { %v2158_v48 = vadd.f32 %v2157_v62, %v1949_v46 }
 0x2cb   :  { %2255 = vst [vmem:[#allocation10 + $0x178] sm:$0xff] %v2158_v48 }
 0x2ce   :  { %v1951_v63 = vpop.f32.mrf.mxu2 }
 0x2cf   :  { %v1952_v51 = vadd.f32 %v3589_v0, %v1951_v63  ;;  %v2160_v44 = vpop.f32.mrf.mxu3 }
 0x2d1   :  { %v2161_v4 = vadd.f32 %v2160_v44, %v1952_v51 }
 0x2d3   :  { %2256 = vst [vmem:[#allocation10 + $0x180] sm:$0xff] %v2161_v4 }
 0x2d6   :  { %v1954_v2 = vpop.f32.mrf.mxu2 }
 0x2d7   :  { %v1955_v5 = vadd.f32 %v3589_v0, %v1954_v2  ;;  %v2163_v25 = vpop.f32.mrf.mxu3 }
 0x2d9   :  { %v2164_v56 = vadd.f32 %v2163_v25, %v1955_v5 }
 0x2db   :  { %2257 = vst [vmem:[#allocation10 + $0x188] sm:$0xff] %v2164_v56 }
 0x2de   :  { %v1957_v11 = vpop.f32.mrf.mxu2 }
 0x2df   :  { %v1958_v59 = vadd.f32 %v3589_v0, %v1957_v11  ;;  %v2166_v43 = vpop.f32.mrf.mxu3 }
 0x2e1   :  { %v2167_v8 = vadd.f32 %v2166_v43, %v1958_v59 }
 0x2e3   :  { %2258 = vst [vmem:[#allocation10 + $0x190] sm:$0xff] %v2167_v8 }
 0x2e6   :  { %v1960_v32 = vpop.f32.mrf.mxu2 }
 0x2e7   :  { %v1961_v19 = vadd.f32 %v3589_v0, %v1960_v32  ;;  %v2169_v14 = vpop.f32.mrf.mxu3 }
 0x2e9   :  { %v2170_v36 = vadd.f32 %v2169_v14, %v1961_v19 }
 0x2eb   :  { %2259 = vst [vmem:[#allocation10 + $0x198] sm:$0xff] %v2170_v36 }
 0x2ee   :  { %v1963_v13 = vpop.f32.mrf.mxu2 }
 0x2ef   :  { %v1964_v17 = vadd.f32 %v3589_v0, %v1963_v13  ;;  %v2172_v28 = vpop.f32.mrf.mxu3 }
 0x2f1   :  { %v2173_v3 = vadd.f32 %v2172_v28, %v1964_v17 }
 0x2f3   :  { %2260 = vst [vmem:[#allocation10 + $0x1a0] sm:$0xff] %v2173_v3 }
 0x2f6   :  { %v1966_v1 = vpop.f32.mrf.mxu2 }
 0x2f7   :  { %v1967_v58 = vadd.f32 %v3589_v0, %v1966_v1  ;;  %v2175_v52 = vpop.f32.mrf.mxu3 }
 0x2f9   :  { %v2176_v18 = vadd.f32 %v2175_v52, %v1967_v58 }
 0x2fb   :  { %2261 = vst [vmem:[#allocation10 + $0x1a8] sm:$0xff] %v2176_v18 }
 0x2fe   :  { %v1969_v9 = vpop.f32.mrf.mxu2 }
 0x2ff   :  { %v1970_v55 = vadd.f32 %v3589_v0, %v1969_v9  ;;  %v2178_v22 = vpop.f32.mrf.mxu3 }
 0x301   :  { %v2179_v29 = vadd.f32 %v2178_v22, %v1970_v55 }
 0x303   :  { %2262 = vst [vmem:[#allocation10 + $0x1b0] sm:$0xff] %v2179_v29 }
 0x306   :  { %v1972_v27 = vpop.f32.mrf.mxu2 }
 0x307   :  { %v1973_v16 = vadd.f32 %v3589_v0, %v1972_v27  ;;  %v2181_v30 = vpop.f32.mrf.mxu3 }
 0x309   :  { %v2182_v20 = vadd.f32 %v2181_v30, %v1973_v16 }
 0x30b   :  { %2263 = vst [vmem:[#allocation10 + $0x1b8] sm:$0xff] %v2182_v20 }
 0x30e   :  { %v1975_v42 = vpop.f32.mrf.mxu2 }
 0x30f   :  { %v1976_v35 = vadd.f32 %v3589_v0, %v1975_v42  ;;  %v2184_v39 = vpop.f32.mrf.mxu3 }
 0x311   :  { %v2185_v50 = vadd.f32 %v2184_v39, %v1976_v35 }
 0x313   :  { %2264 = vst [vmem:[#allocation10 + $0x1c0] sm:$0xff] %v2185_v50 }
 0x316   :  { %v1978_v40 = vpop.f32.mrf.mxu2 }
 0x317   :  { %v1979_v38 = vadd.f32 %v3589_v0, %v1978_v40  ;;  %v2187_v33 = vpop.f32.mrf.mxu3 }
 0x319   :  { %v2188_v21 = vadd.f32 %v2187_v33, %v1979_v38 }
 0x31b   :  { %2265 = vst [vmem:[#allocation10 + $0x1c8] sm:$0xff] %v2188_v21 }
 0x31e   :  { %v1981_v45 = vpop.f32.mrf.mxu2 }
 0x31f   :  { %v1982_v57 = vadd.f32 %v3589_v0, %v1981_v45  ;;  %v2190_v60 = vpop.f32.mrf.mxu3 }
 0x321   :  { %v2191_v31 = vadd.f32 %v2190_v60, %v1982_v57 }
 0x323   :  { %2266 = vst [vmem:[#allocation10 + $0x1d0] sm:$0xff] %v2191_v31 }
 0x326   :  { %v1984_v12 = vpop.f32.mrf.mxu2 }
 0x327   :  { %v1985_v47 = vadd.f32 %v2561_v53, %v1984_v12  ;;  %v2193_v7 = vpop.f32.mrf.mxu3 }
 0x329   :  { %v2194_v23 = vadd.f32 %v2193_v7, %v1985_v47 }
 0x32b   :  { %2267 = vst [vmem:[#allocation10 + $0x1d8] sm:$0xff] %v2194_v23 }
 0x32e   :  { %v1987_v49 = vpop.f32.mrf.mxu2 }
 0x32f   :  { %v1988_v24 = vadd.f32 %v2561_v53, %v1987_v49  ;;  %v2196_v37 = vpop.f32.mrf.mxu3 }
 0x331   :  { %v2197_v54 = vadd.f32 %v2196_v37, %v1988_v24 }
 0x333   :  { %2268 = vst [vmem:[#allocation10 + $0x1e0] sm:$0xff] %v2197_v54 }
 0x336   :  { %v1990_v6 = vpop.f32.mrf.mxu2 }
 0x337   :  { %v1991_v41 = vadd.f32 %v2561_v53, %v1990_v6  ;;  %v2199_v0 = vpop.f32.mrf.mxu3 }
 0x339   :  { %v2200_v15 = vadd.f32 %v2199_v0, %v1991_v41 }
 0x33b   :  { %2269 = vst [vmem:[#allocation10 + $0x1e8] sm:$0xff] %v2200_v15 }
 0x33e   :  { %v1993_v61 = vpop.f32.mrf.mxu2 }
 0x33f   :  { %v1994_v10 = vadd.f32 %v2561_v53, %v1993_v61  ;;  %v2202_v34 = vpop.f32.mrf.mxu3 }
 0x341   :  { %v2203_v26 = vadd.f32 %v2202_v34, %v1994_v10 }
 0x343   :  { %2270 = vst [vmem:[#allocation10 + $0x1f0] sm:$0xff] %v2203_v26 }
 0x346   :  { %v1996_v46 = vpop.f32.mrf.mxu2 }
 0x347   :  { %v1997_v62 = vadd.f32 %v2561_v53, %v1996_v46  ;;  %v2205_v48 = vpop.f32.mrf.mxu3 }
 0x349   :  { %v2206_v63 = vadd.f32 %v2205_v48, %v1997_v62 }
 0x34b   :  { %2271 = vst [vmem:[#allocation10 + $0x1f8] sm:$0xff] %v2206_v63 }
 0x34c   :  { %2284 = dma.vmem_to_hbm [thread:$0]  %s2277_s21, 8192, %s2279_s24, [#allocation4], %s2694_s30, %s2694_s30, %s2695_s6  }
 0x34d   :  { %2688 = dma.done.wait [#allocation4], 8192  }
 0x34e   :  { %2689 = vsyncadd [#allocation4], 4294959104 }
 0x34f   :  { %2289 = vsyncpa [#allocation3], 1 }
 0x350   :  { %2290 = vsyncpa [#allocation6], 1 }
 0x351   :  { %2291 = vsyncpa [#allocation9], 1 }
 0x352   :  { %2292 = vsyncpa [#allocation4], 1 }

</bundles_post_ra>
